<compile_context>
chip_gen: v7x
topology: tpu7x:2x2x1
jax: 0.10.0
libtpu: 0.0.40
codegen_flags: <defaults>
</compile_context>

<pallas_src>
import functools

import jax
import jax.numpy as jnp
from jax import lax
from jax.experimental import pallas as pl
from jax.experimental.pallas import tpu as pltpu


_LANE = 128        # lane width: pad output channels / offset channels to this multiple
_BN_EPS = 1e-5     # torch.nn.BatchNorm2d default eps


def _round_up(x, m):
    return (x + m - 1) // m * m


def _vmem_budget():
    """Scoped-VMEM budget derived from the local chip's physical VMEM."""
    cap = 64 << 20                      # conservative fallback (v7x physical size)
    try:
        info = pltpu.get_tpu_info()
        c = int(getattr(info, "vmem_capacity_bytes", 0))
        if c > 0:
            cap = c
    except Exception:
        pass
    # 3/4 of physical, never above 96 MiB: 96 MiB on 128-MiB v5e/v6e, 48 MiB on 64-MiB v7x.
    return min((cap * 3) // 4, 96 << 20)


def _pick_tile_m(M, K, Cpad, OffPad, budget):
    """Largest M-tile whose double-buffered VMEM footprint fits the scoped budget."""
    per_row = 2 * max(K * 2 + OffPad * 4,          # offset pass: bf16 cols in, f32 offsets out
                      2 * K * 2 + Cpad * 4)        # gated passes: bf16 dcols+cols in, f32 out
    weights = 2 * (K * OffPad * 2 + 2 * K * Cpad * 2 + 8 * Cpad * 4)
    avail = max(budget - weights - (6 << 20), per_row * 8)
    cap = 1024 if budget <= (48 << 20) else 2048   # v7x (64 MiB VMEM) vs v5e/v6e (128 MiB)
    tile = min(cap, avail // per_row, _round_up(M, 8))
    # keep >= ~4 grid steps when M is large so both v7x TensorCores stay busy
    if M >= 4 * 256:
        tile = min(tile, max(256, _round_up(-(-M // 4), 8)))
    return int(max(8, (tile // 8) * 8))


def _compiler_params(budget):
    return pltpu.CompilerParams(
        dimension_semantics=("parallel",),
        vmem_limit_bytes=int(budget),
    )


# ----------------------------- Pallas kernels ------------------------------ #

def _offset_kernel(cols_ref, w_ref, b_ref, off_ref):
    """Offset-conv GEMM over one M-tile of im2col columns (lane-dense padded output)."""
    off_ref[...] = (
        jnp.dot(cols_ref[...], w_ref[...], preferred_element_type=jnp.float32)
        + b_ref[...]
    )


def offset_gemm(cols, w_off, b_off, tile_m, budget):
    """cols: (Mp, K) bf16 -> offsets (Mp, OffPad) f32 (zero-padded past 2*kh*kw)."""
    Mp, K = cols.shape
    OffPad = w_off.shape[1]
    nt = Mp // tile_m
    cost = pl.CostEstimate(
        flops=2 * Mp * K * OffPad,
        transcendentals=0,
        bytes_accessed=Mp * K * 2 + Mp * OffPad * 4 + K * OffPad * 2,
    )
    return pl.pallas_call(
        _offset_kernel,
        out_shape=jax.ShapeDtypeStruct((Mp, OffPad), jnp.float32),
        grid=(nt,),
        in_specs=[
            pl.BlockSpec((tile_m, K), lambda i: (i, 0)),
            pl.BlockSpec((K, OffPad), lambda i: (0, 0)),
            pl.BlockSpec((1, OffPad), lambda i: (0, 0)),
        ],
        out_specs=pl.BlockSpec((tile_m, OffPad), lambda i: (i, 0)),
        compiler_params=_compiler_params(budget),
        cost_estimate=cost,
    )(cols, w_off, b_off)


def _gated_value(dcols, cols, wd, bd, wm, bm):
    """Shared body: deform GEMM + mask GEMM + relu(x)*sigmoid(mask), all f32 acc."""
    x = jnp.dot(dcols, wd, preferred_element_type=jnp.float32) + bd
    m = jnp.dot(cols, wm, preferred_element_type=jnp.float32) + bm
    gate = 1.0 / (1.0 + jnp.exp(-m))     # exact sigmoid: EUP exp + exact divide
    return jnp.maximum(x, 0.0) * gate


def _gated_stats_kernel(dcols_ref, cols_ref, wd_ref, bd_ref, wm_ref, bm_ref,
                        gsum_ref, gsq_ref, *, tile_m, m_valid):
    """Pass 1: gated value + per-tile partial BN statistics (padded rows masked)."""
    g = _gated_value(dcols_ref[...], cols_ref[...], wd_ref[...], bd_ref[...],
                     wm_ref[...], bm_ref[...])
    row = (pl.program_id(0) * tile_m
           + lax.broadcasted_iota(jnp.int32, g.shape, 0))
    valid = (row < m_valid).astype(jnp.float32)
    gv = g * valid
    gsum_ref[...] = jnp.sum(gv, axis=0, keepdims=True).reshape(1, 1, -1)
    gsq_ref[...] = jnp.sum(gv * g, axis=0, keepdims=True).reshape(1, 1, -1)


def gated_stats(dcols, cols, w_d, b_d, w_m, b_m, tile_m, m_valid, budget):
    Mp, K = dcols.shape
    Cpad = w_d.shape[1]
    nt = Mp // tile_m
    cost = pl.CostEstimate(
        flops=4 * Mp * K * Cpad + 10 * Mp * Cpad,
        transcendentals=Mp * Cpad,
        bytes_accessed=2 * Mp * K * 2 + 2 * nt * Cpad * 4 + 2 * K * Cpad * 2,
    )
    kern = functools.partial(_gated_stats_kernel, tile_m=tile_m, m_valid=m_valid)
    return pl.pallas_call(
        kern,
        out_shape=(jax.ShapeDtypeStruct((nt, 1, Cpad), jnp.float32),
                   jax.ShapeDtypeStruct((nt, 1, Cpad), jnp.float32)),
        grid=(nt,),
        in_specs=[
            pl.BlockSpec((tile_m, K), lambda i: (i, 0)),
            pl.BlockSpec((tile_m, K), lambda i: (i, 0)),
            pl.BlockSpec((K, Cpad), lambda i: (0, 0)),
            pl.BlockSpec((1, Cpad), lambda i: (0, 0)),
            pl.BlockSpec((K, Cpad), lambda i: (0, 0)),
            pl.BlockSpec((1, Cpad), lambda i: (0, 0)),
        ],
        out_specs=(pl.BlockSpec((1, 1, Cpad), lambda i: (i, 0, 0)),
                   pl.BlockSpec((1, 1, Cpad), lambda i: (i, 0, 0))),
        compiler_params=_compiler_params(budget),
        cost_estimate=cost,
    )(dcols, cols, w_d, b_d, w_m, b_m)


def _gated_bn_kernel(dcols_ref, cols_ref, wd_ref, bd_ref, wm_ref, bm_ref,
                     scale_ref, shift_ref, o_ref):
    """Pass 2: recompute the gated value and apply the folded BN scale/shift."""
    g = _gated_value(dcols_ref[...], cols_ref[...], wd_ref[...], bd_ref[...],
                     wm_ref[...], bm_ref[...])
    o_ref[...] = g * scale_ref[...] + shift_ref[...]


def gated_bn(dcols, cols, w_d, b_d, w_m, b_m, scale, shift, tile_m, budget):
    Mp, K = dcols.shape
    Cpad = w_d.shape[1]
    nt = Mp // tile_m
    cost = pl.CostEstimate(
        flops=4 * Mp * K * Cpad + 8 * Mp * Cpad,
        transcendentals=Mp * Cpad,
        bytes_accessed=2 * Mp * K * 2 + Mp * Cpad * 4 + 2 * K * Cpad * 2,
    )
    return pl.pallas_call(
        _gated_bn_kernel,
        out_shape=jax.ShapeDtypeStruct((Mp, Cpad), jnp.float32),
        grid=(nt,),
        in_specs=[
            pl.BlockSpec((tile_m, K), lambda i: (i, 0)),
            pl.BlockSpec((tile_m, K), lambda i: (i, 0)),
            pl.BlockSpec((K, Cpad), lambda i: (0, 0)),
            pl.BlockSpec((1, Cpad), lambda i: (0, 0)),
            pl.BlockSpec((K, Cpad), lambda i: (0, 0)),
            pl.BlockSpec((1, Cpad), lambda i: (0, 0)),
            pl.BlockSpec((1, Cpad), lambda i: (0, 0)),
            pl.BlockSpec((1, Cpad), lambda i: (0, 0)),
        ],
        out_specs=pl.BlockSpec((tile_m, Cpad), lambda i: (i, 0)),
        compiler_params=_compiler_params(budget),
        cost_estimate=cost,
    )(dcols, cols, w_d, b_d, w_m, b_m, scale, shift)


# ------------------------------- JAX glue ----------------------------------- #

def im2col(x, kh, kw, stride, padding, dilation):
    """x: (N, C, H, W) -> cols (N*Hout*Wout, C*kh*kw) in x.dtype, plus Hout, Wout."""
    N, C, H, W = x.shape
    Hout = (H + 2 * padding - dilation * (kh - 1) - 1) // stride + 1
    Wout = (W + 2 * padding - dilation * (kw - 1) - 1) // stride + 1
    xp = jnp.pad(x, ((0, 0), (0, 0), (padding, padding), (padding, padding)))
    patches = []
    for i in range(kh):
        for j in range(kw):
            p = lax.slice(
                xp,
                (0, 0, i * dilation, j * dilation),
                (N, C,
                 i * dilation + (Hout - 1) * stride + 1,
                 j * dilation + (Wout - 1) * stride + 1),
                (1, 1, stride, stride),
            )  # (N, C, Hout, Wout)
            patches.append(p)
    cols = jnp.stack(patches, axis=2)                 # (N, C, kh*kw, Hout, Wout)
    cols = cols.transpose(0, 3, 4, 1, 2)              # (N, Hout, Wout, C, kh*kw)
    return cols.reshape(N * Hout * Wout, C * kh * kw), Hout, Wout


def deform_im2col(x, offsets, kh, kw, stride, padding, dilation, Hout, Wout):
    """Deformable im2col with bilinear sampling (zero outside image), NHWC gather.

    x: (N, C, H, W) bf16; offsets: (N*Hout*Wout, 2*kh*kw) f32, channel 2k -> dh,
    2k+1 -> dw.  Returns (N*Hout*Wout, C*kh*kw) bf16.
    """
    # TODO(synk): data-dependent bilinear gather kept in plain JAX (NHWC so C sits on
    # lanes); a Pallas version with scalar-prefetched / DMA'd row indices is the next step.
    N, C, H, W = x.shape
    off = offsets.reshape(N, Hout, Wout, kh * kw, 2)
    dh = off[..., 0].reshape(N, Hout, Wout, kh, kw)
    dw = off[..., 1].reshape(N, Hout, Wout, kh, kw)

    ho = jnp.arange(Hout, dtype=jnp.float32)
    wo = jnp.arange(Wout, dtype=jnp.float32)
    ki = jnp.arange(kh, dtype=jnp.float32)
    kj = jnp.arange(kw, dtype=jnp.float32)
    base_h = (ho[:, None, None, None] * stride - padding
              + ki[None, None, :, None] * dilation)          # (Hout,1,kh,1)
    base_w = (wo[None, :, None, None] * stride - padding
              + kj[None, None, None, :] * dilation)          # (1,Wout,1,kw)
    sh = base_h[None] + dh                                    # (N,Hout,Wout,kh,kw)
    sw = base_w[None] + dw

    h0 = jnp.floor(sh)
    w0 = jnp.floor(sw)
    lh = sh - h0
    lw = sw - w0
    h0i = h0.astype(jnp.int32)
    w0i = w0.astype(jnp.int32)

    x_nhwc = x.transpose(0, 2, 3, 1).reshape(N, H * W, C)     # channels on lanes (bf16)
    L = Hout * Wout * kh * kw

    def corner(hi, wi, wgt):
        valid = ((hi >= 0) & (hi < H) & (wi >= 0) & (wi < W)).astype(jnp.float32)
        idx = jnp.clip(hi, 0, H - 1) * W + jnp.clip(wi, 0, W - 1)
        idx_flat = jnp.broadcast_to(idx.reshape(N, L, 1), (N, L, C))
        gath = jnp.take_along_axis(x_nhwc, idx_flat, axis=1)  # (N, L, C) bf16
        gath = gath.reshape(N, Hout, Wout, kh, kw, C)
        return gath * (wgt * valid)[..., None]                 # promotes to f32

    vals = (corner(h0i,     w0i,     (1.0 - lh) * (1.0 - lw))
            + corner(h0i,     w0i + 1, (1.0 - lh) * lw)
            + corner(h0i + 1, w0i,     lh * (1.0 - lw))
            + corner(h0i + 1, w0i + 1, lh * lw))
    # (N, Hout, Wout, kh, kw, C) -> (N, Hout, Wout, C, kh, kw)
    vals = vals.transpose(0, 1, 2, 5, 3, 4)
    return vals.reshape(N * Hout * Wout, C * kh * kw).astype(jnp.bfloat16)


def gated_deform_conv_forward(x, params, *, kernel_size, stride, padding, dilation):
    """Forward pass of GatedDeformConvWithActivation (ReLU activation, BN on)."""
    N, Cin, H, W = x.shape
    kh = kw = kernel_size
    Cout = params["w_deform"].shape[0]
    K = Cin * kh * kw
    OffC = 2 * kh * kw
    OffPad = _round_up(OffC, _LANE)       # lane-dense offset-GEMM output
    Cpad = _round_up(Cout, _LANE)         # lane-dense output channels

    budget = _vmem_budget()

    # im2col columns directly in bf16 (halves the stack/transpose bytes and the GEMM reads)
    x_bf = x.astype(jnp.bfloat16)
    cols, Hout, Wout = im2col(x_bf, kh, kw, stride, padding, dilation)    # (M, K) bf16
    M = cols.shape[0]

    tile = _pick_tile_m(M, K, Cpad, OffPad, budget)
    Mp = _round_up(M, tile)
    cols_p = jnp.pad(cols, ((0, Mp - M), (0, 0)))                          # bf16, pad only

    # --- offset-conv GEMM (lane-dense 128-wide slab, dense vst) ---
    w_off = jnp.pad(params["w_offset"].reshape(OffC, K).T,
                    ((0, 0), (0, OffPad - OffC))).astype(jnp.bfloat16)     # (K, OffPad)
    b_off = jnp.pad(params["b_offset"].reshape(1, OffC),
                    ((0, 0), (0, OffPad - OffC))).astype(jnp.float32)
    offsets = offset_gemm(cols_p, w_off, b_off, tile, budget)[:M, :OffC]   # (M, OffC) f32

    # --- deformable im2col with the predicted offsets (plain-JAX gather, bf16 out) ---
    dcols = deform_im2col(x_bf, offsets, kh, kw, stride, padding, dilation, Hout, Wout)
    dcols_p = jnp.pad(dcols, ((0, Mp - M), (0, 0)))                        # bf16

    w_d = jnp.pad(params["w_deform"].reshape(Cout, K).T,
                  ((0, 0), (0, Cpad - Cout))).astype(jnp.bfloat16)          # (K, Cpad)
    b_d = jnp.pad(params["b_deform"].reshape(1, Cout),
                  ((0, 0), (0, Cpad - Cout))).astype(jnp.float32)
    w_m = jnp.pad(params["w_mask"].reshape(Cout, K).T,
                  ((0, 0), (0, Cpad - Cout))).astype(jnp.bfloat16)          # (K, Cpad)
    b_m = jnp.pad(params["b_mask"].reshape(1, Cout),
                  ((0, 0), (0, Cpad - Cout))).astype(jnp.float32)

    # --- pass 1: deform GEMM + mask GEMM + gating + partial BN stats (tiny outputs) ---
    gsum, gsq = gated_stats(dcols_p, cols_p, w_d, b_d, w_m, b_m, tile, M, budget)

    # --- tiny cross-tile reduce -> training-mode BN (biased batch variance) ---
    mean = jnp.sum(gsum, axis=(0, 1)) / float(M)                           # (Cpad,)
    var = jnp.maximum(jnp.sum(gsq, axis=(0, 1)) / float(M) - mean * mean, 0.0)
    gamma = jnp.pad(params["gamma"], (0, Cpad - Cout))
    beta = jnp.pad(params["beta"], (0, Cpad - Cout))
    scale = (gamma * lax.rsqrt(var + _BN_EPS)).reshape(1, -1).astype(jnp.float32)
    shift = (beta.reshape(1, -1) - mean.reshape(1, -1) * scale).astype(jnp.float32)
    # TODO(synk): BatchNorm running_mean/running_var are not updated (forward-only batch stats).

    # --- pass 2: recompute gated value, apply folded BN scale/shift, write f32 output ---
    out = gated_bn(dcols_p, cols_p, w_d, b_d, w_m, b_m, scale, shift, tile, budget)

    out = out[:M, :Cout].reshape(N, Hout, Wout, Cout).transpose(0, 3, 1, 2)  # NCHW
    return out


def init_params(key, in_channels, out_channels, kernel_size):
    kh = kw = kernel_size
    ks = jax.random.split(key, 6)
    scale = 1.0 / jnp.sqrt(in_channels * kh * kw)
    params = {
        # DeformConvPack: main deform-conv weight/bias
        "w_deform": scale * jax.random.normal(ks[0], (out_channels, in_channels, kh, kw), jnp.float32),
        "b_deform": scale * jax.random.normal(ks[1], (out_channels,), jnp.float32),
        # DeformConvPack: internal offset conv (2*kh*kw channels); small values so
        # the bilinear sampling path is actually exercised
        "w_offset": 0.1 * scale * jax.random.normal(ks[2], (2 * kh * kw, in_channels, kh, kw), jnp.float32),
        "b_offset": 0.05 * jax.random.normal(ks[3], (2 * kh * kw,), jnp.float32),
        # mask conv (plain Conv2d)
        "w_mask": scale * jax.random.normal(ks[4], (out_channels, in_channels, kh, kw), jnp.float32),
        "b_mask": scale * jax.random.normal(ks[5], (out_channels,), jnp.float32),
        # BatchNorm2d affine params (default init gamma=1, beta=0)
        "gamma": jnp.ones((out_channels,), jnp.float32),
        "beta": jnp.zeros((out_channels,), jnp.float32),
    }
    return params


if __name__ == "__main__":
    key = jax.random.PRNGKey(0)
    k_x, k_p = jax.random.split(key)

    N, Cin, H, W = 2, 4, 16, 16
    Cout, ksize, stride, padding, dilation = 4, 3, 1, 1, 1

    x = jax.random.normal(k_x, (N, Cin, H, W), jnp.float32)
    params = init_params(k_p, Cin, Cout, ksize)

    fwd = jax.jit(functools.partial(
        gated_deform_conv_forward,
        kernel_size=ksize, stride=stride, padding=padding, dilation=dilation))
    out = fwd(x, params)
    out = jax.block_until_ready(out)
    assert out.shape == (N, Cout, H, W), out.shape
    assert bool(jnp.isfinite(out).all())
    print("KERNEL_OK")
</pallas_src>

<mosaic_0001>
module attributes {stable_mosaic.version = 11 : i64} {
  func.func @_offset_kernel(%arg0: i32, %arg1: memref<512x36xbf16, #tpu.memory_space<vmem>>, %arg2: memref<36x128xbf16, #tpu.memory_space<vmem>>, %arg3: memref<1x128xf32, #tpu.memory_space<vmem>>, %arg4: memref<512x128xf32, #tpu.memory_space<vmem>>) attributes {dimension_semantics = [#tpu.dimension_semantics<parallel>], iteration_bounds = array<i64: 1>, scalar_prefetch = 0 : i64, scratch_operands = 0 : i64, tpu.core_type = #tpu.core_type<tc>, window_params = [{transform_indices = @transform_0, window_bounds = array<i64: 512, 36>}, {pipeline_mode = #tpu.pipeline_mode<synchronous>, transform_indices = @transform_1, window_bounds = array<i64: 36, 128>}, {pipeline_mode = #tpu.pipeline_mode<synchronous>, transform_indices = @transform_2, window_bounds = array<i64: 1, 128>}, {transform_indices = @transform_3, window_bounds = array<i64: 512, 128>}]} {
    %c0 = arith.constant 0 : index
    %c0_0 = arith.constant 0 : index
    %0 = vector.load %arg1[%c0, %c0_0] : memref<512x36xbf16, #tpu.memory_space<vmem>>, vector<512x36xbf16>
    %c0_1 = arith.constant 0 : index
    %c0_2 = arith.constant 0 : index
    %1 = vector.load %arg2[%c0_1, %c0_2] : memref<36x128xbf16, #tpu.memory_space<vmem>>, vector<36x128xbf16>
    %cst = arith.constant dense<0.000000e+00> : vector<512x128xf32>
    %2 = tpu.matmul %0, %1, %cst {dimension_numbers = #tpu.dot_dimension_numbers<[1], [0], [0], [1], [0, 0, 1, 1], [], []>} : vector<512x36xbf16>, vector<36x128xbf16>, vector<512x128xf32> -> vector<512x128xf32>
    %c0_3 = arith.constant 0 : index
    %c0_4 = arith.constant 0 : index
    %3 = vector.load %arg3[%c0_3, %c0_4] : memref<1x128xf32, #tpu.memory_space<vmem>>, vector<1x128xf32>
    %4 = vector.broadcast %3 : vector<1x128xf32> to vector<512x128xf32>
    %5 = arith.addf %2, %4 : vector<512x128xf32>
    %c0_5 = arith.constant 0 : index
    %c0_6 = arith.constant 0 : index
    %6 = vector.load %arg4[%c0_5, %c0_6] : memref<512x128xf32, #tpu.memory_space<vmem>>, vector<512x128xf32>
    tpu.vector_store %arg4[%c0_5, %c0_6], %5 {strides = array<i32>} : memref<512x128xf32, #tpu.memory_space<vmem>>, vector<512x128xf32>,
    return
  }
  func.func @transform_0(%arg0: i32) -> (i32, i32) {
    %c0_i32 = arith.constant 0 : i32
    %c0_i32_0 = arith.constant 0 : i32
    return %arg0, %c0_i32 : i32, i32
  }
  func.func @transform_1(%arg0: i32) -> (i32, i32) {
    %c0_i32 = arith.constant 0 : i32
    %c0_i32_0 = arith.constant 0 : i32
    %c0_i32_1 = arith.constant 0 : i32
    return %c0_i32, %c0_i32_0 : i32, i32
  }
  func.func @transform_2(%arg0: i32) -> (i32, i32) {
    %c0_i32 = arith.constant 0 : i32
    %c0_i32_0 = arith.constant 0 : i32
    %c0_i32_1 = arith.constant 0 : i32
    return %c0_i32, %c0_i32_0 : i32, i32
  }
  func.func @transform_3(%arg0: i32) -> (i32, i32) {
    %c0_i32 = arith.constant 0 : i32
    %c0_i32_0 = arith.constant 0 : i32
    return %arg0, %c0_i32 : i32, i32
  }
}

module attributes {stable_mosaic.version = 11 : i64} {
  func.func @_gated_stats_kernel(%arg0: i32, %arg1: memref<512x36xbf16, #tpu.memory_space<vmem>>, %arg2: memref<512x36xbf16, #tpu.memory_space<vmem>>, %arg3: memref<36x128xbf16, #tpu.memory_space<vmem>>, %arg4: memref<1x128xf32, #tpu.memory_space<vmem>>, %arg5: memref<36x128xbf16, #tpu.memory_space<vmem>>, %arg6: memref<1x128xf32, #tpu.memory_space<vmem>>, %arg7: memref<1x1x128xf32, #tpu.memory_space<vmem>>, %arg8: memref<1x1x128xf32, #tpu.memory_space<vmem>>) attributes {dimension_semantics = [#tpu.dimension_semantics<parallel>], iteration_bounds = array<i64: 1>, scalar_prefetch = 0 : i64, scratch_operands = 0 : i64, tpu.core_type = #tpu.core_type<tc>, window_params = [{transform_indices = @transform_0, window_bounds = array<i64: 512, 36>}, {transform_indices = @transform_1, window_bounds = array<i64: 512, 36>}, {pipeline_mode = #tpu.pipeline_mode<synchronous>, transform_indices = @transform_2, window_bounds = array<i64: 36, 128>}, {pipeline_mode = #tpu.pipeline_mode<synchronous>, transform_indices = @transform_3, window_bounds = array<i64: 1, 128>}, {pipeline_mode = #tpu.pipeline_mode<synchronous>, transform_indices = @transform_4, window_bounds = array<i64: 36, 128>}, {pipeline_mode = #tpu.pipeline_mode<synchronous>, transform_indices = @transform_5, window_bounds = array<i64: 1, 128>}, {transform_indices = @transform_6, window_bounds = array<i64: 1, 1, 128>}, {transform_indices = @transform_7, window_bounds = array<i64: 1, 1, 128>}]} {
    %c0 = arith.constant 0 : index
    %c0_0 = arith.constant 0 : index
    %0 = vector.load %arg1[%c0, %c0_0] : memref<512x36xbf16, #tpu.memory_space<vmem>>, vector<512x36xbf16>
    %c0_1 = arith.constant 0 : index
    %c0_2 = arith.constant 0 : index
    %1 = vector.load %arg2[%c0_1, %c0_2] : memref<512x36xbf16, #tpu.memory_space<vmem>>, vector<512x36xbf16>
    %c0_3 = arith.constant 0 : index
    %c0_4 = arith.constant 0 : index
    %2 = vector.load %arg3[%c0_3, %c0_4] : memref<36x128xbf16, #tpu.memory_space<vmem>>, vector<36x128xbf16>
    %c0_5 = arith.constant 0 : index
    %c0_6 = arith.constant 0 : index
    %3 = vector.load %arg4[%c0_5, %c0_6] : memref<1x128xf32, #tpu.memory_space<vmem>>, vector<1x128xf32>
    %c0_7 = arith.constant 0 : index
    %c0_8 = arith.constant 0 : index
    %4 = vector.load %arg5[%c0_7, %c0_8] : memref<36x128xbf16, #tpu.memory_space<vmem>>, vector<36x128xbf16>
    %c0_9 = arith.constant 0 : index
    %c0_10 = arith.constant 0 : index
    %5 = vector.load %arg6[%c0_9, %c0_10] : memref<1x128xf32, #tpu.memory_space<vmem>>, vector<1x128xf32>
    %cst = arith.constant dense<0.000000e+00> : vector<512x128xf32>
    %6 = tpu.matmul %0, %2, %cst {dimension_numbers = #tpu.dot_dimension_numbers<[1], [0], [0], [1], [0, 0, 1, 1], [], []>} : vector<512x36xbf16>, vector<36x128xbf16>, vector<512x128xf32> -> vector<512x128xf32>
    %7 = vector.broadcast %3 : vector<1x128xf32> to vector<512x128xf32>
    %8 = arith.addf %6, %7 : vector<512x128xf32>
    %cst_11 = arith.constant dense<0.000000e+00> : vector<512x128xf32>
    %9 = tpu.matmul %1, %4, %cst_11 {dimension_numbers = #tpu.dot_dimension_numbers<[1], [0], [0], [1], [0, 0, 1, 1], [], []>} : vector<512x36xbf16>, vector<36x128xbf16>, vector<512x128xf32> -> vector<512x128xf32>
    %10 = vector.broadcast %5 : vector<1x128xf32> to vector<512x128xf32>
    %11 = arith.addf %9, %10 : vector<512x128xf32>
    %cst_12 = arith.constant 0.000000e+00 : f32
    %12 = vector.broadcast %cst_12 : f32 to vector<512x128xf32>
    %13 = arith.subf %12, %11 : vector<512x128xf32>
    %14 = math.exp %13 : vector<512x128xf32>
    %cst_13 = arith.constant 1.000000e+00 : f32
    %15 = vector.broadcast %cst_13 : f32 to vector<512x128xf32>
    %16 = arith.addf %15, %14 : vector<512x128xf32>
    %cst_14 = arith.constant 1.000000e+00 : f32
    %17 = vector.broadcast %cst_14 : f32 to vector<512x128xf32>
    %18 = arith.divf %17, %16 : vector<512x128xf32>
    %cst_15 = arith.constant 0.000000e+00 : f32
    %19 = vector.broadcast %cst_15 : f32 to vector<512x128xf32>
    %20 = arith.maximumf %8, %19 : vector<512x128xf32>
    %21 = arith.mulf %20, %18 : vector<512x128xf32>
    %c512_i32 = arith.constant 512 : i32
    %22 = arith.muli %arg0, %c512_i32 : i32
    %23 = tpu.iota {dimensions = array<i32: 0>} : vector<512x128xi32>
    %24 = vector.broadcast %22 : i32 to vector<512x128xi32>
    %25 = arith.addi %24, %23 : vector<512x128xi32>
    %c512_i32_16 = arith.constant 512 : i32
    %26 = vector.broadcast %c512_i32_16 : i32 to vector<512x128xi32>
    %27 = arith.cmpi slt, %25, %26 : vector<512x128xi32>
    %28 = arith.extui %27 : vector<512x128xi1> to vector<512x128xi32>
    %29 = arith.sitofp %28 : vector<512x128xi32> to vector<512x128xf32>
    %30 = arith.mulf %21, %29 : vector<512x128xf32>
    %cst_17 = arith.constant dense<0.000000e+00> : vector<128xf32>
    %31 = vector.multi_reduction <add>, %30, %cst_17 [0] : vector<512x128xf32> to vector<128xf32>
    %32 = vector.shape_cast %31 : vector<128xf32> to vector<1x128xf32>
    %33 = vector.shape_cast %32 : vector<1x128xf32> to vector<1x1x128xf32>
    %c0_18 = arith.constant 0 : index
    %c0_19 = arith.constant 0 : index
    %c0_20 = arith.constant 0 : index
    %34 = vector.load %arg7[%c0_18, %c0_19, %c0_20] : memref<1x1x128xf32, #tpu.memory_space<vmem>>, vector<1x1x128xf32>
    tpu.vector_store %arg7[%c0_18, %c0_19, %c0_20], %33 {strides = array<i32>} : memref<1x1x128xf32, #tpu.memory_space<vmem>>, vector<1x1x128xf32>,
    %35 = arith.mulf %30, %21 : vector<512x128xf32>
    %cst_21 = arith.constant dense<0.000000e+00> : vector<128xf32>
    %36 = vector.multi_reduction <add>, %35, %cst_21 [0] : vector<512x128xf32> to vector<128xf32>
    %37 = vector.shape_cast %36 : vector<128xf32> to vector<1x128xf32>
    %38 = vector.shape_cast %37 : vector<1x128xf32> to vector<1x1x128xf32>
    %c0_22 = arith.constant 0 : index
    %c0_23 = arith.constant 0 : index
    %c0_24 = arith.constant 0 : index
    %39 = vector.load %arg8[%c0_22, %c0_23, %c0_24] : memref<1x1x128xf32, #tpu.memory_space<vmem>>, vector<1x1x128xf32>
    tpu.vector_store %arg8[%c0_22, %c0_23, %c0_24], %38 {strides = array<i32>} : memref<1x1x128xf32, #tpu.memory_space<vmem>>, vector<1x1x128xf32>,
    return
  }
  func.func @transform_0(%arg0: i32) -> (i32, i32) {
    %c0_i32 = arith.constant 0 : i32
    %c0_i32_0 = arith.constant 0 : i32
    return %arg0, %c0_i32 : i32, i32
  }
  func.func @transform_1(%arg0: i32) -> (i32, i32) {
    %c0_i32 = arith.constant 0 : i32
    %c0_i32_0 = arith.constant 0 : i32
    return %arg0, %c0_i32 : i32, i32
  }
  func.func @transform_2(%arg0: i32) -> (i32, i32) {
    %c0_i32 = arith.constant 0 : i32
    %c0_i32_0 = arith.constant 0 : i32
    %c0_i32_1 = arith.constant 0 : i32
    return %c0_i32, %c0_i32_0 : i32, i32
  }
  func.func @transform_3(%arg0: i32) -> (i32, i32) {
    %c0_i32 = arith.constant 0 : i32
    %c0_i32_0 = arith.constant 0 : i32
    %c0_i32_1 = arith.constant 0 : i32
    return %c0_i32, %c0_i32_0 : i32, i32
  }
  func.func @transform_4(%arg0: i32) -> (i32, i32) {
    %c0_i32 = arith.constant 0 : i32
    %c0_i32_0 = arith.constant 0 : i32
    %c0_i32_1 = arith.constant 0 : i32
    return %c0_i32, %c0_i32_0 : i32, i32
  }
  func.func @transform_5(%arg0: i32) -> (i32, i32) {
    %c0_i32 = arith.constant 0 : i32
    %c0_i32_0 = arith.constant 0 : i32
    %c0_i32_1 = arith.constant 0 : i32
    return %c0_i32, %c0_i32_0 : i32, i32
  }
  func.func @transform_6(%arg0: i32) -> (i32, i32, i32) {
    %c0_i32 = arith.constant 0 : i32
    %c0_i32_0 = arith.constant 0 : i32
    %c0_i32_1 = arith.constant 0 : i32
    return %arg0, %c0_i32, %c0_i32_0 : i32, i32, i32
  }
  func.func @transform_7(%arg0: i32) -> (i32, i32, i32) {
    %c0_i32 = arith.constant 0 : i32
    %c0_i32_0 = arith.constant 0 : i32
    %c0_i32_1 = arith.constant 0 : i32
    return %arg0, %c0_i32, %c0_i32_0 : i32, i32, i32
  }
}

module attributes {stable_mosaic.version = 11 : i64} {
  func.func @_gated_bn_kernel(%arg0: i32, %arg1: memref<512x36xbf16, #tpu.memory_space<vmem>>, %arg2: memref<512x36xbf16, #tpu.memory_space<vmem>>, %arg3: memref<36x128xbf16, #tpu.memory_space<vmem>>, %arg4: memref<1x128xf32, #tpu.memory_space<vmem>>, %arg5: memref<36x128xbf16, #tpu.memory_space<vmem>>, %arg6: memref<1x128xf32, #tpu.memory_space<vmem>>, %arg7: memref<1x128xf32, #tpu.memory_space<vmem>>, %arg8: memref<1x128xf32, #tpu.memory_space<vmem>>, %arg9: memref<512x128xf32, #tpu.memory_space<vmem>>) attributes {dimension_semantics = [#tpu.dimension_semantics<parallel>], iteration_bounds = array<i64: 1>, scalar_prefetch = 0 : i64, scratch_operands = 0 : i64, tpu.core_type = #tpu.core_type<tc>, window_params = [{transform_indices = @transform_0, window_bounds = array<i64: 512, 36>}, {transform_indices = @transform_1, window_bounds = array<i64: 512, 36>}, {pipeline_mode = #tpu.pipeline_mode<synchronous>, transform_indices = @transform_2, window_bounds = array<i64: 36, 128>}, {pipeline_mode = #tpu.pipeline_mode<synchronous>, transform_indices = @transform_3, window_bounds = array<i64: 1, 128>}, {pipeline_mode = #tpu.pipeline_mode<synchronous>, transform_indices = @transform_4, window_bounds = array<i64: 36, 128>}, {pipeline_mode = #tpu.pipeline_mode<synchronous>, transform_indices = @transform_5, window_bounds = array<i64: 1, 128>}, {pipeline_mode = #tpu.pipeline_mode<synchronous>, transform_indices = @transform_6, window_bounds = array<i64: 1, 128>}, {pipeline_mode = #tpu.pipeline_mode<synchronous>, transform_indices = @transform_7, window_bounds = array<i64: 1, 128>}, {transform_indices = @transform_8, window_bounds = array<i64: 512, 128>}]} {
    %c0 = arith.constant 0 : index
    %c0_0 = arith.constant 0 : index
    %0 = vector.load %arg1[%c0, %c0_0] : memref<512x36xbf16, #tpu.memory_space<vmem>>, vector<512x36xbf16>
    %c0_1 = arith.constant 0 : index
    %c0_2 = arith.constant 0 : index
    %1 = vector.load %arg2[%c0_1, %c0_2] : memref<512x36xbf16, #tpu.memory_space<vmem>>, vector<512x36xbf16>
    %c0_3 = arith.constant 0 : index
    %c0_4 = arith.constant 0 : index
    %2 = vector.load %arg3[%c0_3, %c0_4] : memref<36x128xbf16, #tpu.memory_space<vmem>>, vector<36x128xbf16>
    %c0_5 = arith.constant 0 : index
    %c0_6 = arith.constant 0 : index
    %3 = vector.load %arg4[%c0_5, %c0_6] : memref<1x128xf32, #tpu.memory_space<vmem>>, vector<1x128xf32>
    %c0_7 = arith.constant 0 : index
    %c0_8 = arith.constant 0 : index
    %4 = vector.load %arg5[%c0_7, %c0_8] : memref<36x128xbf16, #tpu.memory_space<vmem>>, vector<36x128xbf16>
    %c0_9 = arith.constant 0 : index
    %c0_10 = arith.constant 0 : index
    %5 = vector.load %arg6[%c0_9, %c0_10] : memref<1x128xf32, #tpu.memory_space<vmem>>, vector<1x128xf32>
    %cst = arith.constant dense<0.000000e+00> : vector<512x128xf32>
    %6 = tpu.matmul %0, %2, %cst {dimension_numbers = #tpu.dot_dimension_numbers<[1], [0], [0], [1], [0, 0, 1, 1], [], []>} : vector<512x36xbf16>, vector<36x128xbf16>, vector<512x128xf32> -> vector<512x128xf32>
    %7 = vector.broadcast %3 : vector<1x128xf32> to vector<512x128xf32>
    %8 = arith.addf %6, %7 : vector<512x128xf32>
    %cst_11 = arith.constant dense<0.000000e+00> : vector<512x128xf32>
    %9 = tpu.matmul %1, %4, %cst_11 {dimension_numbers = #tpu.dot_dimension_numbers<[1], [0], [0], [1], [0, 0, 1, 1], [], []>} : vector<512x36xbf16>, vector<36x128xbf16>, vector<512x128xf32> -> vector<512x128xf32>
    %10 = vector.broadcast %5 : vector<1x128xf32> to vector<512x128xf32>
    %11 = arith.addf %9, %10 : vector<512x128xf32>
    %cst_12 = arith.constant 0.000000e+00 : f32
    %12 = vector.broadcast %cst_12 : f32 to vector<512x128xf32>
    %13 = arith.subf %12, %11 : vector<512x128xf32>
    %14 = math.exp %13 : vector<512x128xf32>
    %cst_13 = arith.constant 1.000000e+00 : f32
    %15 = vector.broadcast %cst_13 : f32 to vector<512x128xf32>
    %16 = arith.addf %15, %14 : vector<512x128xf32>
    %cst_14 = arith.constant 1.000000e+00 : f32
    %17 = vector.broadcast %cst_14 : f32 to vector<512x128xf32>
    %18 = arith.divf %17, %16 : vector<512x128xf32>
    %cst_15 = arith.constant 0.000000e+00 : f32
    %19 = vector.broadcast %cst_15 : f32 to vector<512x128xf32>
    %20 = arith.maximumf %8, %19 : vector<512x128xf32>
    %21 = arith.mulf %20, %18 : vector<512x128xf32>
    %c0_16 = arith.constant 0 : index
    %c0_17 = arith.constant 0 : index
    %22 = vector.load %arg7[%c0_16, %c0_17] : memref<1x128xf32, #tpu.memory_space<vmem>>, vector<1x128xf32>
    %23 = vector.broadcast %22 : vector<1x128xf32> to vector<512x128xf32>
    %24 = arith.mulf %21, %23 : vector<512x128xf32>
    %c0_18 = arith.constant 0 : index
    %c0_19 = arith.constant 0 : index
    %25 = vector.load %arg8[%c0_18, %c0_19] : memref<1x128xf32, #tpu.memory_space<vmem>>, vector<1x128xf32>
    %26 = vector.broadcast %25 : vector<1x128xf32> to vector<512x128xf32>
    %27 = arith.addf %24, %26 : vector<512x128xf32>
    %c0_20 = arith.constant 0 : index
    %c0_21 = arith.constant 0 : index
    %28 = vector.load %arg9[%c0_20, %c0_21] : memref<512x128xf32, #tpu.memory_space<vmem>>, vector<512x128xf32>
    tpu.vector_store %arg9[%c0_20, %c0_21], %27 {strides = array<i32>} : memref<512x128xf32, #tpu.memory_space<vmem>>, vector<512x128xf32>,
    return
  }
  func.func @transform_0(%arg0: i32) -> (i32, i32) {
    %c0_i32 = arith.constant 0 : i32
    %c0_i32_0 = arith.constant 0 : i32
    return %arg0, %c0_i32 : i32, i32
  }
  func.func @transform_1(%arg0: i32) -> (i32, i32) {
    %c0_i32 = arith.constant 0 : i32
    %c0_i32_0 = arith.constant 0 : i32
    return %arg0, %c0_i32 : i32, i32
  }
  func.func @transform_2(%arg0: i32) -> (i32, i32) {
    %c0_i32 = arith.constant 0 : i32
    %c0_i32_0 = arith.constant 0 : i32
    %c0_i32_1 = arith.constant 0 : i32
    return %c0_i32, %c0_i32_0 : i32, i32
  }
  func.func @transform_3(%arg0: i32) -> (i32, i32) {
    %c0_i32 = arith.constant 0 : i32
    %c0_i32_0 = arith.constant 0 : i32
    %c0_i32_1 = arith.constant 0 : i32
    return %c0_i32, %c0_i32_0 : i32, i32
  }
  func.func @transform_4(%arg0: i32) -> (i32, i32) {
    %c0_i32 = arith.constant 0 : i32
    %c0_i32_0 = arith.constant 0 : i32
    %c0_i32_1 = arith.constant 0 : i32
    return %c0_i32, %c0_i32_0 : i32, i32
  }
  func.func @transform_5(%arg0: i32) -> (i32, i32) {
    %c0_i32 = arith.constant 0 : i32
    %c0_i32_0 = arith.constant 0 : i32
    %c0_i32_1 = arith.constant 0 : i32
    return %c0_i32, %c0_i32_0 : i32, i32
  }
  func.func @transform_6(%arg0: i32) -> (i32, i32) {
    %c0_i32 = arith.constant 0 : i32
    %c0_i32_0 = arith.constant 0 : i32
    %c0_i32_1 = arith.constant 0 : i32
    return %c0_i32, %c0_i32_0 : i32, i32
  }
  func.func @transform_7(%arg0: i32) -> (i32, i32) {
    %c0_i32 = arith.constant 0 : i32
    %c0_i32_0 = arith.constant 0 : i32
    %c0_i32_1 = arith.constant 0 : i32
    return %c0_i32, %c0_i32_0 : i32, i32
  }
  func.func @transform_8(%arg0: i32) -> (i32, i32) {
    %c0_i32 = arith.constant 0 : i32
    %c0_i32_0 = arith.constant 0 : i32
    return %arg0, %c0_i32 : i32, i32
  }
}

</mosaic_0001>

<bundles_post_ra>
// kernel: gated_deform_conv_forward.3
= control target key start
LH: loop header
LB: loop body
LE: loop exit
PB: predicated region body
PF: predicated region fallthrough
CT: control target
= control target key end

     0   :  { %vm266_vm0 = vcmask 293888   ;;  %vm363_vm1 = vcmask 1041408   ;;  %s1358_s1 = inlined_call_operand.vmem [shape: bf16[36,128], index: 1, kind: input, shape index: {}]   ;;  %s1359_s0 = inlined_call_operand.vmem [shape: bf16[512,36], index: 0, kind: input, shape index: {}]   ;;  %s1360_s2 = inlined_call_operand.vmem [shape: f32[1,128], index: 2, kind: input, shape index: {}]   ;;  %s1361_s3 = inlined_call_operand.vmem [shape: f32[512,128], index: 3, kind: output, shape index: {}]  }
   0x1   :  { %v905_v0 = vld [vmem:[%s1358_s1] sm:$0xff]   ;;  %v906_v1 = vld [vmem:[%s1358_s1 + $0x8] sm:$0xff]   ;;  %v907_v2 = vld [vmem:[%s1358_s1 + $0x10] ss:$0 sps:$4 sm:$0x33]  }
   0x2   :  { %827 = vmatprep.subr.bf16.mxu0 %v905_v0  ;;  %897 = vmatprep.subr.bf16.mxu1 %v905_v0  ;;  %v908_v3 = vld [vmem:[%s1359_s0] sm:$0xff]   ;;  %v365_v5 = vsel %vm363_vm1, %v907_v2, 0  ;;  %v910_v6 = vld [vmem:[%s1359_s0 + $0x8] sm:$0xff]   ;;  %v912_v8 = vld [vmem:[%s1359_s0 + $0x10] sm:$0xff]  }
   0x3   :  { %828 = vmatpush3.bf16.msra.mxu0 %v905_v0  ;;  %900 = vmatpush3.bf16.msra.mxu1 %v905_v0  ;;  %v909_v4 = vld [vmem:[%s1359_s0 + $0x80] sm:$0xff]   ;;  %v911_v7 = vld [vmem:[%s1359_s0 + $0x88] sm:$0xff]   ;;  %v913_v9 = vld [vmem:[%s1359_s0 + $0x90] sm:$0xff]  }
   0x4   :  { %829 = vmatprep.subr.bf16.mxu0 %v906_v1  ;;  %898 = vmatprep.subr.bf16.mxu1 %v906_v1  ;;  %v914_v10 = vld [vmem:[%s1359_s0 + $0x18] sm:$0xff]   ;;  %v916_v12 = vld [vmem:[%s1359_s0 + $0x20] sm:$0xff]   ;;  %v918_v14 = vld [vmem:[%s1359_s0 + $0x28] sm:$0xff]  }
   0x5   :  { %833 = vmatprep.mubr.msk.bf16.mxu0 %vm266_vm0, %v908_v3  ;;  %865 = vmatprep.mubr.msk.bf16.mxu1 %vm266_vm0, %v909_v4  ;;  %v915_v11 = vld [vmem:[%s1359_s0 + $0x98] sm:$0xff]   ;;  %v917_v13 = vld [vmem:[%s1359_s0 + $0xa0] sm:$0xff]   ;;  %v919_v15 = vld [vmem:[%s1359_s0 + $0xa8] sm:$0xff]  }
   0x6   :  { %v920_v16 = vld [vmem:[%s1359_s0 + $0x30] sm:$0xff]   ;;  %v922_v18 = vld [vmem:[%s1359_s0 + $0x38] sm:$0xff]   ;;  %v924_v20 = vld [vmem:[%s1359_s0 + $0x40] sm:$0xff]  }
   0x7   :  { %830 = vmatpush3.bf16.msra.mxu0 %v906_v1  ;;  %901 = vmatpush3.bf16.msra.mxu1 %v906_v1  ;;  %v921_v17 = vld [vmem:[%s1359_s0 + $0xb0] sm:$0xff]   ;;  %v923_v19 = vld [vmem:[%s1359_s0 + $0xb8] sm:$0xff]   ;;  %v925_v21 = vld [vmem:[%s1359_s0 + $0xc0] sm:$0xff]  }
   0x8   :  { %903 = vmatprep.subr.msk.bf16.mxu0 %vm363_vm1, %v907_v2  ;;  %904 = vmatprep.subr.msk.bf16.mxu1 %vm363_vm1, %v907_v2  ;;  %v926_v22 = vld [vmem:[%s1359_s0 + $0x48] sm:$0xff]   ;;  %v928_v24 = vld [vmem:[%s1359_s0 + $0x50] sm:$0xff]   ;;  %v930_v26 = vld [vmem:[%s1359_s0 + $0x58] sm:$0xff]  }
   0x9   :  { %v927_v23 = vld [vmem:[%s1359_s0 + $0xc8] sm:$0xff]   ;;  %v929_v25 = vld [vmem:[%s1359_s0 + $0xd0] sm:$0xff]   ;;  %v931_v27 = vld [vmem:[%s1359_s0 + $0xd8] sm:$0xff]  }
   0xa   :  { %v932_v28 = vld [vmem:[%s1359_s0 + $0x60] sm:$0xff]   ;;  %v934_v30 = vld [vmem:[%s1359_s0 + $0x68] sm:$0xff]   ;;  %v936_v32 = vld [vmem:[%s1359_s0 + $0x70] sm:$0xff]  }
   0xb   :  { %832 = vmatpush3.bf16.msra.mxu0 %v365_v5  ;;  %902 = vmatpush3.bf16.msra.mxu1 %v365_v5  ;;  %v933_v29 = vld [vmem:[%s1359_s0 + $0xe0] sm:$0xff]   ;;  %v935_v31 = vld [vmem:[%s1359_s0 + $0xe8] sm:$0xff]   ;;  %v937_v33 = vld [vmem:[%s1359_s0 + $0xf0] sm:$0xff]  }
   0xc   :  { %v938_v34 = vld [vmem:[%s1359_s0 + $0x78] sm:$0xff]   ;;  %v1100_v36 = vld [vmem:[%s1360_s2] ss:$0 sm:$0xff] }
   0xd   :  { %v939_v35 = vld [vmem:[%s1359_s0 + $0xf8] sm:$0xff]  }
   0xe   :  { %834 = vmatmul.mubr.msk.bf16.vlgmr.msra.gmra.mrb[0].mxu0 %vm266_vm0, %v910_v6  ;;  %866 = vmatmul.mubr.msk.bf16.vlgmr.msra.gmra.mrb[0].mxu1 %vm266_vm0, %v911_v7 }
   0xf   :  { %837 = vmatprep.mubr.msk.bf16.mxu0 %vm266_vm0, %v912_v8  ;;  %869 = vmatprep.mubr.msk.bf16.mxu1 %vm266_vm0, %v913_v9 }
  0x16   :  { %838 = vmatmul.mubr.msk.bf16.gmra.mrb[4].mxu0 %vm266_vm0, %v914_v10  ;;  %870 = vmatmul.mubr.msk.bf16.gmra.mrb[4].mxu1 %vm266_vm0, %v915_v11 }
  0x17   :  { %841 = vmatprep.mubr.msk.bf16.mxu0 %vm266_vm0, %v916_v12  ;;  %873 = vmatprep.mubr.msk.bf16.mxu1 %vm266_vm0, %v917_v13 }
  0x1e   :  { %842 = vmatmul.mubr.msk.bf16.gmra.mrb[8].mxu0 %vm266_vm0, %v918_v14  ;;  %874 = vmatmul.mubr.msk.bf16.gmra.mrb[8].mxu1 %vm266_vm0, %v919_v15 }
  0x1f   :  { %845 = vmatprep.mubr.msk.bf16.mxu0 %vm266_vm0, %v920_v16  ;;  %877 = vmatprep.mubr.msk.bf16.mxu1 %vm266_vm0, %v921_v17 }
  0x26   :  { %846 = vmatmul.mubr.msk.bf16.gmra.mrb[12].mxu0 %vm266_vm0, %v922_v18  ;;  %878 = vmatmul.mubr.msk.bf16.gmra.mrb[12].mxu1 %vm266_vm0, %v923_v19 }
  0x27   :  { %849 = vmatprep.mubr.msk.bf16.mxu0 %vm266_vm0, %v924_v20  ;;  %881 = vmatprep.mubr.msk.bf16.mxu1 %vm266_vm0, %v925_v21 }
  0x2e   :  { %850 = vmatmul.mubr.msk.bf16.gmra.mrb[16].mxu0 %vm266_vm0, %v926_v22  ;;  %882 = vmatmul.mubr.msk.bf16.gmra.mrb[16].mxu1 %vm266_vm0, %v927_v23 }
  0x2f   :  { %853 = vmatprep.mubr.msk.bf16.mxu0 %vm266_vm0, %v928_v24  ;;  %885 = vmatprep.mubr.msk.bf16.mxu1 %vm266_vm0, %v929_v25 }
  0x36   :  { %854 = vmatmul.mubr.msk.bf16.gmra.mrb[20].mxu0 %vm266_vm0, %v930_v26  ;;  %886 = vmatmul.mubr.msk.bf16.gmra.mrb[20].mxu1 %vm266_vm0, %v931_v27 }
  0x37   :  { %857 = vmatprep.mubr.msk.bf16.mxu0 %vm266_vm0, %v932_v28  ;;  %889 = vmatprep.mubr.msk.bf16.mxu1 %vm266_vm0, %v933_v29 }
  0x3e   :  { %858 = vmatmul.mubr.msk.bf16.gmra.mrb[24].mxu0 %vm266_vm0, %v934_v30  ;;  %890 = vmatmul.mubr.msk.bf16.gmra.mrb[24].mxu1 %vm266_vm0, %v935_v31 }
  0x3f   :  { %861 = vmatprep.mubr.msk.bf16.mxu0 %vm266_vm0, %v936_v32  ;;  %893 = vmatprep.mubr.msk.bf16.mxu1 %vm266_vm0, %v937_v33 }
  0x46   :  { %862 = vmatmul.mubr.msk.bf16.gmra.mrb[28].mxu0 %vm266_vm0, %v938_v34  ;;  %894 = vmatmul.mubr.msk.bf16.gmra.mrb[28].mxu1 %vm266_vm0, %v939_v35 }
  0xe1   :  { %v835_v37 = vpop.f32.mrb[0].mxu0  ;;  %v867_v38 = vpop.f32.mrb[0].mxu1 }
  0xe2   :  { %v410_v39 = vadd.f32 %v835_v37, %v1100_v36  ;;  %v538_v40 = vadd.f32 %v867_v38, %v1100_v36  ;;  %v401_v41 = vpop.f32.mrb[1].mxu0  ;;  %v529_v42 = vpop.f32.mrb[1].mxu1 }
  0xe3   :  { %v402_v43 = vadd.f32 %v1100_v36, %v401_v41  ;;  %v530_v44 = vadd.f32 %v1100_v36, %v529_v42  ;;  %v836_v45 = vpop.f32.mrb[2].mxu0  ;;  %v868_v46 = vpop.f32.mrb[2].mxu1 }
  0xe4   :  { %658 = vst [vmem:[%s1361_s3 + $0x10] sm:$0xff] %v410_v39  ;;  %690 = vst [vmem:[%s1361_s3 + $0x110] sm:$0xff] %v538_v40  ;;  %v413_v47 = vadd.f32 %v836_v45, %v1100_v36  ;;  %v541_v48 = vadd.f32 %v868_v46, %v1100_v36  ;;  %v404_v49 = vpop.f32.mrb[3].mxu0  ;;  %v532_v50 = vpop.f32.mrb[3].mxu1 }
  0xe5   :  { %656 = vst [vmem:[%s1361_s3] sm:$0xff] %v402_v43  ;;  %688 = vst [vmem:[%s1361_s3 + $0x100] sm:$0xff] %v530_v44  ;;  %v405_v51 = vadd.f32 %v1100_v36, %v404_v49  ;;  %v533_v52 = vadd.f32 %v1100_v36, %v532_v50 }
  0xe6   :  { %659 = vst [vmem:[%s1361_s3 + $0x18] sm:$0xff] %v413_v47  ;;  %691 = vst [vmem:[%s1361_s3 + $0x118] sm:$0xff] %v541_v48 }
  0xe7   :  { %657 = vst [vmem:[%s1361_s3 + $0x8] sm:$0xff] %v405_v51  ;;  %689 = vst [vmem:[%s1361_s3 + $0x108] sm:$0xff] %v533_v52 }
  0xe9   :  { %v839_v53 = vpop.f32.mrb[4].mxu0  ;;  %v871_v54 = vpop.f32.mrb[4].mxu1 }
  0xea   :  { %v426_v55 = vadd.f32 %v839_v53, %v1100_v36  ;;  %v554_v56 = vadd.f32 %v871_v54, %v1100_v36  ;;  %v417_v57 = vpop.f32.mrb[5].mxu0  ;;  %v545_v58 = vpop.f32.mrb[5].mxu1 }
  0xeb   :  { %v418_v59 = vadd.f32 %v1100_v36, %v417_v57  ;;  %v546_v60 = vadd.f32 %v1100_v36, %v545_v58  ;;  %v840_v61 = vpop.f32.mrb[6].mxu0  ;;  %v872_v62 = vpop.f32.mrb[6].mxu1 }
  0xec   :  { %662 = vst [vmem:[%s1361_s3 + $0x30] sm:$0xff] %v426_v55  ;;  %694 = vst [vmem:[%s1361_s3 + $0x130] sm:$0xff] %v554_v56  ;;  %v429_v63 = vadd.f32 %v840_v61, %v1100_v36  ;;  %v557_v0 = vadd.f32 %v872_v62, %v1100_v36  ;;  %v420_v1 = vpop.f32.mrb[7].mxu0  ;;  %v548_v2 = vpop.f32.mrb[7].mxu1 }
  0xed   :  { %660 = vst [vmem:[%s1361_s3 + $0x20] sm:$0xff] %v418_v59  ;;  %692 = vst [vmem:[%s1361_s3 + $0x120] sm:$0xff] %v546_v60  ;;  %v421_v3 = vadd.f32 %v1100_v36, %v420_v1  ;;  %v549_v4 = vadd.f32 %v1100_v36, %v548_v2 }
  0xee   :  { %663 = vst [vmem:[%s1361_s3 + $0x38] sm:$0xff] %v429_v63  ;;  %695 = vst [vmem:[%s1361_s3 + $0x138] sm:$0xff] %v557_v0 }
  0xef   :  { %661 = vst [vmem:[%s1361_s3 + $0x28] sm:$0xff] %v421_v3  ;;  %693 = vst [vmem:[%s1361_s3 + $0x128] sm:$0xff] %v549_v4 }
  0xf1   :  { %v843_v5 = vpop.f32.mrb[8].mxu0  ;;  %v875_v6 = vpop.f32.mrb[8].mxu1 }
  0xf2   :  { %v442_v7 = vadd.f32 %v843_v5, %v1100_v36  ;;  %v570_v8 = vadd.f32 %v875_v6, %v1100_v36  ;;  %v433_v9 = vpop.f32.mrb[9].mxu0  ;;  %v561_v10 = vpop.f32.mrb[9].mxu1 }
  0xf3   :  { %v434_v11 = vadd.f32 %v1100_v36, %v433_v9  ;;  %v562_v12 = vadd.f32 %v1100_v36, %v561_v10  ;;  %v844_v13 = vpop.f32.mrb[10].mxu0  ;;  %v876_v14 = vpop.f32.mrb[10].mxu1 }
  0xf4   :  { %666 = vst [vmem:[%s1361_s3 + $0x50] sm:$0xff] %v442_v7  ;;  %698 = vst [vmem:[%s1361_s3 + $0x150] sm:$0xff] %v570_v8  ;;  %v445_v15 = vadd.f32 %v844_v13, %v1100_v36  ;;  %v573_v16 = vadd.f32 %v876_v14, %v1100_v36  ;;  %v436_v17 = vpop.f32.mrb[11].mxu0  ;;  %v564_v18 = vpop.f32.mrb[11].mxu1 }
  0xf5   :  { %664 = vst [vmem:[%s1361_s3 + $0x40] sm:$0xff] %v434_v11  ;;  %696 = vst [vmem:[%s1361_s3 + $0x140] sm:$0xff] %v562_v12  ;;  %v437_v19 = vadd.f32 %v1100_v36, %v436_v17  ;;  %v565_v20 = vadd.f32 %v1100_v36, %v564_v18 }
  0xf6   :  { %667 = vst [vmem:[%s1361_s3 + $0x58] sm:$0xff] %v445_v15  ;;  %699 = vst [vmem:[%s1361_s3 + $0x158] sm:$0xff] %v573_v16 }
  0xf7   :  { %665 = vst [vmem:[%s1361_s3 + $0x48] sm:$0xff] %v437_v19  ;;  %697 = vst [vmem:[%s1361_s3 + $0x148] sm:$0xff] %v565_v20 }
  0xf9   :  { %v847_v21 = vpop.f32.mrb[12].mxu0  ;;  %v879_v22 = vpop.f32.mrb[12].mxu1 }
  0xfa   :  { %v458_v23 = vadd.f32 %v847_v21, %v1100_v36  ;;  %v586_v24 = vadd.f32 %v879_v22, %v1100_v36  ;;  %v449_v25 = vpop.f32.mrb[13].mxu0  ;;  %v577_v26 = vpop.f32.mrb[13].mxu1 }
  0xfb   :  { %v450_v27 = vadd.f32 %v1100_v36, %v449_v25  ;;  %v578_v28 = vadd.f32 %v1100_v36, %v577_v26  ;;  %v848_v29 = vpop.f32.mrb[14].mxu0  ;;  %v880_v30 = vpop.f32.mrb[14].mxu1 }
  0xfc   :  { %670 = vst [vmem:[%s1361_s3 + $0x70] sm:$0xff] %v458_v23  ;;  %702 = vst [vmem:[%s1361_s3 + $0x170] sm:$0xff] %v586_v24  ;;  %v461_v31 = vadd.f32 %v848_v29, %v1100_v36  ;;  %v589_v32 = vadd.f32 %v880_v30, %v1100_v36  ;;  %v452_v33 = vpop.f32.mrb[15].mxu0  ;;  %v580_v34 = vpop.f32.mrb[15].mxu1 }
  0xfd   :  { %668 = vst [vmem:[%s1361_s3 + $0x60] sm:$0xff] %v450_v27  ;;  %700 = vst [vmem:[%s1361_s3 + $0x160] sm:$0xff] %v578_v28  ;;  %v453_v35 = vadd.f32 %v1100_v36, %v452_v33  ;;  %v581_v37 = vadd.f32 %v1100_v36, %v580_v34 }
  0xfe   :  { %671 = vst [vmem:[%s1361_s3 + $0x78] sm:$0xff] %v461_v31  ;;  %703 = vst [vmem:[%s1361_s3 + $0x178] sm:$0xff] %v589_v32 }
  0xff   :  { %669 = vst [vmem:[%s1361_s3 + $0x68] sm:$0xff] %v453_v35  ;;  %701 = vst [vmem:[%s1361_s3 + $0x168] sm:$0xff] %v581_v37 }
 0x101   :  { %v851_v38 = vpop.f32.mrb[16].mxu0  ;;  %v883_v39 = vpop.f32.mrb[16].mxu1 }
 0x102   :  { %v474_v40 = vadd.f32 %v851_v38, %v1100_v36  ;;  %v602_v41 = vadd.f32 %v883_v39, %v1100_v36  ;;  %v465_v42 = vpop.f32.mrb[17].mxu0  ;;  %v593_v43 = vpop.f32.mrb[17].mxu1 }
 0x103   :  { %v466_v44 = vadd.f32 %v1100_v36, %v465_v42  ;;  %v594_v45 = vadd.f32 %v1100_v36, %v593_v43  ;;  %v852_v46 = vpop.f32.mrb[18].mxu0  ;;  %v884_v47 = vpop.f32.mrb[18].mxu1 }
 0x104   :  { %674 = vst [vmem:[%s1361_s3 + $0x90] sm:$0xff] %v474_v40  ;;  %706 = vst [vmem:[%s1361_s3 + $0x190] sm:$0xff] %v602_v41  ;;  %v477_v48 = vadd.f32 %v852_v46, %v1100_v36  ;;  %v605_v49 = vadd.f32 %v884_v47, %v1100_v36  ;;  %v468_v50 = vpop.f32.mrb[19].mxu0  ;;  %v596_v51 = vpop.f32.mrb[19].mxu1 }
 0x105   :  { %672 = vst [vmem:[%s1361_s3 + $0x80] sm:$0xff] %v466_v44  ;;  %704 = vst [vmem:[%s1361_s3 + $0x180] sm:$0xff] %v594_v45  ;;  %v469_v52 = vadd.f32 %v1100_v36, %v468_v50  ;;  %v597_v53 = vadd.f32 %v1100_v36, %v596_v51 }
 0x106   :  { %675 = vst [vmem:[%s1361_s3 + $0x98] sm:$0xff] %v477_v48  ;;  %707 = vst [vmem:[%s1361_s3 + $0x198] sm:$0xff] %v605_v49 }
 0x107   :  { %673 = vst [vmem:[%s1361_s3 + $0x88] sm:$0xff] %v469_v52  ;;  %705 = vst [vmem:[%s1361_s3 + $0x188] sm:$0xff] %v597_v53 }
 0x109   :  { %v855_v54 = vpop.f32.mrb[20].mxu0  ;;  %v887_v55 = vpop.f32.mrb[20].mxu1 }
 0x10a   :  { %v490_v56 = vadd.f32 %v855_v54, %v1100_v36  ;;  %v618_v57 = vadd.f32 %v887_v55, %v1100_v36  ;;  %v481_v58 = vpop.f32.mrb[21].mxu0  ;;  %v609_v59 = vpop.f32.mrb[21].mxu1 }
 0x10b   :  { %v482_v60 = vadd.f32 %v1100_v36, %v481_v58  ;;  %v610_v61 = vadd.f32 %v1100_v36, %v609_v59  ;;  %v856_v62 = vpop.f32.mrb[22].mxu0  ;;  %v888_v63 = vpop.f32.mrb[22].mxu1 }
 0x10c   :  { %678 = vst [vmem:[%s1361_s3 + $0xb0] sm:$0xff] %v490_v56  ;;  %710 = vst [vmem:[%s1361_s3 + $0x1b0] sm:$0xff] %v618_v57  ;;  %v493_v0 = vadd.f32 %v856_v62, %v1100_v36  ;;  %v621_v1 = vadd.f32 %v888_v63, %v1100_v36  ;;  %v484_v2 = vpop.f32.mrb[23].mxu0  ;;  %v612_v3 = vpop.f32.mrb[23].mxu1 }
 0x10d   :  { %676 = vst [vmem:[%s1361_s3 + $0xa0] sm:$0xff] %v482_v60  ;;  %708 = vst [vmem:[%s1361_s3 + $0x1a0] sm:$0xff] %v610_v61  ;;  %v485_v4 = vadd.f32 %v1100_v36, %v484_v2  ;;  %v613_v5 = vadd.f32 %v1100_v36, %v612_v3 }
 0x10e   :  { %679 = vst [vmem:[%s1361_s3 + $0xb8] sm:$0xff] %v493_v0  ;;  %711 = vst [vmem:[%s1361_s3 + $0x1b8] sm:$0xff] %v621_v1 }
 0x10f   :  { %677 = vst [vmem:[%s1361_s3 + $0xa8] sm:$0xff] %v485_v4  ;;  %709 = vst [vmem:[%s1361_s3 + $0x1a8] sm:$0xff] %v613_v5 }
 0x111   :  { %v859_v6 = vpop.f32.mrb[24].mxu0  ;;  %v891_v7 = vpop.f32.mrb[24].mxu1 }
 0x112   :  { %v506_v8 = vadd.f32 %v859_v6, %v1100_v36  ;;  %v634_v9 = vadd.f32 %v891_v7, %v1100_v36  ;;  %v497_v10 = vpop.f32.mrb[25].mxu0  ;;  %v625_v11 = vpop.f32.mrb[25].mxu1 }
 0x113   :  { %v498_v12 = vadd.f32 %v1100_v36, %v497_v10  ;;  %v626_v13 = vadd.f32 %v1100_v36, %v625_v11  ;;  %v860_v14 = vpop.f32.mrb[26].mxu0  ;;  %v892_v15 = vpop.f32.mrb[26].mxu1 }
 0x114   :  { %682 = vst [vmem:[%s1361_s3 + $0xd0] sm:$0xff] %v506_v8  ;;  %714 = vst [vmem:[%s1361_s3 + $0x1d0] sm:$0xff] %v634_v9  ;;  %v509_v16 = vadd.f32 %v860_v14, %v1100_v36  ;;  %v637_v17 = vadd.f32 %v892_v15, %v1100_v36  ;;  %v500_v18 = vpop.f32.mrb[27].mxu0  ;;  %v628_v19 = vpop.f32.mrb[27].mxu1 }
 0x115   :  { %680 = vst [vmem:[%s1361_s3 + $0xc0] sm:$0xff] %v498_v12  ;;  %712 = vst [vmem:[%s1361_s3 + $0x1c0] sm:$0xff] %v626_v13  ;;  %v501_v20 = vadd.f32 %v1100_v36, %v500_v18  ;;  %v629_v21 = vadd.f32 %v1100_v36, %v628_v19 }
 0x116   :  { %683 = vst [vmem:[%s1361_s3 + $0xd8] sm:$0xff] %v509_v16  ;;  %715 = vst [vmem:[%s1361_s3 + $0x1d8] sm:$0xff] %v637_v17 }
 0x117   :  { %681 = vst [vmem:[%s1361_s3 + $0xc8] sm:$0xff] %v501_v20  ;;  %713 = vst [vmem:[%s1361_s3 + $0x1c8] sm:$0xff] %v629_v21 }
 0x119   :  { %v863_v22 = vpop.f32.mrb[28].mxu0  ;;  %v895_v23 = vpop.f32.mrb[28].mxu1 }
 0x11a   :  { %v522_v24 = vadd.f32 %v863_v22, %v1100_v36  ;;  %v650_v25 = vadd.f32 %v895_v23, %v1100_v36  ;;  %v513_v26 = vpop.f32.mrb[29].mxu0  ;;  %v641_v27 = vpop.f32.mrb[29].mxu1 }
 0x11b   :  { %v514_v28 = vadd.f32 %v1100_v36, %v513_v26  ;;  %v642_v29 = vadd.f32 %v1100_v36, %v641_v27  ;;  %v864_v30 = vpop.f32.mrb[30].mxu0  ;;  %v896_v31 = vpop.f32.mrb[30].mxu1 }
 0x11c   :  { %686 = vst [vmem:[%s1361_s3 + $0xf0] sm:$0xff] %v522_v24  ;;  %718 = vst [vmem:[%s1361_s3 + $0x1f0] sm:$0xff] %v650_v25  ;;  %v525_v32 = vadd.f32 %v864_v30, %v1100_v36  ;;  %v653_v33 = vadd.f32 %v896_v31, %v1100_v36  ;;  %v516_v34 = vpop.f32.mrb[31].mxu0  ;;  %v644_v35 = vpop.f32.mrb[31].mxu1 }
 0x11d   :  { %684 = vst [vmem:[%s1361_s3 + $0xe0] sm:$0xff] %v514_v28  ;;  %716 = vst [vmem:[%s1361_s3 + $0x1e0] sm:$0xff] %v642_v29  ;;  %v517_v37 = vadd.f32 %v1100_v36, %v516_v34  ;;  %v645_v38 = vadd.f32 %v1100_v36, %v644_v35 }
 0x11e   :  { %687 = vst [vmem:[%s1361_s3 + $0xf8] sm:$0xff] %v525_v32  ;;  %719 = vst [vmem:[%s1361_s3 + $0x1f8] sm:$0xff] %v653_v33 }
 0x11f   :  { %685 = vst [vmem:[%s1361_s3 + $0xe8] sm:$0xff] %v517_v37  ;;  %717 = vst [vmem:[%s1361_s3 + $0x1e8] sm:$0xff] %v645_v38 }

// kernel: gated_deform_conv_forward.4
= control target key start
LH: loop header
LB: loop body
LE: loop exit
PB: predicated region body
PF: predicated region fallthrough
CT: control target
= control target key end

     0   :  { %vm347_vm0 = vcmask 293888   ;;  %vm444_vm1 = vcmask 1041408   ;;  %s3963_s4 = inlined_call_operand.vmem [shape: bf16[36,128], index: 4, kind: input, shape index: {}]   ;;  %s3964_s1 = inlined_call_operand.vmem [shape: bf16[512,36], index: 1, kind: input, shape index: {}]   ;;  %s3965_s2 = inlined_call_operand.vmem [shape: bf16[36,128], index: 2, kind: input, shape index: {}]   ;;  %s3966_s0 = inlined_call_operand.vmem [shape: bf16[512,36], index: 0, kind: input, shape index: {}]   ;;  %s3967_s5 = inlined_call_operand.vmem [shape: f32[1,128], index: 5, kind: input, shape index: {}]   ;;  %s3968_s3 = inlined_call_operand.vmem [shape: f32[1,128], index: 3, kind: input, shape index: {}]   ;;  %s3969_s6 = inlined_call_operand.vmem [shape: f32[1,1,128], index: 6, kind: output, shape index: {0}]   ;;  %s3970_s7 = inlined_call_operand.vmem [shape: f32[1,1,128], index: 7, kind: output, shape index: {1}]  }
   0x1   :  { %v2765_v0 = vld [vmem:[%s3963_s4] sm:$0xff]   ;;  %v2766_v1 = vld [vmem:[%s3963_s4 + $0x8] sm:$0xff]   ;;  %v2767_v2 = vld [vmem:[%s3963_s4 + $0x10] ss:$0 sps:$4 sm:$0x33]  }
   0x2   :  { %2693 = vmatprep.subr.bf16.mxu1 %v2765_v0  ;;  %v2768_v3 = vld [vmem:[%s3964_s1] sm:$0xff]   ;;  %v1015_v5 = vsel %vm444_vm1, %v2767_v2, 0  ;;  %v2773_v6 = vld [vmem:[%s3965_s2 + $0x8] sm:$0xff]   ;;  %v2770_v8 = vld [vmem:[%s3964_s1 + $0x10] sm:$0xff]  }
   0x3   :  { %2694 = vmatpush3.bf16.msra.mxu1 %v2765_v0  ;;  %2699 = vmatprep.mubr.msk.bf16.mxu1 %vm347_vm0, %v2768_v3  ;;  %v2772_v4 = vld [vmem:[%s3965_s2] sm:$0xff]   ;;  %v2769_v7 = vld [vmem:[%s3964_s1 + $0x8] sm:$0xff]   ;;  %v2776_v9 = vld [vmem:[%s3965_s2 + $0x10] ss:$0 sps:$4 sm:$0x33]  }
   0x4   :  { %2695 = vmatprep.subr.bf16.mxu1 %v2766_v1  ;;  %2623 = vmatprep.subr.bf16.mxu0 %v2772_v4  ;;  %v2777_v10 = vld [vmem:[%s3966_s0] sm:$0xff]   ;;  %v446_v11 = vsel %vm444_vm1, %v2776_v9, 0  ;;  %v2771_v12 = vld [vmem:[%s3964_s1 + $0x18] sm:$0xff]   ;;  %v2778_v13 = vld [vmem:[%s3966_s0 + $0x8] sm:$0xff]  }
   0x5   :  { %2624 = vmatpush3.bf16.msra.mxu0 %v2772_v4  ;;  %2629 = vmatprep.mubr.msk.bf16.mxu0 %vm347_vm0, %v2777_v10  ;;  %v2781_v14 = vld [vmem:[%s3966_s0 + $0x10] sm:$0xff]   ;;  %v2774_v15 = vld [vmem:[%s3964_s1 + $0x20] sm:$0xff]   ;;  %v2775_v16 = vld [vmem:[%s3964_s1 + $0x28] sm:$0xff]  }
   0x6   :  { %2625 = vmatprep.subr.bf16.mxu0 %v2773_v6  ;;  %v2782_v17 = vld [vmem:[%s3966_s0 + $0x18] sm:$0xff]   ;;  %v2785_v18 = vld [vmem:[%s3966_s0 + $0x20] sm:$0xff]   ;;  %v2779_v19 = vld [vmem:[%s3964_s1 + $0x30] sm:$0xff]  }
   0x7   :  { %2696 = vmatpush3.bf16.msra.mxu1 %v2766_v1  ;;  %v2780_v20 = vld [vmem:[%s3964_s1 + $0x38] sm:$0xff]   ;;  %v2786_v21 = vld [vmem:[%s3966_s0 + $0x28] sm:$0xff]   ;;  %v2789_v22 = vld [vmem:[%s3966_s0 + $0x30] sm:$0xff]  }
   0x8   :  { %2764 = vmatprep.subr.msk.bf16.mxu1 %vm444_vm1, %v2767_v2  ;;  %v2783_v23 = vld [vmem:[%s3964_s1 + $0x40] sm:$0xff]   ;;  %v2784_v24 = vld [vmem:[%s3964_s1 + $0x48] sm:$0xff]   ;;  %v2790_v25 = vld [vmem:[%s3966_s0 + $0x38] sm:$0xff]  }
   0x9   :  { %2626 = vmatpush3.bf16.msra.mxu0 %v2773_v6  ;;  %v2793_v26 = vld [vmem:[%s3966_s0 + $0x40] sm:$0xff]   ;;  %v2787_v27 = vld [vmem:[%s3964_s1 + $0x50] sm:$0xff]   ;;  %v2788_v28 = vld [vmem:[%s3964_s1 + $0x58] sm:$0xff]  }
   0xa   :  { %2763 = vmatprep.subr.msk.bf16.mxu0 %vm444_vm1, %v2776_v9  ;;  %v2794_v29 = vld [vmem:[%s3966_s0 + $0x48] sm:$0xff]   ;;  %v2797_v30 = vld [vmem:[%s3966_s0 + $0x50] sm:$0xff]   ;;  %v2791_v31 = vld [vmem:[%s3964_s1 + $0x60] sm:$0xff]  }
   0xb   :  { %2698 = vmatpush3.bf16.msra.mxu1 %v1015_v5  ;;  %v2792_v32 = vld [vmem:[%s3964_s1 + $0x68] sm:$0xff]   ;;  %v2798_v33 = vld [vmem:[%s3966_s0 + $0x58] sm:$0xff]   ;;  %v2801_v34 = vld [vmem:[%s3966_s0 + $0x60] sm:$0xff]  }
   0xc   :  { %v2795_v35 = vld [vmem:[%s3964_s1 + $0x70] sm:$0xff]   ;;  %v2796_v36 = vld [vmem:[%s3964_s1 + $0x78] sm:$0xff]   ;;  %v2802_v37 = vld [vmem:[%s3966_s0 + $0x68] sm:$0xff]  }
   0xd   :  { %2628 = vmatpush3.bf16.msra.mxu0 %v446_v11  ;;  %v2805_v38 = vld [vmem:[%s3966_s0 + $0x70] sm:$0xff]   ;;  %v2799_v39 = vld [vmem:[%s3964_s1 + $0x80] sm:$0xff]   ;;  %v2806_v40 = vld [vmem:[%s3966_s0 + $0x78] sm:$0xff]  }
   0xe   :  { %2700 = vmatmul.mubr.msk.bf16.vlgmr.msra.gmra.mrb[0].mxu1 %vm347_vm0, %v2769_v7  ;;  %v2800_v41 = vld [vmem:[%s3964_s1 + $0x88] sm:$0xff]   ;;  %v2809_v42 = vld [vmem:[%s3966_s0 + $0x80] sm:$0xff]   ;;  %v2803_v43 = vld [vmem:[%s3964_s1 + $0x90] sm:$0xff]  }
   0xf   :  { %2703 = vmatprep.mubr.msk.bf16.mxu1 %vm347_vm0, %v2770_v8  ;;  %v2810_v44 = vld [vmem:[%s3966_s0 + $0x88] sm:$0xff]   ;;  %v2804_v45 = vld [vmem:[%s3964_s1 + $0x98] sm:$0xff]   ;;  %v2813_v46 = vld [vmem:[%s3966_s0 + $0x90] sm:$0xff]  }
  0x10   :  { %2630 = vmatmul.mubr.msk.bf16.vlgmr.msra.gmra.mrb[0].mxu0 %vm347_vm0, %v2778_v13  ;;  %v2807_v47 = vld [vmem:[%s3964_s1 + $0xa0] sm:$0xff]   ;;  %v2814_v48 = vld [vmem:[%s3966_s0 + $0x98] sm:$0xff]   ;;  %v2808_v49 = vld [vmem:[%s3964_s1 + $0xa8] sm:$0xff]  }
  0x11   :  { %2633 = vmatprep.mubr.msk.bf16.mxu0 %vm347_vm0, %v2781_v14  ;;  %v2817_v50 = vld [vmem:[%s3966_s0 + $0xa0] sm:$0xff]   ;;  %v2811_v51 = vld [vmem:[%s3964_s1 + $0xb0] sm:$0xff]   ;;  %v2818_v52 = vld [vmem:[%s3966_s0 + $0xa8] sm:$0xff]  }
  0x12   :  { %v2812_v53 = vld [vmem:[%s3964_s1 + $0xb8] sm:$0xff]   ;;  %v2821_v54 = vld [vmem:[%s3966_s0 + $0xb0] sm:$0xff]   ;;  %v2815_v55 = vld [vmem:[%s3964_s1 + $0xc0] sm:$0xff]  }
  0x13   :  { %v2822_v56 = vld [vmem:[%s3966_s0 + $0xb8] sm:$0xff]   ;;  %v2816_v57 = vld [vmem:[%s3964_s1 + $0xc8] sm:$0xff]   ;;  %v2825_v58 = vld [vmem:[%s3966_s0 + $0xc0] sm:$0xff]  }
  0x14   :  { %v2819_v59 = vld [vmem:[%s3964_s1 + $0xd0] sm:$0xff]   ;;  %v2826_v60 = vld [vmem:[%s3966_s0 + $0xc8] sm:$0xff]   ;;  %v2820_v61 = vld [vmem:[%s3964_s1 + $0xd8] sm:$0xff]  }
  0x15   :  { %v2829_v62 = vld [vmem:[%s3966_s0 + $0xd0] sm:$0xff]   ;;  %v2823_v63 = vld [vmem:[%s3964_s1 + $0xe0] sm:$0xff]   ;;  %v2830_v0 = vld [vmem:[%s3966_s0 + $0xd8] sm:$0xff]  }
  0x16   :  { %2704 = vmatmul.mubr.msk.bf16.gmra.mrb[4].mxu1 %vm347_vm0, %v2771_v12  ;;  %v2824_v1 = vld [vmem:[%s3964_s1 + $0xe8] sm:$0xff]   ;;  %v2831_v2 = vld [vmem:[%s3966_s0 + $0xe0] sm:$0xff]   ;;  %v2827_v3 = vld [vmem:[%s3964_s1 + $0xf0] sm:$0xff]  }
  0x17   :  { %2707 = vmatprep.mubr.msk.bf16.mxu1 %vm347_vm0, %v2774_v15  ;;  %v2832_v4 = vld [vmem:[%s3966_s0 + $0xe8] sm:$0xff]   ;;  %v2828_v5 = vld [vmem:[%s3964_s1 + $0xf8] sm:$0xff]   ;;  %v2833_v6 = vld [vmem:[%s3966_s0 + $0xf0] sm:$0xff]  }
  0x18   :  { %2634 = vmatmul.mubr.msk.bf16.gmra.mrb[4].mxu0 %vm347_vm0, %v2782_v17  ;;  %v2834_v7 = vld [vmem:[%s3966_s0 + $0xf8] sm:$0xff]   ;;  %v3414_v8 = vld [vmem:[%s3967_s5] ss:$0 sm:$0xff] }
  0x19   :  { %2637 = vmatprep.mubr.msk.bf16.mxu0 %vm347_vm0, %v2785_v18 }
  0x1e   :  { %2708 = vmatmul.mubr.msk.bf16.gmra.mrb[8].mxu1 %vm347_vm0, %v2775_v16 }
  0x1f   :  { %2711 = vmatprep.mubr.msk.bf16.mxu1 %vm347_vm0, %v2779_v19 }
  0x20   :  { %2638 = vmatmul.mubr.msk.bf16.gmra.mrb[8].mxu0 %vm347_vm0, %v2786_v21 }
  0x21   :  { %2641 = vmatprep.mubr.msk.bf16.mxu0 %vm347_vm0, %v2789_v22 }
  0x26   :  { %2712 = vmatmul.mubr.msk.bf16.gmra.mrb[12].mxu1 %vm347_vm0, %v2780_v20 }
  0x27   :  { %2715 = vmatprep.mubr.msk.bf16.mxu1 %vm347_vm0, %v2783_v23 }
  0x28   :  { %2642 = vmatmul.mubr.msk.bf16.gmra.mrb[12].mxu0 %vm347_vm0, %v2790_v25 }
  0x29   :  { %2645 = vmatprep.mubr.msk.bf16.mxu0 %vm347_vm0, %v2793_v26 }
  0x2e   :  { %2716 = vmatmul.mubr.msk.bf16.gmra.mrb[16].mxu1 %vm347_vm0, %v2784_v24 }
  0x2f   :  { %2719 = vmatprep.mubr.msk.bf16.mxu1 %vm347_vm0, %v2787_v27  ;;  %v3423_v27 = vld [vmem:[%s3968_s3] ss:$0 sm:$0xff] }
  0x30   :  { %2646 = vmatmul.mubr.msk.bf16.gmra.mrb[16].mxu0 %vm347_vm0, %v2794_v29 }
  0x31   :  { %2649 = vmatprep.mubr.msk.bf16.mxu0 %vm347_vm0, %v2797_v30 }
  0x36   :  { %2720 = vmatmul.mubr.msk.bf16.gmra.mrb[20].mxu1 %vm347_vm0, %v2788_v28 }
  0x37   :  { %2723 = vmatprep.mubr.msk.bf16.mxu1 %vm347_vm0, %v2791_v31 }
  0x38   :  { %2650 = vmatmul.mubr.msk.bf16.gmra.mrb[20].mxu0 %vm347_vm0, %v2798_v33 }
  0x39   :  { %2653 = vmatprep.mubr.msk.bf16.mxu0 %vm347_vm0, %v2801_v34 }
  0x3e   :  { %2724 = vmatmul.mubr.msk.bf16.gmra.mrb[24].mxu1 %vm347_vm0, %v2792_v32 }
  0x3f   :  { %2727 = vmatprep.mubr.msk.bf16.mxu1 %vm347_vm0, %v2795_v35 }
  0x40   :  { %2654 = vmatmul.mubr.msk.bf16.gmra.mrb[24].mxu0 %vm347_vm0, %v2802_v37 }
  0x41   :  { %2657 = vmatprep.mubr.msk.bf16.mxu0 %vm347_vm0, %v2805_v38 }
  0x46   :  { %2728 = vmatmul.mubr.msk.bf16.gmra.mrb[28].mxu1 %vm347_vm0, %v2796_v36 }
  0x47   :  { %2731 = vmatprep.mubr.msk.bf16.mxu1 %vm347_vm0, %v2799_v39 }
  0x48   :  { %2658 = vmatmul.mubr.msk.bf16.gmra.mrb[28].mxu0 %vm347_vm0, %v2806_v40 }
  0x49   :  { %2661 = vmatprep.mubr.msk.bf16.mxu0 %vm347_vm0, %v2809_v42 }
  0x4e   :  { %2732 = vmatmul.mubr.msk.bf16.gmra.mrb[32].mxu1 %vm347_vm0, %v2800_v41 }
  0x4f   :  { %2735 = vmatprep.mubr.msk.bf16.mxu1 %vm347_vm0, %v2803_v43 }
  0x50   :  { %2662 = vmatmul.mubr.msk.bf16.gmra.mrb[32].mxu0 %vm347_vm0, %v2810_v44 }
  0x51   :  { %2665 = vmatprep.mubr.msk.bf16.mxu0 %vm347_vm0, %v2813_v46 }
  0x56   :  { %2736 = vmatmul.mubr.msk.bf16.gmra.mrb[36].mxu1 %vm347_vm0, %v2804_v45 }
  0x57   :  { %2739 = vmatprep.mubr.msk.bf16.mxu1 %vm347_vm0, %v2807_v47 }
  0x58   :  { %2666 = vmatmul.mubr.msk.bf16.gmra.mrb[36].mxu0 %vm347_vm0, %v2814_v48 }
  0x59   :  { %2669 = vmatprep.mubr.msk.bf16.mxu0 %vm347_vm0, %v2817_v50 }
  0x5e   :  { %2740 = vmatmul.mubr.msk.bf16.gmra.mrb[40].mxu1 %vm347_vm0, %v2808_v49 }
  0x5f   :  { %2743 = vmatprep.mubr.msk.bf16.mxu1 %vm347_vm0, %v2811_v51 }
  0x60   :  { %2670 = vmatmul.mubr.msk.bf16.gmra.mrb[40].mxu0 %vm347_vm0, %v2818_v52 }
  0x61   :  { %2673 = vmatprep.mubr.msk.bf16.mxu0 %vm347_vm0, %v2821_v54 }
  0x66   :  { %2744 = vmatmul.mubr.msk.bf16.gmra.mrb[44].mxu1 %vm347_vm0, %v2812_v53 }
  0x67   :  { %2747 = vmatprep.mubr.msk.bf16.mxu1 %vm347_vm0, %v2815_v55 }
  0x68   :  { %2674 = vmatmul.mubr.msk.bf16.gmra.mrb[44].mxu0 %vm347_vm0, %v2822_v56 }
  0x69   :  { %2677 = vmatprep.mubr.msk.bf16.mxu0 %vm347_vm0, %v2825_v58 }
  0x6e   :  { %2748 = vmatmul.mubr.msk.bf16.gmra.mrb[48].mxu1 %vm347_vm0, %v2816_v57 }
  0x6f   :  { %2751 = vmatprep.mubr.msk.bf16.mxu1 %vm347_vm0, %v2819_v59 }
  0x70   :  { %2678 = vmatmul.mubr.msk.bf16.gmra.mrb[48].mxu0 %vm347_vm0, %v2826_v60 }
  0x71   :  { %2681 = vmatprep.mubr.msk.bf16.mxu0 %vm347_vm0, %v2829_v62 }
  0x76   :  { %2752 = vmatmul.mubr.msk.bf16.gmra.mrb[52].mxu1 %vm347_vm0, %v2820_v61 }
  0x77   :  { %2755 = vmatprep.mubr.msk.bf16.mxu1 %vm347_vm0, %v2823_v63 }
  0x78   :  { %2682 = vmatmul.mubr.msk.bf16.gmra.mrb[52].mxu0 %vm347_vm0, %v2830_v0 }
  0x79   :  { %2685 = vmatprep.mubr.msk.bf16.mxu0 %vm347_vm0, %v2831_v2 }
  0x7e   :  { %2756 = vmatmul.mubr.msk.bf16.gmra.mrb[56].mxu1 %vm347_vm0, %v2824_v1 }
  0x7f   :  { %2759 = vmatprep.mubr.msk.bf16.mxu1 %vm347_vm0, %v2827_v3 }
  0x80   :  { %2686 = vmatmul.mubr.msk.bf16.gmra.mrb[56].mxu0 %vm347_vm0, %v2832_v4 }
  0x81   :  { %2689 = vmatprep.mubr.msk.bf16.mxu0 %vm347_vm0, %v2833_v6 }
  0x86   :  { %2760 = vmatmul.mubr.msk.bf16.gmra.mrb[60].mxu1 %vm347_vm0, %v2828_v5 }
  0x88   :  { %2690 = vmatmul.mubr.msk.bf16.gmra.mrb[60].mxu0 %vm347_vm0, %v2834_v7 }
  0xe1   :  { %v2701_v9 = vpop.f32.mrb[0].mxu1 }
  0xe2   :  { %v1060_v10 = vadd.f32 %v2701_v9, %v3414_v8  ;;  %v1051_v11 = vpop.f32.mrb[1].mxu1 }
  0xe3   :  { %v1052_v12 = vadd.f32 %v3414_v8, %v1051_v11  ;;  %v2702_v13 = vpop.f32.mrb[2].mxu1  ;;  %v2631_v24 = vpop.f32.mrb[0].mxu0 }
  0xe4   :  { %v1308_v14 = vsub.f32 0.0, %v1060_v10  ;;  %v1063_v15 = vadd.f32 %v2702_v13, %v3414_v8  ;;  %v1054_v16 = vpop.f32.mrb[3].mxu1  ;;  %v482_v28 = vpop.f32.mrb[1].mxu0  ;;  %v3429_v38 = vadd.f32 %v2631_v24, %v3423_v27 }
  0xe5   :  { %v1306_v17 = vsub.f32 0.0, %v1052_v12  ;;  %v1055_v18 = vadd.f32 %v3414_v8, %v1054_v16  ;;  %v2632_v31 = vpop.f32.mrb[2].mxu0  ;;  %v3433_v41 = vadd.f32 %v3423_v27, %v482_v28 }
  0xe6   :  { %v1374_v19 = vmul.f32 1.442695, %v1308_v14  ;;  %v1309_v20 = vsub.f32 0.0, %v1063_v15  ;;  %v485_v34 = vpop.f32.mrb[3].mxu0  ;;  %v3436_v44 = vadd.f32 %v2632_v31, %v3423_v27  ;;  %v1692_v49 = vmax.f32 %v3429_v38, 0.0 }
  0xe7   :  { %v1370_v21 = vmul.f32 1.442695, %v1306_v17  ;;  %v1307_v22 = vsub.f32 0.0, %v1055_v18  ;;  %v3439_v45 = vadd.f32 %v3423_v27, %v485_v34  ;;  %v1690_v53 = vmax.f32 %v3433_v41, 0.0 }
  0xe8   :  { %2835 = vpow2.f32 %v1374_v19  ;;  %v1376_v23 = vmul.f32 1.442695, %v1309_v20  ;;  %v1693_v59 = vmax.f32 %v3436_v44, 0.0 }
  0xe9   :  { %2837 = vpow2.f32 %v1370_v21  ;;  %v1372_v25 = vmul.f32 1.442695, %v1307_v22  ;;  %v2705_v26 = vpop.f32.mrb[4].mxu1  ;;  %v1691_v60 = vmax.f32 %v3439_v45, 0.0 }
  0xea   :  { %2839 = vpow2.f32 %v1376_v23  ;;  %v1076_v29 = vadd.f32 %v2705_v26, %v3414_v8  ;;  %v1067_v30 = vpop.f32.mrb[5].mxu1 }
  0xeb   :  { %2841 = vpow2.f32 %v1372_v25  ;;  %v1068_v32 = vadd.f32 %v3414_v8, %v1067_v30  ;;  %v2706_v33 = vpop.f32.mrb[6].mxu1  ;;  %v2635_v50 = vpop.f32.mrb[4].mxu0 }
  0xec   :  { %v1312_v35 = vsub.f32 0.0, %v1076_v29  ;;  %v1079_v36 = vadd.f32 %v2706_v33, %v3414_v8  ;;  %v1070_v37 = vpop.f32.mrb[7].mxu1  ;;  %v3444_v54 = vadd.f32 %v2635_v50, %v3423_v27  ;;  %v498_v55 = vpop.f32.mrb[5].mxu0 }
  0xed   :  { %v1310_v39 = vsub.f32 0.0, %v1068_v32  ;;  %v1071_v40 = vadd.f32 %v3414_v8, %v1070_v37  ;;  %v2636_v61 = vpop.f32.mrb[6].mxu0  ;;  %v3451_v2 = vadd.f32 %v3423_v27, %v498_v55 }
  0xee   :  { %v1382_v42 = vmul.f32 1.442695, %v1312_v35  ;;  %v1313_v43 = vsub.f32 0.0, %v1079_v36  ;;  %v501_v3 = vpop.f32.mrb[7].mxu0  ;;  %v1696_v10 = vmax.f32 %v3444_v54, 0.0  ;;  %v3457_v20 = vadd.f32 %v2636_v61, %v3423_v27 }
  0xef   :  { %v1378_v46 = vmul.f32 1.442695, %v1310_v39  ;;  %v1311_v47 = vsub.f32 0.0, %v1071_v40  ;;  %v1694_v22 = vmax.f32 %v3451_v2, 0.0  ;;  %v3461_v23 = vadd.f32 %v3423_v27, %v501_v3 }
  0xf0   :  { %2843 = vpow2.f32 %v1382_v42  ;;  %v1384_v48 = vmul.f32 1.442695, %v1313_v43  ;;  %v1697_v28 = vmax.f32 %v3457_v20, 0.0 }
  0xf1   :  { %2845 = vpow2.f32 %v1378_v46  ;;  %v1380_v51 = vmul.f32 1.442695, %v1311_v47  ;;  %v2709_v52 = vpop.f32.mrb[8].mxu1  ;;  %v1695_v34 = vmax.f32 %v3461_v23, 0.0 }
  0xf2   :  { %v2836_v56 = vpop.eup %2835  ;;  %2847 = vpow2.f32 %v1384_v48  ;;  %v1092_v57 = vadd.f32 %v2709_v52, %v3414_v8  ;;  %v1083_v58 = vpop.f32.mrb[9].mxu1 }
  0xf3   :  { %v2838_v62 = vpop.eup %2837  ;;  %v1500_v63 = vadd.f32 1.0, %v2836_v56  ;;  %2849 = vpow2.f32 %v1380_v51  ;;  %v1084_v0 = vadd.f32 %v3414_v8, %v1083_v58  ;;  %v2710_v1 = vpop.f32.mrb[10].mxu1 }
  0xf4   :  { %v2840_v4 = vpop.eup %2839  ;;  %v1498_v5 = vadd.f32 1.0, %v2838_v62  ;;  %v1316_v6 = vsub.f32 0.0, %v1092_v57  ;;  %v1095_v7 = vadd.f32 %v2710_v1, %v3414_v8  ;;  %v1086_v9 = vpop.f32.mrb[11].mxu1 }
  0xf5   :  { %v2842_v11 = vpop.eup %2841  ;;  %2851 = vrcp.f32 %v1500_v63  ;;  %v1501_v12 = vadd.f32 1.0, %v2840_v4  ;;  %v1314_v13 = vsub.f32 0.0, %v1084_v0  ;;  %v1087_v14 = vadd.f32 %v3414_v8, %v1086_v9  ;;  %v2639_v24 = vpop.f32.mrb[8].mxu0 }
  0xf6   :  { %2853 = vrcp.f32 %v1498_v5  ;;  %v1499_v15 = vadd.f32 1.0, %v2842_v11  ;;  %v1390_v16 = vmul.f32 1.442695, %v1316_v6  ;;  %v1317_v17 = vsub.f32 0.0, %v1095_v7  ;;  %v514_v30 = vpop.f32.mrb[9].mxu0 }
  0xf7   :  { %2855 = vrcp.f32 %v1501_v12  ;;  %v1386_v18 = vmul.f32 1.442695, %v1314_v13  ;;  %v1315_v19 = vsub.f32 0.0, %v1087_v14  ;;  %v3465_v29 = vadd.f32 %v2639_v24, %v3423_v27  ;;  %v2640_v36 = vpop.f32.mrb[10].mxu0 }
  0xf8   :  { %2857 = vrcp.f32 %v1499_v15  ;;  %v1392_v21 = vmul.f32 1.442695, %v1317_v17  ;;  %v3470_v35 = vadd.f32 %v3423_v27, %v514_v30  ;;  %v517_v46 = vpop.f32.mrb[11].mxu0  ;;  %v3480_v9 = vadd.f32 %v2640_v36, %v3423_v27 }
  0xf9   :  { %2859 = vpow2.f32 %v1390_v16  ;;  %v1388_v25 = vmul.f32 1.442695, %v1315_v19  ;;  %v2713_v26 = vpop.f32.mrb[12].mxu1  ;;  %v1700_v43 = vmax.f32 %v3465_v29, 0.0  ;;  %v3487_v16 = vadd.f32 %v3423_v27, %v517_v46 }
  0xfa   :  { %v2844_v31 = vpop.eup %2843  ;;  %2861 = vpow2.f32 %v1386_v18  ;;  %v1108_v32 = vadd.f32 %v2713_v26, %v3414_v8  ;;  %v1099_v33 = vpop.f32.mrb[13].mxu1  ;;  %v1698_v4 = vmax.f32 %v3470_v35, 0.0 }
  0xfb   :  { %v2846_v37 = vpop.eup %2845  ;;  %v1504_v39 = vadd.f32 1.0, %v2844_v31  ;;  %2863 = vpow2.f32 %v1392_v21  ;;  %v1100_v40 = vadd.f32 %v3414_v8, %v1099_v33  ;;  %v2714_v42 = vpop.f32.mrb[14].mxu1 }
  0xfc   :  { %v2848_v47 = vpop.eup %2847  ;;  %v1502_v48 = vadd.f32 1.0, %v2846_v37  ;;  %2865 = vpow2.f32 %v1388_v25  ;;  %v1320_v50 = vsub.f32 0.0, %v1108_v32  ;;  %v1111_v51 = vadd.f32 %v2714_v42, %v3414_v8  ;;  %v1102_v52 = vpop.f32.mrb[15].mxu1 }
  0xfd   :  { %v2850_v55 = vpop.eup %2849  ;;  %2867 = vrcp.f32 %v1504_v39  ;;  %v1505_v56 = vadd.f32 1.0, %v2848_v47  ;;  %v1318_v57 = vsub.f32 0.0, %v1100_v40  ;;  %v1103_v58 = vadd.f32 %v3414_v8, %v1102_v52  ;;  %v3482_v11 = vpop.f32.mrb[12].mxu0 }
  0xfe   :  { %2869 = vrcp.f32 %v1502_v48  ;;  %v1503_v61 = vadd.f32 1.0, %v2850_v55  ;;  %v1398_v62 = vmul.f32 1.442695, %v1320_v50  ;;  %v1321_v63 = vsub.f32 0.0, %v1111_v51  ;;  %v3489_v17 = vpop.f32.mrb[13].mxu0 }
  0xff   :  { %v2852_v0 = vpop.eup %2851  ;;  %2871 = vrcp.f32 %v1505_v56  ;;  %v1394_v1 = vmul.f32 1.442695, %v1318_v57  ;;  %v1319_v3 = vsub.f32 0.0, %v1103_v58  ;;  %v3494_v24 = vpop.f32.mrb[14].mxu0 }
 0x100   :  { %v2854_v5 = vpop.eup %2853  ;;  %2873 = vrcp.f32 %v1503_v61  ;;  %v1756_v6 = vmul.f32 %v2852_v0, %v1692_v49  ;;  %v1400_v7 = vmul.f32 1.442695, %v1321_v63  ;;  %v3499_v31 = vpop.f32.mrb[15].mxu0 }
 0x101   :  { %v2856_v12 = vpop.eup %2855  ;;  %v1754_v13 = vmul.f32 %v2854_v5, %v1690_v53  ;;  %2875 = vpow2.f32 %v1398_v62  ;;  %v1396_v14 = vmul.f32 1.442695, %v1319_v3  ;;  %v2717_v15 = vpop.f32.mrb[16].mxu1 }
 0x102   :  { %v2858_v38 = vpop.eup %2857  ;;  %v2277_v49 = vmul.f32 %v1756_v6, %v1756_v6  ;;  %v1757_v18 = vmul.f32 %v2856_v12, %v1693_v59  ;;  %2877 = vpow2.f32 %v1394_v1  ;;  %v1124_v19 = vadd.f32 %v2717_v15, %v3414_v8  ;;  %v1115_v21 = vpop.f32.mrb[17].mxu1 }
 0x103   :  { %v2860_v41 = vpop.eup %2859  ;;  %v2275_v53 = vmul.f32 %v1754_v13, %v1754_v13  ;;  %v1755_v25 = vmul.f32 %v2858_v38, %v1691_v60  ;;  %2879 = vpow2.f32 %v1400_v7  ;;  %v1116_v26 = vadd.f32 %v3414_v8, %v1115_v21  ;;  %v2718_v30 = vpop.f32.mrb[18].mxu1 }
 0x104   :  { %v2862_v32 = vpop.eup %2861  ;;  %v1508_v44 = vadd.f32 1.0, %v2860_v41  ;;  %v2278_v59 = vmul.f32 %v1757_v18, %v1757_v18  ;;  %2881 = vpow2.f32 %v1396_v14  ;;  %v1324_v33 = vsub.f32 0.0, %v1124_v19  ;;  %v1118_v36 = vpop.f32.mrb[19].mxu1 }
 0x105   :  { %v2864_v37 = vpop.eup %2863  ;;  %v1506_v39 = vadd.f32 1.0, %v2862_v32  ;;  %v2205_v40 = vadd.f32 %v1755_v25, %v1754_v13  ;;  %v2276_v42 = vmul.f32 %v1755_v25, %v1755_v25  ;;  %v1322_v46 = vsub.f32 0.0, %v1116_v26  ;;  %v3504_v62 = vpop.f32.mrb[16].mxu0 }
 0x106   :  { %v2866_v47 = vpop.eup %2865  ;;  %2883 = vrcp.f32 %v1508_v44  ;;  %v1509_v45 = vadd.f32 1.0, %v2864_v37  ;;  %v1406_v60 = vmul.f32 1.442695, %v1324_v33  ;;  %v1127_v48 = vadd.f32 %v2718_v30, %v3414_v8  ;;  %v3508_v7 = vpop.f32.mrb[17].mxu0 }
 0x107   :  { %v2868_v50 = vpop.eup %2867  ;;  %2885 = vrcp.f32 %v1506_v39  ;;  %v1507_v51 = vadd.f32 1.0, %v2866_v47  ;;  %v2206_v52 = vadd.f32 %v2205_v40, %v1756_v6  ;;  %v2339_v55 = vadd.f32 %v2276_v42, %v2275_v53  ;;  %v3512_v14 = vpop.f32.mrb[18].mxu0 }
 0x108   :  { %v2870_v56 = vpop.eup %2869  ;;  %2887 = vrcp.f32 %v1509_v45  ;;  %v1760_v57 = vmul.f32 %v2868_v50, %v1696_v10  ;;  %v1402_v58 = vmul.f32 1.442695, %v1322_v46  ;;  %v1325_v61 = vsub.f32 0.0, %v1127_v48 }
 0x109   :  { %v2872_v63 = vpop.eup %2871  ;;  %2889 = vrcp.f32 %v1507_v51  ;;  %v2340_v0 = vadd.f32 %v2339_v55, %v2277_v49  ;;  %v1758_v1 = vmul.f32 %v2870_v56, %v1694_v22  ;;  %v2207_v3 = vadd.f32 %v2206_v52, %v1757_v18  ;;  %v2721_v5 = vpop.f32.mrb[20].mxu1 }
 0x10a   :  { %v2874_v6 = vpop.eup %2873  ;;  %v2281_v12 = vmul.f32 %v1760_v57, %v1760_v57  ;;  %2891 = vpow2.f32 %v1406_v60  ;;  %v1761_v54 = vmul.f32 %v2872_v63, %v1697_v28  ;;  %v1408_v10 = vmul.f32 1.442695, %v1325_v61  ;;  %v1131_v13 = vpop.f32.mrb[21].mxu1 }
 0x10b   :  { %v2876_v15 = vpop.eup %2875  ;;  %v2208_v38 = vadd.f32 %v2207_v3, %v1758_v1  ;;  %v2279_v49 = vmul.f32 %v1758_v1, %v1758_v1  ;;  %v2341_v19 = vadd.f32 %v2340_v0, %v2278_v59  ;;  %2893 = vpow2.f32 %v1402_v58  ;;  %v3514_v2 = vpop.f32.mrb[22].mxu1 }
 0x10c   :  { %v3516_v22 = vpop.f32.mrb[19].mxu0  ;;  %v2878_v18 = vpop.eup %2877  ;;  %v1512_v21 = vadd.f32 1.0, %v2876_v15  ;;  %v2282_v41 = vmul.f32 %v1761_v54, %v1761_v54  ;;  %v1759_v20 = vmul.f32 %v2874_v6, %v1695_v34  ;;  %2895 = vpow2.f32 %v1408_v10 }
 0x10d   :  { %v1134_v28 = vpop.f32.mrb[23].mxu1  ;;  %v2880_v53 = vpop.eup %2879  ;;  %v1510_v25 = vadd.f32 1.0, %v2878_v18  ;;  %v2342_v26 = vadd.f32 %v2341_v19, %v2279_v49  ;;  %v1119_v30 = vadd.f32 %v3414_v8, %v1118_v36  ;;  %v1140_v32 = vadd.f32 %v2721_v5, %v3414_v8 }
 0x10e   :  { %v2882_v44 = vpop.eup %2881  ;;  %2897 = vrcp.f32 %v1512_v21  ;;  %v1513_v59 = vadd.f32 1.0, %v2880_v53  ;;  %v2209_v33 = vadd.f32 %v2208_v38, %v1759_v20  ;;  %v2280_v37 = vmul.f32 %v1759_v20, %v1759_v20  ;;  %v3523_v45 = vpop.f32.mrb[20].mxu0 }
 0x10f   :  { %2899 = vrcp.f32 %v1510_v25  ;;  %v1511_v39 = vadd.f32 1.0, %v2882_v44  ;;  %v1323_v40 = vsub.f32 0.0, %v1119_v30  ;;  %v1328_v42 = vsub.f32 0.0, %v1140_v32  ;;  %v3527_v52 = vpop.f32.mrb[21].mxu0 }
 0x110   :  { %v2884_v23 = vpop.eup %2883  ;;  %2901 = vrcp.f32 %v1513_v59  ;;  %v2210_v34 = vadd.f32 %v2209_v33, %v1760_v57  ;;  %v2343_v46 = vadd.f32 %v2342_v26, %v2280_v37  ;;  %v1701_v47 = vmax.f32 %v3480_v9, 0.0  ;;  %v3532_v63 = vpop.f32.mrb[22].mxu0 }
 0x111   :  { %v2886_v36 = vpop.eup %2885  ;;  %2903 = vrcp.f32 %v1511_v39  ;;  %v1404_v60 = vmul.f32 1.442695, %v1323_v40  ;;  %v1764_v48 = vmul.f32 %v2884_v23, %v1700_v43  ;;  %v1414_v50 = vmul.f32 1.442695, %v1328_v42  ;;  %v2725_v51 = vpop.f32.mrb[24].mxu1 }
 0x112   :  { %v2888_v55 = vpop.eup %2887  ;;  %v2344_v56 = vadd.f32 %v2343_v46, %v2281_v12  ;;  %v1762_v57 = vmul.f32 %v2886_v36, %v1698_v4  ;;  %v2211_v58 = vadd.f32 %v2210_v34, %v1761_v54  ;;  %v1132_v9 = vadd.f32 %v3414_v8, %v1131_v13  ;;  %v1147_v61 = vpop.f32.mrb[25].mxu1 }
 0x113   :  { %v2890_v0 = vpop.eup %2889  ;;  %2905 = vpow2.f32 %v1404_v60  ;;  %v2285_v1 = vmul.f32 %v1764_v48, %v1764_v48  ;;  %v1765_v29 = vmul.f32 %v2888_v55, %v1701_v47  ;;  %v1699_v43 = vmax.f32 %v3487_v16, 0.0  ;;  %v3535_v3 = vpop.f32.mrb[26].mxu1 }
 0x114   :  { %v3537_v5 = vpop.f32.mrb[23].mxu0  ;;  %v2892_v6 = vpop.eup %2891  ;;  %v2212_v12 = vadd.f32 %v2211_v58, %v1762_v57  ;;  %v2283_v35 = vmul.f32 %v1762_v57, %v1762_v57  ;;  %v2345_v4 = vadd.f32 %v2344_v56, %v2282_v41  ;;  %2907 = vpow2.f32 %v1414_v50 }
 0x115   :  { %v3539_v54 = vpop.f32.mrb[27].mxu1  ;;  %v2894_v10 = vpop.eup %2893  ;;  %v1516_v13 = vadd.f32 1.0, %v2892_v6  ;;  %v2286_v15 = vmul.f32 %v1765_v29, %v1765_v29  ;;  %v1326_v38 = vsub.f32 0.0, %v1132_v9  ;;  %v1763_v49 = vmul.f32 %v2890_v0, %v1699_v43 }
 0x116   :  { %v2896_v19 = vpop.eup %2895  ;;  %v1514_v18 = vadd.f32 1.0, %v2894_v10  ;;  %v2346_v21 = vadd.f32 %v2345_v4, %v2283_v35  ;;  %v1143_v16 = vadd.f32 %v3514_v2, %v3414_v8  ;;  %v1135_v20 = vadd.f32 %v3414_v8, %v1134_v28  ;;  %v3544_v59 = vpop.f32.mrb[24].mxu0 }
 0x117   :  { %2909 = vrcp.f32 %v1516_v13  ;;  %v1517_v53 = vadd.f32 1.0, %v2896_v19  ;;  %v1410_v25 = vmul.f32 1.442695, %v1326_v38  ;;  %v2213_v41 = vadd.f32 %v2212_v12, %v1763_v49  ;;  %v3552_v40 = vpop.f32.mrb[25].mxu0 }
 0x118   :  { %v2898_v26 = vpop.eup %2897  ;;  %2911 = vrcp.f32 %v1514_v18  ;;  %v2284_v30 = vmul.f32 %v1763_v49, %v1763_v49  ;;  %v1329_v32 = vsub.f32 0.0, %v1143_v16  ;;  %v1327_v44 = vsub.f32 0.0, %v1135_v20  ;;  %v3556_v36 = vpop.f32.mrb[26].mxu0 }
 0x119   :  { %v2900_v33 = vpop.eup %2899  ;;  %2913 = vrcp.f32 %v1517_v53  ;;  %v2214_v37 = vadd.f32 %v2213_v41, %v1764_v48  ;;  %v539_v39 = vadd.f32 %v3482_v11, %v3423_v27  ;;  %v531_v2 = vadd.f32 %v3423_v27, %v3489_v17  ;;  %v3550_v28 = vpop.f32.mrb[28].mxu1 }
 0x11a   :  { %v2902_v42 = vpop.eup %2901  ;;  %2915 = vpow2.f32 %v1410_v25  ;;  %v2347_v23 = vadd.f32 %v2346_v21, %v2284_v30  ;;  %v1416_v34 = vmul.f32 1.442695, %v1329_v32  ;;  %v1412_v46 = vmul.f32 1.442695, %v1327_v44  ;;  %v3554_v47 = vpop.f32.mrb[29].mxu1 }
 0x11b   :  { %v2904_v60 = vpop.eup %2903  ;;  %v1704_v48 = vmax.f32 %v539_v39, 0.0  ;;  %v1702_v50 = vmax.f32 %v531_v2, 0.0  ;;  %v2215_v11 = vadd.f32 %v2214_v37, %v1765_v29  ;;  %v1156_v55 = vadd.f32 %v2725_v51, %v3414_v8  ;;  %v3559_v17 = vpop.f32.mrb[30].mxu1 }
 0x11c   :  { %v3561_v56 = vpop.f32.mrb[27].mxu0  ;;  %v2348_v57 = vadd.f32 %v2347_v23, %v2285_v1  ;;  %2917 = vpow2.f32 %v1416_v34  ;;  %v542_v58 = vadd.f32 %v3494_v24, %v3423_v27  ;;  %v1148_v9 = vadd.f32 %v3414_v8, %v1147_v61  ;;  %v3566_v0 = vpop.f32.mrb[31].mxu1 }
 0x11d   :  { %v2906_v43 = vpop.eup %2905  ;;  %2919 = vpow2.f32 %v1412_v46  ;;  %v3568_v6 = vmul.f32 %v2898_v26, %v1704_v48  ;;  %v1766_v29 = vmul.f32 %v2900_v33, %v1702_v50  ;;  %v1332_v12 = vsub.f32 0.0, %v1156_v55  ;;  %v3576_v21 = vpop.f32.mrb[28].mxu0 }
 0x11e   :  { %v2908_v51 = vpop.eup %2907  ;;  %v1515_v35 = vadd.f32 1.0, %v2906_v43  ;;  %v2349_v4 = vadd.f32 %v2348_v57, %v2286_v15  ;;  %v1705_v10 = vmax.f32 %v542_v58, 0.0  ;;  %v1330_v13 = vsub.f32 0.0, %v1148_v9  ;;  %v3584_v41 = vpop.f32.mrb[29].mxu0 }
 0x11f   :  { %v1520_v1 = vadd.f32 1.0, %v2908_v51  ;;  %v3572_v38 = vmul.f32 %v3568_v6, %v3568_v6  ;;  %v2216_v24 = vadd.f32 %v2215_v11, %v1766_v29  ;;  %v2287_v61 = vmul.f32 %v1766_v29, %v1766_v29  ;;  %v3596_v33 = vpop.f32.mrb[30].mxu0 }
 0x120   :  { %2921 = vrcp.f32 %v1515_v35  ;;  %v1422_v49 = vmul.f32 1.442695, %v1332_v12  ;;  %v3574_v19 = vmul.f32 %v2902_v42, %v1705_v10  ;;  %v1418_v18 = vmul.f32 1.442695, %v1330_v13  ;;  %v3602_v23 = vpop.f32.mrb[31].mxu0 }
 0x121   :  { %v2910_v16 = vpop.eup %2909  ;;  %2923 = vrcp.f32 %v1520_v1  ;;  %v2350_v20 = vadd.f32 %v2349_v4, %v2287_v61  ;;  %v534_v15 = vadd.f32 %v3423_v27, %v3499_v31  ;;  %v1159_v53 = vadd.f32 %v3535_v3, %v3414_v8  ;;  %v3582_v25 = vpop.f32.mrb[32].mxu1 }
 0x122   :  { %v2912_v26 = vpop.eup %2911  ;;  %2925 = vpow2.f32 %v1422_v49  ;;  %v3588_v30 = vmul.f32 %v3574_v19, %v3574_v19  ;;  %v1151_v32 = vadd.f32 %v3414_v8, %v3539_v54  ;;  %v555_v44 = vadd.f32 %v3504_v62, %v3423_v27  ;;  %v3594_v31 = vpop.f32.mrb[33].mxu1 }
 0x123   :  { %v2914_v3 = vpop.eup %2913  ;;  %2927 = vpow2.f32 %v1418_v18  ;;  %v1703_v37 = vmax.f32 %v534_v15, 0.0  ;;  %v1333_v39 = vsub.f32 0.0, %v1159_v53  ;;  %v547_v2 = vadd.f32 %v3423_v27, %v3508_v7  ;;  %v3600_v42 = vpop.f32.mrb[34].mxu1 }
 0x124   :  { %v2916_v34 = vpop.eup %2915  ;;  %v1331_v54 = vsub.f32 0.0, %v1151_v32  ;;  %v1708_v46 = vmax.f32 %v555_v44, 0.0  ;;  %v1172_v62 = vadd.f32 %v3550_v28, %v3414_v8  ;;  %v558_v48 = vadd.f32 %v3512_v14, %v3423_v27  ;;  %v3608_v50 = vpop.f32.mrb[35].mxu1 }
 0x125   :  { %v1518_v11 = vadd.f32 1.0, %v2916_v34  ;;  %v1767_v55 = vmul.f32 %v2904_v60, %v1703_v37  ;;  %v1424_v57 = vmul.f32 1.442695, %v1333_v39  ;;  %v1706_v58 = vmax.f32 %v547_v2, 0.0  ;;  %v3616_v13 = vpop.f32.mrb[32].mxu0 }
 0x126   :  { %v2918_v7 = vpop.eup %2917  ;;  %v1420_v9 = vmul.f32 1.442695, %v1331_v54  ;;  %v3610_v43 = vmul.f32 %v2910_v16, %v1708_v46  ;;  %v1336_v29 = vsub.f32 0.0, %v1172_v62  ;;  %v1709_v12 = vmax.f32 %v558_v48, 0.0  ;;  %v3621_v16 = vpop.f32.mrb[33].mxu0 }
 0x127   :  { %v2920_v51 = vpop.eup %2919  ;;  %2929 = vrcp.f32 %v1518_v11  ;;  %v1521_v35 = vadd.f32 1.0, %v2918_v7  ;;  %v2217_v4 = vadd.f32 %v2216_v24, %v1767_v55  ;;  %v2288_v28 = vmul.f32 %v1767_v55, %v1767_v55  ;;  %v3629_v44 = vpop.f32.mrb[34].mxu0 }
 0x128   :  { %v1519_v10 = vadd.f32 1.0, %v2920_v51  ;;  %2931 = vpow2.f32 %v1424_v57  ;;  %v3614_v14 = vmul.f32 %v3610_v43, %v3610_v43  ;;  %v1770_v60 = vmul.f32 %v2912_v26, %v1706_v58 }
 0x129   :  { %2933 = vrcp.f32 %v1521_v35  ;;  %v2218_v1 = vadd.f32 %v2217_v4, %v3568_v6  ;;  %v2351_v61 = vadd.f32 %v2350_v20, %v2288_v28  ;;  %v1430_v49 = vmul.f32 1.442695, %v1336_v29  ;;  %v3619_v18 = vpop.f32.mrb[36].mxu1 }
 0x12a   :  { %v2922_v24 = vpop.eup %2921  ;;  %2935 = vrcp.f32 %v1519_v10  ;;  %v2291_v15 = vmul.f32 %v1770_v60, %v1770_v60  ;;  %v3623_v53 = vmul.f32 %v2914_v3, %v1709_v12  ;;  %v1164_v32 = vadd.f32 %v3414_v8, %v3554_v47  ;;  %v3627_v26 = vpop.f32.mrb[37].mxu1 }
 0x12b   :  { %v2924_v37 = vpop.eup %2923  ;;  %v2352_v6 = vadd.f32 %v2351_v61, %v3572_v38  ;;  %2937 = vpow2.f32 %v1420_v9  ;;  %v2219_v20 = vadd.f32 %v2218_v1, %v3574_v19  ;;  %v550_v39 = vadd.f32 %v3423_v27, %v3516_v22  ;;  %v3635_v2 = vpop.f32.mrb[38].mxu1 }
 0x12c   :  { %v3637_v3 = vpop.f32.mrb[35].mxu0  ;;  %v2926_v34 = vpop.eup %2925  ;;  %2939 = vpow2.f32 %v1430_v49  ;;  %v2294_v47 = vmul.f32 %v3623_v53, %v3623_v53  ;;  %v1334_v54 = vsub.f32 0.0, %v1164_v32  ;;  %v1175_v46 = vadd.f32 %v3559_v17, %v3414_v8 }
 0x12d   :  { %v3643_v38 = vpop.f32.mrb[39].mxu1  ;;  %v2928_v62 = vpop.eup %2927  ;;  %v1524_v19 = vadd.f32 1.0, %v2926_v34  ;;  %v2220_v48 = vadd.f32 %v2219_v20, %v1770_v60  ;;  %v2353_v22 = vadd.f32 %v2352_v6, %v3588_v30  ;;  %v1707_v11 = vmax.f32 %v550_v39, 0.0 }
 0x12e   :  { %v1522_v55 = vadd.f32 1.0, %v2928_v62  ;;  %v1426_v57 = vmul.f32 1.442695, %v1334_v54  ;;  %v1337_v58 = vsub.f32 0.0, %v1175_v46  ;;  %v1167_v7 = vadd.f32 %v3414_v8, %v3566_v0  ;;  %v3652_v30 = vpop.f32.mrb[36].mxu0 }
 0x12f   :  { %2941 = vrcp.f32 %v1524_v19  ;;  %v2354_v9 = vadd.f32 %v2353_v22, %v2291_v15  ;;  %v1771_v29 = vmul.f32 %v2922_v24, %v1707_v11  ;;  %v571_v17 = vadd.f32 %v3523_v45, %v3423_v27  ;;  %v3656_v1 = vpop.f32.mrb[37].mxu0 }
 0x130   :  { %2943 = vrcp.f32 %v1522_v55  ;;  %v1432_v12 = vmul.f32 1.442695, %v1337_v58  ;;  %v1335_v51 = vsub.f32 0.0, %v1167_v7  ;;  %v563_v35 = vadd.f32 %v3423_v27, %v3527_v52  ;;  %v3662_v52 = vpop.f32.mrb[38].mxu0 }
 0x131   :  { %v2930_v4 = vpop.eup %2929  ;;  %2945 = vpow2.f32 %v1426_v57  ;;  %v2221_v28 = vadd.f32 %v2220_v48, %v1771_v29  ;;  %v2292_v10 = vmul.f32 %v1771_v29, %v1771_v29  ;;  %v1712_v60 = vmax.f32 %v571_v17, 0.0  ;;  %v3654_v0 = vpop.f32.mrb[40].mxu1 }
 0x132   :  { %v2932_v61 = vpop.eup %2931  ;;  %2947 = vpow2.f32 %v1432_v12  ;;  %v1428_v45 = vmul.f32 1.442695, %v1335_v51  ;;  %v1710_v49 = vmax.f32 %v563_v35, 0.0  ;;  %v1188_v24 = vadd.f32 %v3582_v25, %v3414_v8  ;;  %v3660_v15 = vpop.f32.mrb[41].mxu1 }
 0x133   :  { %v2934_v32 = vpop.eup %2933  ;;  %v1525_v6 = vadd.f32 1.0, %v2932_v61  ;;  %v2222_v20 = vadd.f32 %v2221_v28, %v3610_v43  ;;  %v2355_v39 = vadd.f32 %v2354_v9, %v2292_v10  ;;  %v3665_v34 = vmul.f32 %v2924_v37, %v1712_v60  ;;  %v3667_v54 = vpop.f32.mrb[42].mxu1 }
 0x134   :  { %v3669_v46 = vpop.f32.mrb[39].mxu0  ;;  %v2936_v62 = vpop.eup %2935  ;;  %2949 = vpow2.f32 %v1428_v45  ;;  %v1774_v19 = vmul.f32 %v2930_v4, %v1710_v49  ;;  %v1340_v48 = vsub.f32 0.0, %v1188_v24  ;;  %v574_v25 = vadd.f32 %v3532_v63, %v3423_v27 }
 0x135   :  { %v3673_v22 = vpop.f32.mrb[43].mxu1  ;;  %v2938_v11 = vpop.eup %2937  ;;  %2951 = vrcp.f32 %v1525_v6  ;;  %v2356_v43 = vadd.f32 %v2355_v39, %v3614_v14  ;;  %v3678_v37 = vmul.f32 %v3665_v34, %v3665_v34  ;;  %v2223_v55 = vadd.f32 %v2222_v20, %v3623_v53 }
 0x136   :  { %v2940_v57 = vpop.eup %2939  ;;  %v1523_v58 = vadd.f32 1.0, %v2938_v11  ;;  %v2295_v7 = vmul.f32 %v1774_v19, %v1774_v19  ;;  %v1438_v9 = vmul.f32 1.442695, %v1340_v48  ;;  %v1713_v29 = vmax.f32 %v574_v25, 0.0  ;;  %v3687_v53 = vpop.f32.mrb[40].mxu0 }
 0x137   :  { %v1528_v17 = vadd.f32 1.0, %v2940_v57  ;;  %v2224_v12 = vadd.f32 %v2223_v55, %v1774_v19  ;;  %v2357_v63 = vadd.f32 %v2356_v43, %v2294_v47  ;;  %v1180_v51 = vadd.f32 %v3414_v8, %v3594_v31  ;;  %v3693_v31 = vpop.f32.mrb[41].mxu0 }
 0x138   :  { %2953 = vrcp.f32 %v1523_v58  ;;  %v1777_v35 = vmul.f32 %v2934_v32, %v1713_v29  ;;  %v566_v14 = vadd.f32 %v3423_v27, %v3537_v5  ;;  %v1191_v4 = vadd.f32 %v3600_v42, %v3414_v8  ;;  %v3697_v42 = vpop.f32.mrb[42].mxu0 }
 0x139   :  { %v2942_v28 = vpop.eup %2941  ;;  %2955 = vrcp.f32 %v1528_v17  ;;  %v2358_v10 = vadd.f32 %v2357_v63, %v2295_v7  ;;  %v1338_v60 = vsub.f32 0.0, %v1180_v51  ;;  %v1183_v47 = vadd.f32 %v3414_v8, %v3608_v50  ;;  %v3691_v61 = vpop.f32.mrb[44].mxu1 }
 0x13a   :  { %v2944_v45 = vpop.eup %2943  ;;  %2957 = vpow2.f32 %v1438_v9  ;;  %v2298_v49 = vmul.f32 %v1777_v35, %v1777_v35  ;;  %v1711_v5 = vmax.f32 %v566_v14, 0.0  ;;  %v1341_v24 = vsub.f32 0.0, %v1191_v4  ;;  %v3695_v32 = vpop.f32.mrb[45].mxu1 }
 0x13b   :  { %v2946_v6 = vpop.eup %2945  ;;  %v1434_v20 = vmul.f32 1.442695, %v1338_v60  ;;  %v1339_v39 = vsub.f32 0.0, %v1183_v47  ;;  %v587_v19 = vadd.f32 %v3544_v59, %v3423_v27  ;;  %v579_v50 = vadd.f32 %v3423_v27, %v3552_v40  ;;  %v3703_v48 = vpop.f32.mrb[46].mxu1 }
 0x13c   :  { %v3705_v25 = vpop.f32.mrb[43].mxu0  ;;  %v2948_v11 = vpop.eup %2947  ;;  %v1526_v43 = vadd.f32 1.0, %v2946_v6  ;;  %v1775_v55 = vmul.f32 %v2936_v62, %v1711_v5  ;;  %v1440_v57 = vmul.f32 1.442695, %v1341_v24  ;;  %v1204_v58 = vadd.f32 %v3619_v18, %v3414_v8 }
 0x13d   :  { %v3709_v7 = vpop.f32.mrb[47].mxu1  ;;  %v1529_v9 = vadd.f32 1.0, %v2948_v11  ;;  %2959 = vpow2.f32 %v1434_v20  ;;  %v1436_v29 = vmul.f32 1.442695, %v1339_v39  ;;  %v1716_v59 = vmax.f32 %v587_v19, 0.0  ;;  %v3714_v5 = vpop.f32.mrb[44].mxu0 }
 0x13e   :  { %v2950_v17 = vpop.eup %2949  ;;  %2961 = vrcp.f32 %v1526_v43  ;;  %v2225_v40 = vadd.f32 %v2224_v12, %v1775_v55  ;;  %v2296_v63 = vmul.f32 %v1775_v55, %v1775_v55  ;;  %v1714_v51 = vmax.f32 %v579_v50, 0.0 }
 0x13f   :  { %v2952_v14 = vpop.eup %2951  ;;  %2963 = vrcp.f32 %v1529_v9  ;;  %v1527_v4 = vadd.f32 1.0, %v2950_v17  ;;  %v3711_v60 = vmul.f32 %v2942_v28, %v1716_v59  ;;  %v1344_v62 = vsub.f32 0.0, %v1204_v58  ;;  %v3724_v28 = vpop.f32.mrb[45].mxu0 }
 0x140   :  { %v2226_v47 = vadd.f32 %v2225_v40, %v3665_v34  ;;  %v2359_v8 = vadd.f32 %v2358_v10, %v2296_v63  ;;  %2965 = vpow2.f32 %v1440_v57  ;;  %v1778_v18 = vmul.f32 %v2944_v45, %v1714_v51  ;;  %v3729_v50 = vpop.f32.mrb[46].mxu0 }
 0x141   :  { %2967 = vrcp.f32 %v1527_v4  ;;  %v3718_v24 = vmul.f32 %v3711_v60, %v3711_v60  ;;  %v1446_v12 = vmul.f32 1.442695, %v1344_v62  ;;  %v590_v6 = vadd.f32 %v3556_v36, %v3423_v27  ;;  %v3722_v20 = vpop.f32.mrb[48].mxu1  ;;  %v3734_v36 = vld [vmem:[%s3967_s5] ss:$0 sm:$0xff]  ;;  %v3742_v57 = vpop.f32.mrb[47].mxu0 }
 0x142   :  { %v2954_v39 = vpop.eup %2953  ;;  %v2360_v34 = vadd.f32 %v2359_v8, %v3678_v37  ;;  %2969 = vpow2.f32 %v1436_v29  ;;  %v2227_v10 = vadd.f32 %v2226_v47, %v1777_v35  ;;  %v2299_v45 = vmul.f32 %v1778_v18, %v1778_v18  ;;  %v3727_v19 = vpop.f32.mrb[49].mxu1  ;;  %v3753_v47 = vld [vmem:[%s3968_s3] ss:$0 sm:$0xff] }
 0x143   :  { %v2956_v11 = vpop.eup %2955  ;;  %2971 = vpow2.f32 %v1446_v12  ;;  %v1717_v43 = vmax.f32 %v590_v6, 0.0  ;;  %v1196_v55 = vadd.f32 %v3734_v36, %v3627_v26  ;;  %v582_v37 = vadd.f32 %v3423_v27, %v3561_v56  ;;  %v3740_v35 = vpop.f32.mrb[50].mxu1 }
 0x144   :  { %v2958_v58 = vpop.eup %2957  ;;  %v2228_v9 = vadd.f32 %v2227_v10, %v1778_v18  ;;  %v2361_v29 = vadd.f32 %v2360_v34, %v2298_v49  ;;  %v1207_v59 = vadd.f32 %v3734_v36, %v3635_v2  ;;  %v1199_v17 = vadd.f32 %v3734_v36, %v3643_v38  ;;  %v3748_v40 = vpop.f32.mrb[51].mxu1 }
 0x145   :  { %v1532_v63 = vadd.f32 1.0, %v2958_v58  ;;  %v1781_v26 = vmul.f32 %v2952_v14, %v1717_v43  ;;  %v1342_v51 = vsub.f32 0.0, %v1196_v55  ;;  %v1715_v4 = vmax.f32 %v582_v37, 0.0 }
 0x146   :  { %v2362_v27 = vadd.f32 %v2361_v29, %v2299_v45  ;;  %v1345_v56 = vsub.f32 0.0, %v1207_v59  ;;  %v1343_v62 = vsub.f32 0.0, %v1199_v17  ;;  %v603_v2 = vadd.f32 %v3753_v47, %v3576_v21  ;;  %v3761_v21 = vpop.f32.mrb[48].mxu0 }
 0x147   :  { %v2960_v49 = vpop.eup %2959  ;;  %2973 = vrcp.f32 %v1532_v63  ;;  %v2302_v38 = vmul.f32 %v1781_v26, %v1781_v26  ;;  %v1442_v8 = vmul.f32 1.442695, %v1342_v51  ;;  %v1779_v18 = vmul.f32 %v2954_v39, %v1715_v4 }
 0x148   :  { %v2962_v12 = vpop.eup %2961  ;;  %v1530_v14 = vadd.f32 1.0, %v2960_v49  ;;  %v1448_v6 = vmul.f32 1.442695, %v1345_v56  ;;  %v1444_v34 = vmul.f32 1.442695, %v1343_v62  ;;  %v1720_v10 = vmax.f32 %v603_v2, 0.0 }
 0x149   :  { %v2964_v45 = vpop.eup %2963  ;;  %2975 = vpow2.f32 %v1442_v8  ;;  %v2229_v43 = vadd.f32 %v2228_v9, %v1779_v18  ;;  %v2300_v55 = vmul.f32 %v1779_v18, %v1779_v18  ;;  %v595_v37 = vadd.f32 %v3753_v47, %v3584_v41  ;;  %v3759_v58 = vpop.f32.mrb[52].mxu1 }
 0x14a   :  { %v2966_v29 = vpop.eup %2965  ;;  %2977 = vrcp.f32 %v1530_v14  ;;  %v3763_v59 = vmul.f32 %v2956_v11, %v1720_v10  ;;  %v1220_v39 = vadd.f32 %v3734_v36, %v3654_v0  ;;  %v606_v17 = vadd.f32 %v3753_v47, %v3596_v33  ;;  %v3769_v63 = vpop.f32.mrb[53].mxu1 }
 0x14b   :  { %v3771_v9 = vpop.f32.mrb[49].mxu0  ;;  %v2968_v51 = vpop.eup %2967  ;;  %v1533_v41 = vadd.f32 1.0, %v2966_v29  ;;  %v2230_v4 = vadd.f32 %v2229_v43, %v3711_v60  ;;  %v2363_v56 = vadd.f32 %v2362_v27, %v2300_v55  ;;  %2979 = vpow2.f32 %v1448_v6 }
 0x14c   :  { %v3774_v62 = vpop.f32.mrb[54].mxu1  ;;  %v3776_v11 = vpop.f32.mrb[50].mxu0  ;;  %2981 = vpow2.f32 %v1444_v34  ;;  %v3780_v0 = vmul.f32 %v3763_v59, %v3763_v59  ;;  %v1718_v33 = vmax.f32 %v595_v37, 0.0  ;;  %v1348_v49 = vsub.f32 0.0, %v1220_v39 }
 0x14d   :  { %3971 = vst [vmem:[#allocation2_spill] sm:$0xff] %v3776_v11  ;;  %v2970_v2 = vpop.eup %2969  ;;  %v3782_v8 = vpop.f32.mrb[55].mxu1  ;;  %2983 = vrcp.f32 %v1533_v41  ;;  %v2364_v27 = vadd.f32 %v2363_v56, %v3718_v24  ;;  %v2231_v6 = vadd.f32 %v2230_v4, %v1781_v26  ;;  %v1721_v34 = vmax.f32 %v606_v17, 0.0 }
 0x14e   :  { %v3784_v18 = vpop.f32.mrb[51].mxu0  ;;  %v2972_v14 = vpop.eup %2971  ;;  %v1531_v60 = vadd.f32 1.0, %v2970_v2  ;;  %v1782_v43 = vmul.f32 %v2962_v12, %v1718_v33  ;;  %v1454_v55 = vmul.f32 1.442695, %v1348_v49  ;;  %v1212_v37 = vadd.f32 %v3734_v36, %v3660_v15 }
 0x14f   :  { %3972 = vst [vmem:[#allocation3_spill] sm:$0xff] %v3784_v18  ;;  %v1536_v10 = vadd.f32 1.0, %v2972_v14  ;;  %v2365_v29 = vadd.f32 %v2364_v27, %v2302_v38  ;;  %v598_v39 = vadd.f32 %v3753_v47, %v3602_v23  ;;  %v1785_v41 = vmul.f32 %v2964_v45, %v1721_v34  ;;  %v3791_v2 = vpop.f32.mrb[52].mxu0 }
 0x150   :  { %2985 = vrcp.f32 %v1531_v60  ;;  %v2232_v18 = vadd.f32 %v2231_v6, %v1782_v43  ;;  %v2303_v11 = vmul.f32 %v1782_v43, %v1782_v43  ;;  %v1346_v26 = vsub.f32 0.0, %v1212_v37  ;;  %v3797_v4 = vpop.f32.mrb[53].mxu0 }
 0x151   :  { %2987 = vrcp.f32 %v1536_v10  ;;  %v2974_v24 = vpop.eup %2973  ;;  %v1719_v12 = vmax.f32 %v598_v39, 0.0  ;;  %v1223_v17 = vadd.f32 %v3734_v36, %v3667_v54  ;;  %v3795_v38 = vpop.f32.mrb[56].mxu1  ;;  %v2306_v56 = vmul.f32 %v1785_v41, %v1785_v41 }
 0x152   :  { %2989 = vpow2.f32 %v1454_v55  ;;  %v2366_v15 = vadd.f32 %v2365_v29, %v2303_v11  ;;  %v1215_v23 = vadd.f32 %v3734_v36, %v3673_v22  ;;  %v619_v45 = vadd.f32 %v3753_v47, %v3616_v13  ;;  %v3803_v33 = vpop.f32.mrb[57].mxu1  ;;  %v3805_v49 = vpop.f32.mrb[54].mxu0 }
 0x153   :  { %3973 = vst [vmem:[#allocation4_spill] sm:$0xff] %v3805_v49  ;;  %v2976_v14 = vpop.eup %2975  ;;  %v1450_v60 = vmul.f32 1.442695, %v1346_v26  ;;  %v1783_v27 = vmul.f32 %v2968_v51, %v1719_v12  ;;  %v1349_v54 = vsub.f32 0.0, %v1223_v17  ;;  %v611_v6 = vadd.f32 %v3753_v47, %v3621_v16  ;;  %v3809_v10 = vpop.f32.mrb[58].mxu1 }
 0x154   :  { %v3811_v11 = vpop.f32.mrb[55].mxu0  ;;  %v2978_v43 = vpop.eup %2977  ;;  %v1534_v22 = vadd.f32 1.0, %v2976_v14  ;;  %v1347_v55 = vsub.f32 0.0, %v1215_v23  ;;  %v1724_v34 = vmax.f32 %v619_v45, 0.0  ;;  %v1236_v13 = vadd.f32 %v3734_v36, %v3691_v61 }
 0x155   :  { %3974 = vst [vmem:[#allocation5_spill] sm:$0xff] %v3811_v11  ;;  %v3815_v29 = vpop.f32.mrb[59].mxu1  ;;  %v2980_v37 = vpop.eup %2979  ;;  %2991 = vpow2.f32 %v1450_v60  ;;  %v2233_v51 = vadd.f32 %v2232_v18, %v1783_v27  ;;  %v2304_v39 = vmul.f32 %v1783_v27, %v1783_v27  ;;  %v1456_v26 = vmul.f32 1.442695, %v1349_v54 }
 0x156   :  { %v2982_v12 = vpop.eup %2981  ;;  %2993 = vrcp.f32 %v1534_v22  ;;  %v1537_v16 = vadd.f32 1.0, %v2980_v37  ;;  %v1452_v17 = vmul.f32 1.442695, %v1347_v55  ;;  %v3817_v49 = vmul.f32 %v2974_v24, %v1724_v34  ;;  %v3824_v27 = vpop.f32.mrb[56].mxu0 }
 0x157   :  { %v2984_v11 = vpop.eup %2983  ;;  %v1535_v14 = vadd.f32 1.0, %v2982_v12  ;;  %v2234_v23 = vadd.f32 %v2233_v51, %v3763_v59  ;;  %v2367_v45 = vadd.f32 %v2366_v15, %v2304_v39  ;;  %2995 = vpow2.f32 %v1456_v26  ;;  %v3831_v15 = vpop.f32.mrb[57].mxu0 }
 0x158   :  { %2997 = vrcp.f32 %v1537_v16  ;;  %v3822_v61 = vmul.f32 %v3817_v49, %v3817_v49  ;;  %v1722_v18 = vmax.f32 %v611_v6, 0.0  ;;  %v1352_v60 = vsub.f32 0.0, %v1236_v13  ;;  %3975 = vst [vmem:[#allocation6_spill] sm:$0xff] %v3831_v15  ;;  %v3837_v39 = vpop.f32.mrb[58].mxu0 }
 0x159   :  { %2999 = vrcp.f32 %v1535_v14  ;;  %v2368_v24 = vadd.f32 %v2367_v45, %v3780_v0  ;;  %v2235_v22 = vadd.f32 %v2234_v23, %v1785_v41  ;;  %v622_v55 = vadd.f32 %v3753_v47, %v3629_v44  ;;  %v3829_v59 = vpop.f32.mrb[60].mxu1  ;;  %3976 = vst [vmem:[#allocation7_spill] sm:$0xff] %v3837_v39 }
 0x15a   :  { %v2986_v54 = vpop.eup %2985  ;;  %3001 = vpow2.f32 %v1452_v17  ;;  %v1786_v37 = vmul.f32 %v2978_v43, %v1722_v18  ;;  %v1462_v51 = vmul.f32 1.442695, %v1352_v60  ;;  %v1228_v6 = vadd.f32 %v3734_v36, %v3695_v32  ;;  %v3835_v13 = vpop.f32.mrb[61].mxu1 }
 0x15b   :  { %v2988_v34 = vpop.eup %2987  ;;  %v2369_v41 = vadd.f32 %v2368_v24, %v2306_v56  ;;  %v1725_v26 = vmax.f32 %v622_v55, 0.0  ;;  %v614_v44 = vadd.f32 %v3753_v47, %v3637_v3  ;;  %v1239_v12 = vadd.f32 %v3734_v36, %v3703_v48  ;;  %v3843_v16 = vpop.f32.mrb[62].mxu1 }
 0x15c   :  { %v2990_v0 = vpop.eup %2989  ;;  %v3845_v43 = vpop.f32.mrb[59].mxu0  ;;  %v2236_v14 = vadd.f32 %v2235_v22, %v1786_v37  ;;  %v2307_v32 = vmul.f32 %v1786_v37, %v1786_v37  ;;  %3003 = vpow2.f32 %v1462_v51  ;;  %v1350_v18 = vsub.f32 0.0, %v1228_v6 }
 0x15d   :  { %3977 = vst [vmem:[#allocation8_spill] sm:$0xff] %v3845_v43  ;;  %v1540_v17 = vadd.f32 1.0, %v2990_v0  ;;  %v3847_v23 = vpop.f32.mrb[63].mxu1  ;;  %v1789_v45 = vmul.f32 %v2984_v11, %v1725_v26  ;;  %v1723_v56 = vmax.f32 %v614_v44, 0.0  ;;  %v1353_v60 = vsub.f32 0.0, %v1239_v12  ;;  %v3855_v26 = vpop.f32.mrb[60].mxu0 }
 0x15e   :  { %v2370_v24 = vadd.f32 %v2369_v41, %v2307_v32  ;;  %v1231_v3 = vadd.f32 %v3734_v36, %v3709_v7  ;;  %v635_v48 = vadd.f32 %v3753_v47, %v3652_v30  ;;  %v1458_v0 = vmul.f32 1.442695, %v1350_v18  ;;  %v3859_v12 = vpop.f32.mrb[61].mxu0 }
 0x15f   :  { %3005 = vrcp.f32 %v1540_v17  ;;  %v2992_v55 = vpop.eup %2991  ;;  %v2310_v43 = vmul.f32 %v1789_v45, %v1789_v45  ;;  %v1787_v22 = vmul.f32 %v2986_v54, %v1723_v56  ;;  %v1464_v37 = vmul.f32 1.442695, %v1353_v60  ;;  %v3863_v56 = vpop.f32.mrb[62].mxu0 }
 0x160   :  { %v2994_v51 = vpop.eup %2993  ;;  %v1538_v39 = vadd.f32 1.0, %v2992_v55  ;;  %v1351_v15 = vsub.f32 0.0, %v1231_v3  ;;  %v1728_v11 = vmax.f32 %v635_v48, 0.0  ;;  %v627_v6 = vadd.f32 %v3753_v47, %v3656_v1  ;;  %v3866_v48 = vpop.f32.mrb[63].mxu0 }
 0x161   :  { %v2996_v41 = vpop.eup %2995  ;;  %3007 = vpow2.f32 %v1458_v0  ;;  %v2237_v7 = vadd.f32 %v2236_v14, %v1787_v22  ;;  %v2308_v44 = vmul.f32 %v1787_v22, %v1787_v22  ;;  %v1252_v30 = vadd.f32 %v3734_v36, %v3722_v20 }
 0x162   :  { %v2998_v54 = vpop.eup %2997  ;;  %3009 = vrcp.f32 %v1538_v39  ;;  %v1541_v17 = vadd.f32 1.0, %v2996_v41  ;;  %v1460_v32 = vmul.f32 1.442695, %v1351_v15  ;;  %v3861_v18 = vmul.f32 %v2988_v34, %v1728_v11 }
 0x163   :  { %v3000_v1 = vpop.eup %2999  ;;  %v2238_v60 = vadd.f32 %v2237_v7, %v3817_v49  ;;  %v2371_v3 = vadd.f32 %v2370_v24, %v2308_v44  ;;  %3011 = vpow2.f32 %v1464_v37  ;;  %v1726_v14 = vmax.f32 %v627_v6, 0.0 }
 0x164   :  { %v3002_v55 = vpop.eup %3001  ;;  %3013 = vrcp.f32 %v1541_v17  ;;  %v3870_v20 = vmul.f32 %v3861_v18, %v3861_v18  ;;  %v1356_v39 = vsub.f32 0.0, %v1252_v30  ;;  %v638_v15 = vadd.f32 %v3753_v47, %v3662_v52 }
 0x165   :  { %v1539_v34 = vadd.f32 1.0, %v3002_v55  ;;  %v2372_v0 = vadd.f32 %v2371_v3, %v3822_v61  ;;  %3015 = vpow2.f32 %v1460_v32  ;;  %v1790_v49 = vmul.f32 %v2994_v51, %v1726_v14 }
 0x166   :  { %v3004_v24 = vpop.eup %3003  ;;  %v2239_v22 = vadd.f32 %v2238_v60, %v1789_v45  ;;  %v1470_v37 = vmul.f32 1.442695, %v1356_v39  ;;  %v1729_v11 = vmax.f32 %v638_v15, 0.0  ;;  %v1244_v6 = vadd.f32 %v3734_v36, %v3727_v19 }
 0x167   :  { %3017 = vrcp.f32 %v1539_v34  ;;  %v1544_v41 = vadd.f32 1.0, %v3004_v24  ;;  %v2311_v7 = vmul.f32 %v1790_v49, %v1790_v49  ;;  %v2373_v44 = vadd.f32 %v2372_v0, %v2310_v43 }
 0x168   :  { %v2240_v17 = vadd.f32 %v2239_v22, %v1790_v49  ;;  %3019 = vpow2.f32 %v1470_v37  ;;  %v1793_v52 = vmul.f32 %v2998_v54, %v1729_v11  ;;  %v1354_v55 = vsub.f32 0.0, %v1244_v6 }
 0x169   :  { %v3006_v30 = vpop.eup %3005  ;;  %3021 = vrcp.f32 %v1544_v41  ;;  %v2374_v61 = vadd.f32 %v2373_v44, %v2311_v7  ;;  %v630_v51 = vadd.f32 %v3753_v47, %v3669_v46  ;;  %v1255_v45 = vadd.f32 %v3734_v36, %v3740_v35 }
 0x16a   :  { %v2314_v32 = vmul.f32 %v1793_v52, %v1793_v52  ;;  %v1466_v60 = vmul.f32 1.442695, %v1354_v55  ;;  %v1247_v19 = vadd.f32 %v3734_v36, %v3748_v40  ;;  %v651_v43 = vadd.f32 %v3753_v47, %v3687_v53 }
 0x16b   :  { %v3008_v3 = vpop.eup %3007  ;;  %v1727_v14 = vmax.f32 %v630_v51, 0.0  ;;  %v1357_v54 = vsub.f32 0.0, %v1255_v45  ;;  %v643_v39 = vadd.f32 %v3753_v47, %v3693_v31  ;;  %v1268_v46 = vadd.f32 %v3734_v36, %v3759_v58 }
 0x16c   :  { %v3010_v15 = vpop.eup %3009  ;;  %v1542_v34 = vadd.f32 1.0, %v3008_v3  ;;  %3023 = vpow2.f32 %v1466_v60  ;;  %v1355_v35 = vsub.f32 0.0, %v1247_v19  ;;  %v1732_v0 = vmax.f32 %v651_v43, 0.0 }
 0x16d   :  { %v3012_v49 = vpop.eup %3011  ;;  %v1791_v24 = vmul.f32 %v3000_v1, %v1727_v14  ;;  %v1472_v40 = vmul.f32 1.442695, %v1357_v54  ;;  %v1730_v22 = vmax.f32 %v643_v39, 0.0  ;;  %v1360_v37 = vsub.f32 0.0, %v1268_v46 }
 0x16e   :  { %v3014_v53 = vpop.eup %3013  ;;  %3025 = vrcp.f32 %v1542_v34  ;;  %v1545_v11 = vadd.f32 1.0, %v3012_v49  ;;  %v1468_v6 = vmul.f32 1.442695, %v1355_v35  ;;  %v1796_v41 = vmul.f32 %v3006_v30, %v1732_v0 }
 0x16f   :  { %v3016_v7 = vpop.eup %3015  ;;  %v2241_v31 = vadd.f32 %v2240_v17, %v1791_v24  ;;  %v2312_v44 = vmul.f32 %v1791_v24, %v1791_v24  ;;  %3027 = vpow2.f32 %v1472_v40  ;;  %v1794_v58 = vmul.f32 %v3010_v15, %v1730_v22 }
 0x170   :  { %3029 = vrcp.f32 %v1545_v11  ;;  %v1543_v55 = vadd.f32 1.0, %v3016_v7  ;;  %v2317_v51 = vmul.f32 %v1796_v41, %v1796_v41  ;;  %v1478_v45 = vmul.f32 1.442695, %v1360_v37 }
 0x171   :  { %v3018_v60 = vpop.eup %3017  ;;  %v2242_v1 = vadd.f32 %v2241_v31, %v3861_v18  ;;  %v2375_v19 = vadd.f32 %v2374_v61, %v2312_v44  ;;  %3031 = vpow2.f32 %v1468_v6  ;;  %v2315_v43 = vmul.f32 %v1794_v58, %v1794_v58 }
 0x172   :  { %v3020_v3 = vpop.eup %3019  ;;  %3033 = vrcp.f32 %v1543_v55  ;;  %v654_v30 = vadd.f32 %v3753_v47, %v3697_v42  ;;  %v1260_v17 = vadd.f32 %v3734_v36, %v3769_v63  ;;  %v646_v14 = vadd.f32 %v3753_v47, %v3705_v25 }
 0x173   :  { %v3022_v54 = vpop.eup %3021  ;;  %v1548_v39 = vadd.f32 1.0, %v3020_v3  ;;  %v2376_v46 = vadd.f32 %v2375_v19, %v3870_v20  ;;  %v2243_v15 = vadd.f32 %v2242_v1, %v1793_v52  ;;  %3035 = vpow2.f32 %v1478_v45 }
 0x174   :  { %v1733_v18 = vmax.f32 %v654_v30, 0.0  ;;  %v1358_v61 = vsub.f32 0.0, %v1260_v17  ;;  %v1731_v34 = vmax.f32 %v646_v14, 0.0  ;;  %v1271_v35 = vadd.f32 %v3734_v36, %v3774_v62 }
 0x175   :  { %3037 = vrcp.f32 %v1548_v39  ;;  %v2244_v42 = vadd.f32 %v2243_v15, %v1794_v58  ;;  %v2377_v0 = vadd.f32 %v2376_v46, %v2314_v32  ;;  %v1263_v63 = vadd.f32 %v3734_v36, %v3782_v8 }
 0x176   :  { %v3024_v49 = vpop.eup %3023  ;;  %v1797_v25 = vmul.f32 %v3014_v53, %v1733_v18  ;;  %v1474_v24 = vmul.f32 1.442695, %v1358_v61  ;;  %v1795_v40 = vmul.f32 %v3018_v60, %v1731_v34  ;;  %v1361_v22 = vsub.f32 0.0, %v1271_v35 }
 0x177   :  { %v1546_v20 = vadd.f32 1.0, %v3024_v49  ;;  %v2378_v52 = vadd.f32 %v2377_v0, %v2315_v43  ;;  %v1359_v37 = vsub.f32 0.0, %v1263_v63  ;;  %v667_v11 = vadd.f32 %v3753_v47, %v3714_v5 }
 0x178   :  { %v3026_v6 = vpop.eup %3025  ;;  %v2318_v7 = vmul.f32 %v1797_v25, %v1797_v25  ;;  %3039 = vpow2.f32 %v1474_v24  ;;  %v2245_v62 = vadd.f32 %v2244_v42, %v1795_v40  ;;  %v2316_v31 = vmul.f32 %v1795_v40, %v1795_v40 }
 0x179   :  { %v3028_v32 = vpop.eup %3027  ;;  %3041 = vrcp.f32 %v1546_v20  ;;  %v1480_v44 = vmul.f32 1.442695, %v1361_v22  ;;  %v1476_v8 = vmul.f32 1.442695, %v1359_v37  ;;  %v1736_v58 = vmax.f32 %v667_v11, 0.0 }
 0x17a   :  { %v3030_v53 = vpop.eup %3029  ;;  %v1549_v55 = vadd.f32 1.0, %v3028_v32  ;;  %v2246_v45 = vadd.f32 %v2245_v62, %v1796_v41  ;;  %v2379_v60 = vadd.f32 %v2378_v52, %v2316_v31  ;;  %v659_v1 = vadd.f32 %v3753_v47, %v3724_v28 }
 0x17b   :  { %v3032_v19 = vpop.eup %3031  ;;  %3043 = vpow2.f32 %v1480_v44  ;;  %v1800_v5 = vmul.f32 %v3022_v54, %v1736_v58  ;;  %v1284_v43 = vadd.f32 %v3734_v36, %v3795_v38  ;;  %v670_v3 = vadd.f32 %v3753_v47, %v3729_v50 }
 0x17c   :  { %v3034_v30 = vpop.eup %3033  ;;  %3045 = vrcp.f32 %v1549_v55  ;;  %v1547_v17 = vadd.f32 1.0, %v3032_v19  ;;  %v2380_v14 = vadd.f32 %v2379_v60, %v2317_v51  ;;  %v1734_v39 = vmax.f32 %v659_v1, 0.0 }
 0x17d   :  { %v3036_v46 = vpop.eup %3035  ;;  %3047 = vpow2.f32 %v1476_v8  ;;  %v2247_v41 = vadd.f32 %v2246_v45, %v1797_v25  ;;  %v1364_v15 = vsub.f32 0.0, %v1284_v43  ;;  %v2321_v28 = vmul.f32 %v1800_v5, %v1800_v5 }
 0x17e   :  { %v1552_v18 = vadd.f32 1.0, %v3036_v46  ;;  %v1798_v61 = vmul.f32 %v3026_v6, %v1734_v39  ;;  %v2381_v34 = vadd.f32 %v2380_v14, %v2318_v7  ;;  %v1737_v42 = vmax.f32 %v670_v3, 0.0  ;;  %v3978_v46 = vld [vmem:[#allocation2_spill] sm:$0xff] }
 0x17f   :  { %v3038_v54 = vpop.eup %3037  ;;  %v1486_v35 = vmul.f32 1.442695, %v1364_v15  ;;  %v1276_v38 = vadd.f32 %v3734_v36, %v3803_v33  ;;  %v662_v50 = vadd.f32 %v3753_v47, %v3742_v57  ;;  %3049 = vrcp.f32 %v1547_v17 }
 0x180   :  { %v2248_v51 = vadd.f32 %v2247_v41, %v1798_v61  ;;  %v2319_v0 = vmul.f32 %v1798_v61, %v1798_v61  ;;  %v1287_v63 = vadd.f32 %v3734_v36, %v3809_v10  ;;  %v1801_v49 = vmul.f32 %v3030_v53, %v1737_v42 }
 0x181   :  { %3051 = vpow2.f32 %v1486_v35  ;;  %v1362_v25 = vsub.f32 0.0, %v1276_v38  ;;  %v1735_v24 = vmax.f32 %v662_v50, 0.0  ;;  %v1279_v52 = vadd.f32 %v3734_v36, %v3815_v29 }
 0x182   :  { %v3040_v40 = vpop.eup %3039  ;;  %v2382_v22 = vadd.f32 %v2381_v34, %v2319_v0  ;;  %v1365_v20 = vsub.f32 0.0, %v1287_v63  ;;  %v683_v33 = vadd.f32 %v3753_v47, %v3761_v21  ;;  %3053 = vrcp.f32 %v1552_v18 }
 0x183   :  { %v3042_v57 = vpop.eup %3041  ;;  %v1550_v37 = vadd.f32 1.0, %v3040_v40  ;;  %v1482_v11 = vmul.f32 1.442695, %v1362_v25  ;;  %v1799_v6 = vmul.f32 %v3034_v30, %v1735_v24  ;;  %v1363_v10 = vsub.f32 0.0, %v1279_v52 }
 0x184   :  { %v1488_v7 = vmul.f32 1.442695, %v1365_v20  ;;  %v1740_v62 = vmax.f32 %v683_v33, 0.0  ;;  %v675_v31 = vadd.f32 %v3753_v47, %v3771_v9  ;;  %v1300_v29 = vadd.f32 %v3734_v36, %v3829_v59 }
 0x185   :  { %v3044_v32 = vpop.eup %3043  ;;  %3055 = vrcp.f32 %v1550_v37  ;;  %v2249_v44 = vadd.f32 %v2248_v51, %v1799_v6  ;;  %v2320_v8 = vmul.f32 %v1799_v6, %v1799_v6  ;;  %v1484_v53 = vmul.f32 1.442695, %v1363_v10 }
 0x186   :  { %v3046_v58 = vpop.eup %3045  ;;  %v1553_v21 = vadd.f32 1.0, %v3044_v32  ;;  %3057 = vpow2.f32 %v1482_v11  ;;  %v1804_v55 = vmul.f32 %v3038_v54, %v1740_v62  ;;  %v1738_v19 = vmax.f32 %v675_v31, 0.0  ;;  %v3979_v54 = vld [vmem:[#allocation3_spill] sm:$0xff]  ;;  %v3980_v11 = vld [vmem:[#allocation4_spill] sm:$0xff] }
 0x187   :  { %v3048_v45 = vpop.eup %3047  ;;  %v2250_v60 = vadd.f32 %v2249_v44, %v1800_v5  ;;  %v2383_v1 = vadd.f32 %v2382_v22, %v2320_v8  ;;  %3059 = vpow2.f32 %v1488_v7  ;;  %v2322_v9 = vmul.f32 %v1801_v49, %v1801_v49 }
 0x188   :  { %3061 = vrcp.f32 %v1553_v21  ;;  %v1551_v43 = vadd.f32 1.0, %v3048_v45  ;;  %v1368_v3 = vsub.f32 0.0, %v1300_v29  ;;  %v1802_v17 = vmul.f32 %v3042_v57, %v1738_v19 }
 0x189   :  { %v2384_v30 = vadd.f32 %v2383_v1, %v2321_v28  ;;  %3063 = vpow2.f32 %v1484_v53  ;;  %v2251_v14 = vadd.f32 %v2250_v60, %v1801_v49  ;;  %v3050_v39 = vpop.eup %3049  ;;  %v686_v41 = vadd.f32 %v3753_v47, %v3978_v46 }
 0x18a   :  { %3065 = vrcp.f32 %v1551_v43  ;;  %v1494_v59 = vmul.f32 1.442695, %v1368_v3  ;;  %v1292_v5 = vadd.f32 %v3734_v36, %v3835_v13  ;;  %v2323_v61 = vmul.f32 %v1802_v17, %v1802_v17 }
 0x18b   :  { %v3052_v15 = vpop.eup %3051  ;;  %v2252_v18 = vadd.f32 %v2251_v14, %v1802_v17  ;;  %v2385_v34 = vadd.f32 %v2384_v30, %v2322_v9  ;;  %v678_v35 = vadd.f32 %v3753_v47, %v3979_v54  ;;  %v1741_v42 = vmax.f32 %v686_v41, 0.0  ;;  %v3981_v17 = vld [vmem:[#allocation5_spill] sm:$0xff]  ;;  %v3983_v54 = vld [vmem:[#allocation7_spill] sm:$0xff] }
 0x18c   :  { %v1556_v28 = vadd.f32 1.0, %v3052_v15  ;;  %3067 = vpow2.f32 %v1494_v59  ;;  %v1366_v38 = vsub.f32 0.0, %v1292_v5  ;;  %v3054_v50 = vpop.eup %3053  ;;  %v1303_v63 = vadd.f32 %v3734_v36, %v3843_v16 }
 0x18d   :  { %v2386_v51 = vadd.f32 %v2385_v34, %v2323_v61  ;;  %v1739_v0 = vmax.f32 %v678_v35, 0.0  ;;  %v1295_v13 = vadd.f32 %v3734_v36, %v3847_v23  ;;  %v1805_v49 = vmul.f32 %v3046_v58, %v1741_v42 }
 0x18e   :  { %3069 = vrcp.f32 %v1556_v28  ;;  %v1490_v25 = vmul.f32 1.442695, %v1366_v38  ;;  %v699_v24 = vadd.f32 %v3753_v47, %v3791_v2  ;;  %v1369_v20 = vsub.f32 0.0, %v1303_v63 }
 0x18f   :  { %v3056_v40 = vpop.eup %3055  ;;  %v1803_v22 = vmul.f32 %v3050_v39, %v1739_v0  ;;  %v1367_v52 = vsub.f32 0.0, %v1295_v13  ;;  %v691_v33 = vadd.f32 %v3753_v47, %v3797_v4  ;;  %v2325_v37 = vmul.f32 %v1804_v55, %v1804_v55 }
 0x190   :  { %v3058_v57 = vpop.eup %3057  ;;  %3071 = vpow2.f32 %v1490_v25  ;;  %v1744_v16 = vmax.f32 %v699_v24, 0.0  ;;  %v702_v36 = vadd.f32 %v3753_v47, %v3980_v11  ;;  %v1496_v62 = vmul.f32 1.442695, %v1369_v20 }
 0x191   :  { %v3060_v23 = vpop.eup %3059  ;;  %v1554_v6 = vadd.f32 1.0, %v3058_v57  ;;  %v2253_v7 = vadd.f32 %v2252_v18, %v1803_v22  ;;  %v2324_v10 = vmul.f32 %v1803_v22, %v1803_v22  ;;  %v1492_v32 = vmul.f32 1.442695, %v1367_v52  ;;  %v3982_v18 = vld [vmem:[#allocation6_spill] sm:$0xff] }
 0x192   :  { %v3062_v2 = vpop.eup %3061  ;;  %v1557_v31 = vadd.f32 1.0, %v3060_v23  ;;  %v1808_v44 = vmul.f32 %v3054_v50, %v1744_v16  ;;  %v1742_v8 = vmax.f32 %v691_v33, 0.0  ;;  %v1745_v21 = vmax.f32 %v702_v36, 0.0 }
 0x193   :  { %v3064_v29 = vpop.eup %3063  ;;  %3073 = vrcp.f32 %v1554_v6  ;;  %v2254_v4 = vadd.f32 %v2253_v7, %v1804_v55  ;;  %v2387_v58 = vadd.f32 %v2386_v51, %v2324_v10  ;;  %v2326_v60 = vmul.f32 %v1805_v49, %v1805_v49  ;;  %v3984_v51 = vld [vmem:[#allocation8_spill] sm:$0xff] }
 0x194   :  { %v3066_v53 = vpop.eup %3065  ;;  %3075 = vrcp.f32 %v1557_v31  ;;  %v1555_v45 = vadd.f32 1.0, %v3064_v29  ;;  %v1806_v1 = vmul.f32 %v3056_v40, %v1742_v8  ;;  %v1809_v9 = vmul.f32 %v3062_v2, %v1745_v21 }
 0x195   :  { %v2388_v19 = vadd.f32 %v2387_v58, %v2325_v37  ;;  %3077 = vpow2.f32 %v1496_v62  ;;  %v2255_v43 = vadd.f32 %v2254_v4, %v1805_v49  ;;  %v694_v14 = vadd.f32 %v3753_v47, %v3981_v17 }
 0x196   :  { %v3068_v3 = vpop.eup %3067  ;;  %3079 = vrcp.f32 %v1555_v45  ;;  %v2327_v30 = vmul.f32 %v1806_v1, %v1806_v1  ;;  %v715_v55 = vadd.f32 %v3753_v47, %v3824_v27  ;;  %v707_v61 = vadd.f32 %v3753_v47, %v3982_v18 }
 0x197   :  { %v1560_v39 = vadd.f32 1.0, %v3068_v3  ;;  %3081 = vpow2.f32 %v1492_v32  ;;  %v2256_v59 = vadd.f32 %v2255_v43, %v1806_v1  ;;  %v2389_v46 = vadd.f32 %v2388_v19, %v2326_v60 }
 0x198   :  { %v3070_v41 = vpop.eup %3069  ;;  %v1743_v5 = vmax.f32 %v694_v14, 0.0  ;;  %v1748_v15 = vmax.f32 %v715_v55, 0.0  ;;  %v718_v35 = vadd.f32 %v3753_v47, %v3983_v54  ;;  %v1746_v50 = vmax.f32 %v707_v61, 0.0 }
 0x199   :  { %3083 = vrcp.f32 %v1560_v39  ;;  %v2390_v34 = vadd.f32 %v2389_v46, %v2327_v30  ;;  %v710_v0 = vadd.f32 %v3753_v47, %v3984_v51  ;;  %v731_v63 = vadd.f32 %v3753_v47, %v3855_v26 }
 0x19a   :  { %v3072_v28 = vpop.eup %3071  ;;  %v1807_v42 = vmul.f32 %v3066_v53, %v1743_v5  ;;  %v1812_v38 = vmul.f32 %v3070_v41, %v1748_v15  ;;  %v2329_v24 = vmul.f32 %v1808_v44, %v1808_v44  ;;  %v1749_v40 = vmax.f32 %v718_v35, 0.0 }
 0x19b   :  { %v1558_v27 = vadd.f32 1.0, %v3072_v28  ;;  %v2330_v20 = vmul.f32 %v1809_v9, %v1809_v9  ;;  %v1747_v11 = vmax.f32 %v710_v0, 0.0  ;;  %v1752_v36 = vmax.f32 %v731_v63, 0.0 }
 0x19c   :  { %v2257_v13 = vadd.f32 %v2256_v59, %v1807_v42  ;;  %v2328_v49 = vmul.f32 %v1807_v42, %v1807_v42  ;;  %v723_v23 = vadd.f32 %v3753_v47, %v3859_v12  ;;  %v2333_v60 = vmul.f32 %v1812_v38, %v1812_v38 }
 0x19d   :  { %v3074_v25 = vpop.eup %3073  ;;  %3085 = vrcp.f32 %v1558_v27  ;;  %v734_v43 = vadd.f32 %v3753_v47, %v3863_v56  ;;  %v726_v14 = vadd.f32 %v3753_v47, %v3866_v48 }
 0x19e   :  { %v3076_v22 = vpop.eup %3075  ;;  %v2258_v52 = vadd.f32 %v2257_v13, %v1808_v44  ;;  %v2391_v33 = vadd.f32 %v2390_v34, %v2328_v49  ;;  %v1810_v57 = vmul.f32 %v3074_v25, %v1746_v50  ;;  %v1750_v58 = vmax.f32 %v723_v23, 0.0 }
 0x19f   :  { %v3078_v37 = vpop.eup %3077  ;;  %v1813_v16 = vmul.f32 %v3076_v22, %v1749_v40  ;;  %v1753_v46 = vmax.f32 %v734_v43, 0.0  ;;  %v1751_v18 = vmax.f32 %v726_v14, 0.0 }
 0x1a0   :  { %v3080_v6 = vpop.eup %3079  ;;  %v1561_v26 = vadd.f32 1.0, %v3078_v37  ;;  %v2392_v7 = vadd.f32 %v2391_v33, %v2329_v24  ;;  %v2259_v10 = vadd.f32 %v2258_v52, %v1809_v9  ;;  %v2331_v62 = vmul.f32 %v1810_v57, %v1810_v57 }
 0x1a1   :  { %v3082_v2 = vpop.eup %3081  ;;  %v1811_v31 = vmul.f32 %v3080_v6, %v1747_v11  ;;  %v2334_v9 = vmul.f32 %v1813_v16, %v1813_v16 }
 0x1a2   :  { %3087 = vrcp.f32 %v1561_v26  ;;  %v1559_v32 = vadd.f32 1.0, %v3082_v2  ;;  %v2260_v8 = vadd.f32 %v2259_v10, %v1810_v57  ;;  %v2393_v44 = vadd.f32 %v2392_v7, %v2330_v20 }
 0x1a3   :  { %v3084_v29 = vpop.eup %3083  ;;  %v2332_v4 = vmul.f32 %v1811_v31, %v1811_v31 }
 0x1a4   :  { %3089 = vrcp.f32 %v1559_v32  ;;  %v2394_v21 = vadd.f32 %v2393_v44, %v2331_v62  ;;  %v2261_v53 = vadd.f32 %v2260_v8, %v1811_v31  ;;  %v1816_v45 = vmul.f32 %v3084_v29, %v1752_v36 }
 0x1a6   :  { %v2262_v12 = vadd.f32 %v2261_v53, %v1812_v38  ;;  %v2395_v1 = vadd.f32 %v2394_v21, %v2332_v4  ;;  %v2337_v56 = vmul.f32 %v1816_v45, %v1816_v45 }
 0x1a7   :  { %v3086_v19 = vpop.eup %3085 }
 0x1a8   :  { %v2396_v3 = vadd.f32 %v2395_v1, %v2333_v60  ;;  %v1814_v30 = vmul.f32 %v3086_v19, %v1750_v58  ;;  %v2263_v17 = vadd.f32 %v2262_v12, %v1813_v16 }
 0x1aa   :  { %v2264_v55 = vadd.f32 %v2263_v17, %v1814_v30  ;;  %v2335_v39 = vmul.f32 %v1814_v30, %v1814_v30  ;;  %v2397_v59 = vadd.f32 %v2396_v3, %v2334_v9 }
 0x1ac   :  { %v3088_v41 = vpop.eup %3087  ;;  %v2398_v5 = vadd.f32 %v2397_v59, %v2335_v39 }
 0x1ad   :  { %v1817_v15 = vmul.f32 %v3088_v41, %v1753_v46 }
 0x1ae   :  { %v3090_v61 = vpop.eup %3089 }
 0x1af   :  { %v1815_v34 = vmul.f32 %v3090_v61, %v1751_v18  ;;  %v2338_v38 = vmul.f32 %v1817_v15, %v1817_v15 }
 0x1b1   :  { %v2265_v54 = vadd.f32 %v2264_v55, %v1815_v34  ;;  %v2336_v35 = vmul.f32 %v1815_v34, %v1815_v34 }
 0x1b3   :  { %v2266_v28 = vadd.f32 %v2265_v54, %v1816_v45  ;;  %v2399_v42 = vadd.f32 %v2398_v5, %v2336_v35 }
 0x1b5   :  { %v2267_v50 = vadd.f32 %v2266_v28, %v1817_v15  ;;  %v2400_v27 = vadd.f32 %v2399_v42, %v2337_v56 }
 0x1b7   :  { %v2268_v51 = vrot.slane %v2267_v50, 4  ;;  %v2401_v47 = vadd.f32 %v2400_v27, %v2338_v38 }
 0x1b9   :  { %v2269_v48 = vadd.f32 %v2268_v51, %v2267_v50  ;;  %v2402_v0 = vrot.slane %v2401_v47, 4 }
 0x1bb   :  { %v2270_v63 = vrot.slane %v2269_v48, 2  ;;  %v2403_v13 = vadd.f32 %v2402_v0, %v2401_v47 }
 0x1bd   :  { %v2271_v49 = vadd.f32 %v2270_v63, %v2269_v48  ;;  %v2404_v25 = vrot.slane %v2403_v13, 2 }
 0x1bf   :  { %v2272_v24 = vrot.slane %v2271_v49, 1  ;;  %v2405_v40 = vadd.f32 %v2404_v25, %v2403_v13 }
 0x1c1   :  { %v2273_v22 = vadd.f32 %v2272_v24, %v2271_v49  ;;  %v2406_v20 = vrot.slane %v2405_v40, 1 }
 0x1c3   :  { %2274 = vst [vmem:[%s3969_s6] sm:$0x1] %v2273_v22  ;;  %v2407_v52 = vadd.f32 %v2406_v20, %v2405_v40 }
 0x1c5   :  { %2408 = vst [vmem:[%s3970_s7] sm:$0x1] %v2407_v52 }

// kernel: gated_deform_conv_forward.5
= control target key start
LH: loop header
LB: loop body
LE: loop exit
PB: predicated region body
PF: predicated region fallthrough
CT: control target
= control target key end

     0   :  { %vm351_vm0 = vcmask 293888   ;;  %vm448_vm1 = vcmask 1041408   ;;  %s3848_s4 = inlined_call_operand.vmem [shape: bf16[36,128], index: 4, kind: input, shape index: {}]   ;;  %s3849_s1 = inlined_call_operand.vmem [shape: bf16[512,36], index: 1, kind: input, shape index: {}]   ;;  %s3850_s2 = inlined_call_operand.vmem [shape: bf16[36,128], index: 2, kind: input, shape index: {}]   ;;  %s3851_s0 = inlined_call_operand.vmem [shape: bf16[512,36], index: 0, kind: input, shape index: {}]   ;;  %s3852_s5 = inlined_call_operand.vmem [shape: f32[1,128], index: 5, kind: input, shape index: {}]   ;;  %s3853_s3 = inlined_call_operand.vmem [shape: f32[1,128], index: 3, kind: input, shape index: {}]   ;;  %s3854_s6 = inlined_call_operand.vmem [shape: f32[1,128], index: 6, kind: input, shape index: {}]   ;;  %s3855_s7 = inlined_call_operand.vmem [shape: f32[1,128], index: 7, kind: input, shape index: {}]   ;;  %s3856_s8 = inlined_call_operand.vmem [shape: f32[512,128], index: 8, kind: output, shape index: {}]  }
   0x1   :  { %v2382_v0 = vld [vmem:[%s3848_s4] sm:$0xff]   ;;  %v2383_v1 = vld [vmem:[%s3848_s4 + $0x8] sm:$0xff]   ;;  %v2384_v2 = vld [vmem:[%s3848_s4 + $0x10] ss:$0 sps:$4 sm:$0x33]  }
   0x2   :  { %2310 = vmatprep.subr.bf16.mxu1 %v2382_v0  ;;  %v2385_v3 = vld [vmem:[%s3849_s1] sm:$0xff]   ;;  %v1019_v5 = vsel %vm448_vm1, %v2384_v2, 0  ;;  %v2390_v6 = vld [vmem:[%s3850_s2 + $0x8] sm:$0xff]   ;;  %v2387_v8 = vld [vmem:[%s3849_s1 + $0x10] sm:$0xff]  }
   0x3   :  { %2311 = vmatpush3.bf16.msra.mxu1 %v2382_v0  ;;  %2316 = vmatprep.mubr.msk.bf16.mxu1 %vm351_vm0, %v2385_v3  ;;  %v2389_v4 = vld [vmem:[%s3850_s2] sm:$0xff]   ;;  %v2386_v7 = vld [vmem:[%s3849_s1 + $0x8] sm:$0xff]   ;;  %v2393_v9 = vld [vmem:[%s3850_s2 + $0x10] ss:$0 sps:$4 sm:$0x33]  }
   0x4   :  { %2312 = vmatprep.subr.bf16.mxu1 %v2383_v1  ;;  %2240 = vmatprep.subr.bf16.mxu0 %v2389_v4  ;;  %v2394_v10 = vld [vmem:[%s3851_s0] sm:$0xff]   ;;  %v450_v11 = vsel %vm448_vm1, %v2393_v9, 0  ;;  %v2388_v12 = vld [vmem:[%s3849_s1 + $0x18] sm:$0xff]   ;;  %v2395_v13 = vld [vmem:[%s3851_s0 + $0x8] sm:$0xff]  }
   0x5   :  { %2241 = vmatpush3.bf16.msra.mxu0 %v2389_v4  ;;  %2246 = vmatprep.mubr.msk.bf16.mxu0 %vm351_vm0, %v2394_v10  ;;  %v2398_v14 = vld [vmem:[%s3851_s0 + $0x10] sm:$0xff]   ;;  %v2391_v15 = vld [vmem:[%s3849_s1 + $0x20] sm:$0xff]   ;;  %v2392_v16 = vld [vmem:[%s3849_s1 + $0x28] sm:$0xff]  }
   0x6   :  { %2242 = vmatprep.subr.bf16.mxu0 %v2390_v6  ;;  %v2399_v17 = vld [vmem:[%s3851_s0 + $0x18] sm:$0xff]   ;;  %v2402_v18 = vld [vmem:[%s3851_s0 + $0x20] sm:$0xff]   ;;  %v2396_v19 = vld [vmem:[%s3849_s1 + $0x30] sm:$0xff]  }
   0x7   :  { %2313 = vmatpush3.bf16.msra.mxu1 %v2383_v1  ;;  %v2397_v20 = vld [vmem:[%s3849_s1 + $0x38] sm:$0xff]   ;;  %v2403_v21 = vld [vmem:[%s3851_s0 + $0x28] sm:$0xff]   ;;  %v2406_v22 = vld [vmem:[%s3851_s0 + $0x30] sm:$0xff]  }
   0x8   :  { %2381 = vmatprep.subr.msk.bf16.mxu1 %vm448_vm1, %v2384_v2  ;;  %v2400_v23 = vld [vmem:[%s3849_s1 + $0x40] sm:$0xff]   ;;  %v2401_v24 = vld [vmem:[%s3849_s1 + $0x48] sm:$0xff]   ;;  %v2407_v25 = vld [vmem:[%s3851_s0 + $0x38] sm:$0xff]  }
   0x9   :  { %2243 = vmatpush3.bf16.msra.mxu0 %v2390_v6  ;;  %v2410_v26 = vld [vmem:[%s3851_s0 + $0x40] sm:$0xff]   ;;  %v2404_v27 = vld [vmem:[%s3849_s1 + $0x50] sm:$0xff]   ;;  %v2405_v28 = vld [vmem:[%s3849_s1 + $0x58] sm:$0xff]  }
   0xa   :  { %2380 = vmatprep.subr.msk.bf16.mxu0 %vm448_vm1, %v2393_v9  ;;  %v2411_v29 = vld [vmem:[%s3851_s0 + $0x48] sm:$0xff]   ;;  %v2414_v30 = vld [vmem:[%s3851_s0 + $0x50] sm:$0xff]   ;;  %v2408_v31 = vld [vmem:[%s3849_s1 + $0x60] sm:$0xff]  }
   0xb   :  { %2315 = vmatpush3.bf16.msra.mxu1 %v1019_v5  ;;  %v2409_v32 = vld [vmem:[%s3849_s1 + $0x68] sm:$0xff]   ;;  %v2415_v33 = vld [vmem:[%s3851_s0 + $0x58] sm:$0xff]   ;;  %v2418_v34 = vld [vmem:[%s3851_s0 + $0x60] sm:$0xff]  }
   0xc   :  { %v2412_v35 = vld [vmem:[%s3849_s1 + $0x70] sm:$0xff]   ;;  %v2413_v36 = vld [vmem:[%s3849_s1 + $0x78] sm:$0xff]   ;;  %v2419_v37 = vld [vmem:[%s3851_s0 + $0x68] sm:$0xff]  }
   0xd   :  { %2245 = vmatpush3.bf16.msra.mxu0 %v450_v11  ;;  %v2422_v38 = vld [vmem:[%s3851_s0 + $0x70] sm:$0xff]   ;;  %v2416_v39 = vld [vmem:[%s3849_s1 + $0x80] sm:$0xff]   ;;  %v2423_v40 = vld [vmem:[%s3851_s0 + $0x78] sm:$0xff]  }
   0xe   :  { %2317 = vmatmul.mubr.msk.bf16.vlgmr.msra.gmra.mrb[0].mxu1 %vm351_vm0, %v2386_v7  ;;  %v2417_v41 = vld [vmem:[%s3849_s1 + $0x88] sm:$0xff]   ;;  %v2426_v42 = vld [vmem:[%s3851_s0 + $0x80] sm:$0xff]   ;;  %v2420_v43 = vld [vmem:[%s3849_s1 + $0x90] sm:$0xff]  }
   0xf   :  { %2320 = vmatprep.mubr.msk.bf16.mxu1 %vm351_vm0, %v2387_v8  ;;  %v2427_v44 = vld [vmem:[%s3851_s0 + $0x88] sm:$0xff]   ;;  %v2421_v45 = vld [vmem:[%s3849_s1 + $0x98] sm:$0xff]   ;;  %v2430_v46 = vld [vmem:[%s3851_s0 + $0x90] sm:$0xff]  }
  0x10   :  { %2247 = vmatmul.mubr.msk.bf16.vlgmr.msra.gmra.mrb[0].mxu0 %vm351_vm0, %v2395_v13  ;;  %v2424_v47 = vld [vmem:[%s3849_s1 + $0xa0] sm:$0xff]   ;;  %v2431_v48 = vld [vmem:[%s3851_s0 + $0x98] sm:$0xff]   ;;  %v2425_v49 = vld [vmem:[%s3849_s1 + $0xa8] sm:$0xff]  }
  0x11   :  { %2250 = vmatprep.mubr.msk.bf16.mxu0 %vm351_vm0, %v2398_v14  ;;  %v2434_v50 = vld [vmem:[%s3851_s0 + $0xa0] sm:$0xff]   ;;  %v2428_v51 = vld [vmem:[%s3849_s1 + $0xb0] sm:$0xff]   ;;  %v2435_v52 = vld [vmem:[%s3851_s0 + $0xa8] sm:$0xff]  }
  0x12   :  { %v2429_v53 = vld [vmem:[%s3849_s1 + $0xb8] sm:$0xff]   ;;  %v2438_v54 = vld [vmem:[%s3851_s0 + $0xb0] sm:$0xff]   ;;  %v2432_v55 = vld [vmem:[%s3849_s1 + $0xc0] sm:$0xff]  }
  0x13   :  { %v2439_v56 = vld [vmem:[%s3851_s0 + $0xb8] sm:$0xff]   ;;  %v2433_v57 = vld [vmem:[%s3849_s1 + $0xc8] sm:$0xff]   ;;  %v2442_v58 = vld [vmem:[%s3851_s0 + $0xc0] sm:$0xff]  }
  0x14   :  { %v2436_v59 = vld [vmem:[%s3849_s1 + $0xd0] sm:$0xff]   ;;  %v2443_v60 = vld [vmem:[%s3851_s0 + $0xc8] sm:$0xff]   ;;  %v2437_v61 = vld [vmem:[%s3849_s1 + $0xd8] sm:$0xff]  }
  0x15   :  { %v2446_v62 = vld [vmem:[%s3851_s0 + $0xd0] sm:$0xff]   ;;  %v2440_v63 = vld [vmem:[%s3849_s1 + $0xe0] sm:$0xff]   ;;  %v2447_v0 = vld [vmem:[%s3851_s0 + $0xd8] sm:$0xff]  }
  0x16   :  { %2321 = vmatmul.mubr.msk.bf16.gmra.mrb[4].mxu1 %vm351_vm0, %v2388_v12  ;;  %v2441_v1 = vld [vmem:[%s3849_s1 + $0xe8] sm:$0xff]   ;;  %v2448_v2 = vld [vmem:[%s3851_s0 + $0xe0] sm:$0xff]   ;;  %v2444_v3 = vld [vmem:[%s3849_s1 + $0xf0] sm:$0xff]  }
  0x17   :  { %2324 = vmatprep.mubr.msk.bf16.mxu1 %vm351_vm0, %v2391_v15  ;;  %v2449_v4 = vld [vmem:[%s3851_s0 + $0xe8] sm:$0xff]   ;;  %v2445_v5 = vld [vmem:[%s3849_s1 + $0xf8] sm:$0xff]   ;;  %v2450_v6 = vld [vmem:[%s3851_s0 + $0xf0] sm:$0xff]  }
  0x18   :  { %2251 = vmatmul.mubr.msk.bf16.gmra.mrb[4].mxu0 %vm351_vm0, %v2399_v17  ;;  %v2451_v7 = vld [vmem:[%s3851_s0 + $0xf8] sm:$0xff]   ;;  %v3038_v8 = vld [vmem:[%s3852_s5] ss:$0 sm:$0xff] }
  0x19   :  { %2254 = vmatprep.mubr.msk.bf16.mxu0 %vm351_vm0, %v2402_v18 }
  0x1e   :  { %2325 = vmatmul.mubr.msk.bf16.gmra.mrb[8].mxu1 %vm351_vm0, %v2392_v16 }
  0x1f   :  { %2328 = vmatprep.mubr.msk.bf16.mxu1 %vm351_vm0, %v2396_v19 }
  0x20   :  { %2255 = vmatmul.mubr.msk.bf16.gmra.mrb[8].mxu0 %vm351_vm0, %v2403_v21 }
  0x21   :  { %2258 = vmatprep.mubr.msk.bf16.mxu0 %vm351_vm0, %v2406_v22 }
  0x26   :  { %2329 = vmatmul.mubr.msk.bf16.gmra.mrb[12].mxu1 %vm351_vm0, %v2397_v20 }
  0x27   :  { %2332 = vmatprep.mubr.msk.bf16.mxu1 %vm351_vm0, %v2400_v23 }
  0x28   :  { %2259 = vmatmul.mubr.msk.bf16.gmra.mrb[12].mxu0 %vm351_vm0, %v2407_v25 }
  0x29   :  { %2262 = vmatprep.mubr.msk.bf16.mxu0 %vm351_vm0, %v2410_v26 }
  0x2e   :  { %2333 = vmatmul.mubr.msk.bf16.gmra.mrb[16].mxu1 %vm351_vm0, %v2401_v24 }
  0x2f   :  { %2336 = vmatprep.mubr.msk.bf16.mxu1 %vm351_vm0, %v2404_v27  ;;  %v3047_v27 = vld [vmem:[%s3853_s3] ss:$0 sm:$0xff] }
  0x30   :  { %2263 = vmatmul.mubr.msk.bf16.gmra.mrb[16].mxu0 %vm351_vm0, %v2411_v29 }
  0x31   :  { %2266 = vmatprep.mubr.msk.bf16.mxu0 %vm351_vm0, %v2414_v30 }
  0x36   :  { %2337 = vmatmul.mubr.msk.bf16.gmra.mrb[20].mxu1 %vm351_vm0, %v2405_v28 }
  0x37   :  { %2340 = vmatprep.mubr.msk.bf16.mxu1 %vm351_vm0, %v2408_v31 }
  0x38   :  { %2267 = vmatmul.mubr.msk.bf16.gmra.mrb[20].mxu0 %vm351_vm0, %v2415_v33 }
  0x39   :  { %2270 = vmatprep.mubr.msk.bf16.mxu0 %vm351_vm0, %v2418_v34 }
  0x3e   :  { %2341 = vmatmul.mubr.msk.bf16.gmra.mrb[24].mxu1 %vm351_vm0, %v2409_v32 }
  0x3f   :  { %2344 = vmatprep.mubr.msk.bf16.mxu1 %vm351_vm0, %v2412_v35 }
  0x40   :  { %2271 = vmatmul.mubr.msk.bf16.gmra.mrb[24].mxu0 %vm351_vm0, %v2419_v37 }
  0x41   :  { %2274 = vmatprep.mubr.msk.bf16.mxu0 %vm351_vm0, %v2422_v38 }
  0x46   :  { %2345 = vmatmul.mubr.msk.bf16.gmra.mrb[28].mxu1 %vm351_vm0, %v2413_v36 }
  0x47   :  { %2348 = vmatprep.mubr.msk.bf16.mxu1 %vm351_vm0, %v2416_v39 }
  0x48   :  { %2275 = vmatmul.mubr.msk.bf16.gmra.mrb[28].mxu0 %vm351_vm0, %v2423_v40 }
  0x49   :  { %2278 = vmatprep.mubr.msk.bf16.mxu0 %vm351_vm0, %v2426_v42 }
  0x4e   :  { %2349 = vmatmul.mubr.msk.bf16.gmra.mrb[32].mxu1 %vm351_vm0, %v2417_v41 }
  0x4f   :  { %2352 = vmatprep.mubr.msk.bf16.mxu1 %vm351_vm0, %v2420_v43 }
  0x50   :  { %2279 = vmatmul.mubr.msk.bf16.gmra.mrb[32].mxu0 %vm351_vm0, %v2427_v44 }
  0x51   :  { %2282 = vmatprep.mubr.msk.bf16.mxu0 %vm351_vm0, %v2430_v46 }
  0x56   :  { %2353 = vmatmul.mubr.msk.bf16.gmra.mrb[36].mxu1 %vm351_vm0, %v2421_v45 }
  0x57   :  { %2356 = vmatprep.mubr.msk.bf16.mxu1 %vm351_vm0, %v2424_v47 }
  0x58   :  { %2283 = vmatmul.mubr.msk.bf16.gmra.mrb[36].mxu0 %vm351_vm0, %v2431_v48 }
  0x59   :  { %2286 = vmatprep.mubr.msk.bf16.mxu0 %vm351_vm0, %v2434_v50 }
  0x5e   :  { %2357 = vmatmul.mubr.msk.bf16.gmra.mrb[40].mxu1 %vm351_vm0, %v2425_v49 }
  0x5f   :  { %2360 = vmatprep.mubr.msk.bf16.mxu1 %vm351_vm0, %v2428_v51 }
  0x60   :  { %2287 = vmatmul.mubr.msk.bf16.gmra.mrb[40].mxu0 %vm351_vm0, %v2435_v52 }
  0x61   :  { %2290 = vmatprep.mubr.msk.bf16.mxu0 %vm351_vm0, %v2438_v54 }
  0x66   :  { %2361 = vmatmul.mubr.msk.bf16.gmra.mrb[44].mxu1 %vm351_vm0, %v2429_v53 }
  0x67   :  { %2364 = vmatprep.mubr.msk.bf16.mxu1 %vm351_vm0, %v2432_v55 }
  0x68   :  { %2291 = vmatmul.mubr.msk.bf16.gmra.mrb[44].mxu0 %vm351_vm0, %v2439_v56 }
  0x69   :  { %2294 = vmatprep.mubr.msk.bf16.mxu0 %vm351_vm0, %v2442_v58 }
  0x6e   :  { %2365 = vmatmul.mubr.msk.bf16.gmra.mrb[48].mxu1 %vm351_vm0, %v2433_v57 }
  0x6f   :  { %2368 = vmatprep.mubr.msk.bf16.mxu1 %vm351_vm0, %v2436_v59 }
  0x70   :  { %2295 = vmatmul.mubr.msk.bf16.gmra.mrb[48].mxu0 %vm351_vm0, %v2443_v60 }
  0x71   :  { %2298 = vmatprep.mubr.msk.bf16.mxu0 %vm351_vm0, %v2446_v62 }
  0x76   :  { %2369 = vmatmul.mubr.msk.bf16.gmra.mrb[52].mxu1 %vm351_vm0, %v2437_v61 }
  0x77   :  { %2372 = vmatprep.mubr.msk.bf16.mxu1 %vm351_vm0, %v2440_v63 }
  0x78   :  { %2299 = vmatmul.mubr.msk.bf16.gmra.mrb[52].mxu0 %vm351_vm0, %v2447_v0 }
  0x79   :  { %2302 = vmatprep.mubr.msk.bf16.mxu0 %vm351_vm0, %v2448_v2 }
  0x7e   :  { %2373 = vmatmul.mubr.msk.bf16.gmra.mrb[56].mxu1 %vm351_vm0, %v2441_v1 }
  0x7f   :  { %2376 = vmatprep.mubr.msk.bf16.mxu1 %vm351_vm0, %v2444_v3 }
  0x80   :  { %2303 = vmatmul.mubr.msk.bf16.gmra.mrb[56].mxu0 %vm351_vm0, %v2449_v4 }
  0x81   :  { %2306 = vmatprep.mubr.msk.bf16.mxu0 %vm351_vm0, %v2450_v6 }
  0x86   :  { %2377 = vmatmul.mubr.msk.bf16.gmra.mrb[60].mxu1 %vm351_vm0, %v2445_v5 }
  0x88   :  { %2307 = vmatmul.mubr.msk.bf16.gmra.mrb[60].mxu0 %vm351_vm0, %v2451_v7 }
  0xe1   :  { %v2318_v9 = vpop.f32.mrb[0].mxu1 }
  0xe2   :  { %v1064_v10 = vadd.f32 %v2318_v9, %v3038_v8  ;;  %v1055_v11 = vpop.f32.mrb[1].mxu1 }
  0xe3   :  { %v1056_v12 = vadd.f32 %v3038_v8, %v1055_v11  ;;  %v2319_v13 = vpop.f32.mrb[2].mxu1  ;;  %v2248_v24 = vpop.f32.mrb[0].mxu0 }
  0xe4   :  { %v1312_v14 = vsub.f32 0.0, %v1064_v10  ;;  %v1067_v15 = vadd.f32 %v2319_v13, %v3038_v8  ;;  %v1058_v16 = vpop.f32.mrb[3].mxu1  ;;  %v486_v28 = vpop.f32.mrb[1].mxu0  ;;  %v3053_v38 = vadd.f32 %v2248_v24, %v3047_v27 }
  0xe5   :  { %v1310_v17 = vsub.f32 0.0, %v1056_v12  ;;  %v1059_v18 = vadd.f32 %v3038_v8, %v1058_v16  ;;  %v2249_v31 = vpop.f32.mrb[2].mxu0  ;;  %v3057_v41 = vadd.f32 %v3047_v27, %v486_v28 }
  0xe6   :  { %v1378_v19 = vmul.f32 1.442695, %v1312_v14  ;;  %v1313_v20 = vsub.f32 0.0, %v1067_v15  ;;  %v489_v34 = vpop.f32.mrb[3].mxu0  ;;  %v3060_v44 = vadd.f32 %v2249_v31, %v3047_v27  ;;  %v1696_v49 = vmax.f32 %v3053_v38, 0.0 }
  0xe7   :  { %v1374_v21 = vmul.f32 1.442695, %v1310_v17  ;;  %v1311_v22 = vsub.f32 0.0, %v1059_v18  ;;  %v3063_v45 = vadd.f32 %v3047_v27, %v489_v34  ;;  %v1694_v53 = vmax.f32 %v3057_v41, 0.0 }
  0xe8   :  { %2452 = vpow2.f32 %v1378_v19  ;;  %v1380_v23 = vmul.f32 1.442695, %v1313_v20  ;;  %v1697_v59 = vmax.f32 %v3060_v44, 0.0 }
  0xe9   :  { %2454 = vpow2.f32 %v1374_v21  ;;  %v1376_v25 = vmul.f32 1.442695, %v1311_v22  ;;  %v2322_v26 = vpop.f32.mrb[4].mxu1  ;;  %v1695_v60 = vmax.f32 %v3063_v45, 0.0 }
  0xea   :  { %2456 = vpow2.f32 %v1380_v23  ;;  %v1080_v29 = vadd.f32 %v2322_v26, %v3038_v8  ;;  %v1071_v30 = vpop.f32.mrb[5].mxu1 }
  0xeb   :  { %2458 = vpow2.f32 %v1376_v25  ;;  %v1072_v32 = vadd.f32 %v3038_v8, %v1071_v30  ;;  %v2323_v33 = vpop.f32.mrb[6].mxu1  ;;  %v2252_v50 = vpop.f32.mrb[4].mxu0 }
  0xec   :  { %v1316_v35 = vsub.f32 0.0, %v1080_v29  ;;  %v1083_v36 = vadd.f32 %v2323_v33, %v3038_v8  ;;  %v1074_v37 = vpop.f32.mrb[7].mxu1  ;;  %v3068_v54 = vadd.f32 %v2252_v50, %v3047_v27  ;;  %v502_v55 = vpop.f32.mrb[5].mxu0 }
  0xed   :  { %v1314_v39 = vsub.f32 0.0, %v1072_v32  ;;  %v1075_v40 = vadd.f32 %v3038_v8, %v1074_v37  ;;  %v2253_v61 = vpop.f32.mrb[6].mxu0  ;;  %v3075_v2 = vadd.f32 %v3047_v27, %v502_v55 }
  0xee   :  { %v1386_v42 = vmul.f32 1.442695, %v1316_v35  ;;  %v1317_v43 = vsub.f32 0.0, %v1083_v36  ;;  %v505_v3 = vpop.f32.mrb[7].mxu0  ;;  %v1700_v10 = vmax.f32 %v3068_v54, 0.0  ;;  %v3081_v20 = vadd.f32 %v2253_v61, %v3047_v27 }
  0xef   :  { %v1382_v46 = vmul.f32 1.442695, %v1314_v39  ;;  %v1315_v47 = vsub.f32 0.0, %v1075_v40  ;;  %v1698_v22 = vmax.f32 %v3075_v2, 0.0  ;;  %v3085_v23 = vadd.f32 %v3047_v27, %v505_v3 }
  0xf0   :  { %2460 = vpow2.f32 %v1386_v42  ;;  %v1388_v48 = vmul.f32 1.442695, %v1317_v43  ;;  %v1701_v28 = vmax.f32 %v3081_v20, 0.0 }
  0xf1   :  { %2462 = vpow2.f32 %v1382_v46  ;;  %v1384_v51 = vmul.f32 1.442695, %v1315_v47  ;;  %v2326_v52 = vpop.f32.mrb[8].mxu1  ;;  %v1699_v34 = vmax.f32 %v3085_v23, 0.0 }
  0xf2   :  { %v2453_v56 = vpop.eup %2452  ;;  %2464 = vpow2.f32 %v1388_v48  ;;  %v1096_v57 = vadd.f32 %v2326_v52, %v3038_v8  ;;  %v1087_v58 = vpop.f32.mrb[9].mxu1 }
  0xf3   :  { %v2455_v62 = vpop.eup %2454  ;;  %v1504_v63 = vadd.f32 1.0, %v2453_v56  ;;  %2466 = vpow2.f32 %v1384_v51  ;;  %v1088_v0 = vadd.f32 %v3038_v8, %v1087_v58  ;;  %v2327_v1 = vpop.f32.mrb[10].mxu1 }
  0xf4   :  { %v2457_v4 = vpop.eup %2456  ;;  %v1502_v5 = vadd.f32 1.0, %v2455_v62  ;;  %v1320_v6 = vsub.f32 0.0, %v1096_v57  ;;  %v1099_v7 = vadd.f32 %v2327_v1, %v3038_v8  ;;  %v1090_v9 = vpop.f32.mrb[11].mxu1  ;;  %v3103_v1 = vld [vmem:[%s3854_s6] ss:$0 sm:$0xff] }
  0xf5   :  { %v2459_v11 = vpop.eup %2458  ;;  %2468 = vrcp.f32 %v1504_v63  ;;  %v1505_v12 = vadd.f32 1.0, %v2457_v4  ;;  %v1318_v13 = vsub.f32 0.0, %v1088_v0  ;;  %v1091_v14 = vadd.f32 %v3038_v8, %v1090_v9  ;;  %v2256_v24 = vpop.f32.mrb[8].mxu0 }
  0xf6   :  { %2470 = vrcp.f32 %v1502_v5  ;;  %v1503_v15 = vadd.f32 1.0, %v2459_v11  ;;  %v1394_v16 = vmul.f32 1.442695, %v1320_v6  ;;  %v1321_v17 = vsub.f32 0.0, %v1099_v7  ;;  %v518_v30 = vpop.f32.mrb[9].mxu0 }
  0xf7   :  { %2472 = vrcp.f32 %v1505_v12  ;;  %v1390_v18 = vmul.f32 1.442695, %v1318_v13  ;;  %v1319_v19 = vsub.f32 0.0, %v1091_v14  ;;  %v3089_v29 = vadd.f32 %v2256_v24, %v3047_v27  ;;  %v2257_v36 = vpop.f32.mrb[10].mxu0  ;;  %v3116_v14 = vld [vmem:[%s3855_s7] ss:$0 sm:$0xff] }
  0xf8   :  { %2474 = vrcp.f32 %v1503_v15  ;;  %v1396_v21 = vmul.f32 1.442695, %v1321_v17  ;;  %v3094_v35 = vadd.f32 %v3047_v27, %v518_v30  ;;  %v521_v46 = vpop.f32.mrb[11].mxu0  ;;  %v3109_v11 = vadd.f32 %v2257_v36, %v3047_v27 }
  0xf9   :  { %2476 = vpow2.f32 %v1394_v16  ;;  %v1392_v25 = vmul.f32 1.442695, %v1319_v19  ;;  %v2330_v26 = vpop.f32.mrb[12].mxu1  ;;  %v1704_v43 = vmax.f32 %v3089_v29, 0.0  ;;  %v3121_v38 = vadd.f32 %v3047_v27, %v521_v46 }
  0xfa   :  { %v2461_v31 = vpop.eup %2460  ;;  %2478 = vpow2.f32 %v1390_v18  ;;  %v1112_v32 = vadd.f32 %v2330_v26, %v3038_v8  ;;  %v1103_v33 = vpop.f32.mrb[13].mxu1  ;;  %v1702_v5 = vmax.f32 %v3094_v35, 0.0  ;;  %v1705_v54 = vmax.f32 %v3109_v11, 0.0 }
  0xfb   :  { %v2463_v37 = vpop.eup %2462  ;;  %v1508_v39 = vadd.f32 1.0, %v2461_v31  ;;  %2480 = vpow2.f32 %v1396_v21  ;;  %v1104_v40 = vadd.f32 %v3038_v8, %v1103_v33  ;;  %v2331_v42 = vpop.f32.mrb[14].mxu1 }
  0xfc   :  { %v2465_v47 = vpop.eup %2464  ;;  %v1506_v48 = vadd.f32 1.0, %v2463_v37  ;;  %2482 = vpow2.f32 %v1392_v25  ;;  %v1324_v50 = vsub.f32 0.0, %v1112_v32  ;;  %v1115_v51 = vadd.f32 %v2331_v42, %v3038_v8  ;;  %v1106_v52 = vpop.f32.mrb[15].mxu1 }
  0xfd   :  { %v2467_v55 = vpop.eup %2466  ;;  %2484 = vrcp.f32 %v1508_v39  ;;  %v1509_v56 = vadd.f32 1.0, %v2465_v47  ;;  %v1322_v57 = vsub.f32 0.0, %v1104_v40  ;;  %v1107_v58 = vadd.f32 %v3038_v8, %v1106_v52  ;;  %v3111_v12 = vpop.f32.mrb[12].mxu0 }
  0xfe   :  { %2486 = vrcp.f32 %v1506_v48  ;;  %v1507_v61 = vadd.f32 1.0, %v2467_v55  ;;  %v1402_v62 = vmul.f32 1.442695, %v1324_v50  ;;  %v1325_v63 = vsub.f32 0.0, %v1115_v51 }
  0xff   :  { %v2469_v0 = vpop.eup %2468  ;;  %2488 = vrcp.f32 %v1509_v56  ;;  %v1398_v3 = vmul.f32 1.442695, %v1322_v57  ;;  %v1323_v4 = vsub.f32 0.0, %v1107_v58 }
 0x100   :  { %v2471_v6 = vpop.eup %2470  ;;  %2490 = vrcp.f32 %v1507_v61  ;;  %v1760_v7 = vmul.f32 %v2469_v0, %v1696_v49  ;;  %v1404_v9 = vmul.f32 1.442695, %v1325_v63  ;;  %v3123_v49 = vpop.f32.mrb[13].mxu0 }
 0x101   :  { %v2473_v13 = vpop.eup %2472  ;;  %v1758_v15 = vmul.f32 %v2471_v6, %v1694_v53  ;;  %2492 = vpow2.f32 %v1402_v62  ;;  %v1400_v16 = vmul.f32 1.442695, %v1323_v4  ;;  %v2334_v17 = vpop.f32.mrb[16].mxu1 }
 0x102   :  { %v2475_v18 = vpop.eup %2474  ;;  %v1831_v19 = vmul.f32 %v3103_v1, %v1760_v7  ;;  %v1761_v21 = vmul.f32 %v2473_v13, %v1697_v59  ;;  %2494 = vpow2.f32 %v1398_v3  ;;  %v1128_v24 = vadd.f32 %v2334_v17, %v3038_v8  ;;  %v1119_v25 = vpop.f32.mrb[17].mxu1 }
 0x103   :  { %v3129_v41 = vpop.f32.mrb[14].mxu0  ;;  %v2477_v53 = vpop.eup %2476  ;;  %v1829_v26 = vmul.f32 %v3103_v1, %v1758_v15  ;;  %v1759_v30 = vmul.f32 %v2475_v18, %v1695_v60  ;;  %2496 = vpow2.f32 %v1404_v9  ;;  %v1120_v31 = vadd.f32 %v3038_v8, %v1119_v25 }
 0x104   :  { %v2335_v32 = vpop.f32.mrb[18].mxu1  ;;  %v3135_v33 = vpop.f32.mrb[15].mxu0  ;;  %v1512_v59 = vadd.f32 1.0, %v2477_v53  ;;  %v1902_v36 = vadd.f32 %v3116_v14, %v1831_v19  ;;  %v1832_v37 = vmul.f32 %v3103_v1, %v1761_v21  ;;  %2498 = vpow2.f32 %v1400_v16 }
 0x105   :  { %v2479_v44 = vpop.eup %2478  ;;  %v1122_v39 = vpop.f32.mrb[19].mxu1  ;;  %v1900_v46 = vadd.f32 %v3116_v14, %v1829_v26  ;;  %v1830_v45 = vmul.f32 %v3103_v1, %v1759_v30  ;;  %v1328_v60 = vsub.f32 0.0, %v1128_v24  ;;  %v1326_v51 = vsub.f32 0.0, %v1120_v31 }
 0x106   :  { %v2481_v40 = vpop.eup %2480  ;;  %v1510_v42 = vadd.f32 1.0, %v2479_v44  ;;  %2500 = vrcp.f32 %v1512_v59  ;;  %1966 = vst [vmem:[%s3856_s8 + $0x10] sm:$0xff] %v1902_v36  ;;  %v1903_v50 = vadd.f32 %v3116_v14, %v1832_v37  ;;  %v1131_v63 = vadd.f32 %v2335_v32, %v3038_v8  ;;  %v3155_v0 = vpop.f32.mrb[16].mxu0 }
 0x107   :  { %v2483_v47 = vpop.eup %2482  ;;  %v1513_v48 = vadd.f32 1.0, %v2481_v40  ;;  %1964 = vst [vmem:[%s3856_s8] sm:$0xff] %v1900_v46  ;;  %v1901_v56 = vadd.f32 %v3116_v14, %v1830_v45  ;;  %v1410_v57 = vmul.f32 1.442695, %v1328_v60  ;;  %v1406_v62 = vmul.f32 1.442695, %v1326_v51 }
 0x108   :  { %v2485_v52 = vpop.eup %2484  ;;  %2502 = vrcp.f32 %v1510_v42  ;;  %v1511_v55 = vadd.f32 1.0, %v2483_v47  ;;  %1967 = vst [vmem:[%s3856_s8 + $0x18] sm:$0xff] %v1903_v50  ;;  %v1123_v6 = vadd.f32 %v3038_v8, %v1122_v39  ;;  %v1329_v16 = vsub.f32 0.0, %v1131_v63 }
 0x109   :  { %v2487_v58 = vpop.eup %2486  ;;  %2504 = vrcp.f32 %v1513_v48  ;;  %v1764_v61 = vmul.f32 %v2485_v52, %v1700_v10  ;;  %1965 = vst [vmem:[%s3856_s8 + $0x8] sm:$0xff] %v1901_v56  ;;  %v2338_v7 = vpop.f32.mrb[20].mxu1  ;;  %v1703_v48 = vmax.f32 %v3121_v38, 0.0 }
 0x10a   :  { %v2489_v3 = vpop.eup %2488  ;;  %2506 = vrcp.f32 %v1511_v55  ;;  %v1762_v4 = vmul.f32 %v2487_v58, %v1698_v22  ;;  %v3164_v10 = vpop.f32.mrb[17].mxu0  ;;  %v1327_v21 = vsub.f32 0.0, %v1123_v6  ;;  %v1412_v30 = vmul.f32 1.442695, %v1329_v16 }
 0x10b   :  { %v2491_v9 = vpop.eup %2490  ;;  %v1835_v13 = vmul.f32 %v3103_v1, %v1764_v61  ;;  %2508 = vpow2.f32 %v1410_v57  ;;  %v1765_v15 = vmul.f32 %v2489_v3, %v1701_v28  ;;  %v1135_v17 = vpop.f32.mrb[21].mxu1  ;;  %v1144_v40 = vadd.f32 %v2338_v7, %v3038_v8 }
 0x10c   :  { %v3169_v18 = vpop.f32.mrb[18].mxu0  ;;  %v2493_v2 = vpop.eup %2492  ;;  %v1833_v22 = vmul.f32 %v3103_v1, %v1762_v4  ;;  %2510 = vpow2.f32 %v1406_v62  ;;  %v1763_v19 = vmul.f32 %v2491_v9, %v1699_v34  ;;  %v1408_v23 = vmul.f32 1.442695, %v1327_v21 }
 0x10d   :  { %v2339_v24 = vpop.f32.mrb[22].mxu1  ;;  %v3174_v25 = vpop.f32.mrb[19].mxu0  ;;  %v1516_v26 = vadd.f32 1.0, %v2493_v2  ;;  %v1906_v20 = vadd.f32 %v3116_v14, %v1835_v13  ;;  %v1836_v28 = vmul.f32 %v3103_v1, %v1765_v15  ;;  %v1136_v45 = vadd.f32 %v3038_v8, %v1135_v17 }
 0x10e   :  { %v2495_v53 = vpop.eup %2494  ;;  %v1138_v31 = vpop.f32.mrb[23].mxu1  ;;  %v1904_v59 = vadd.f32 %v3116_v14, %v1833_v22  ;;  %v1834_v36 = vmul.f32 %v3103_v1, %v1763_v19  ;;  %v1332_v47 = vsub.f32 0.0, %v1144_v40  ;;  %v1147_v50 = vadd.f32 %v2339_v24, %v3038_v8 }
 0x10f   :  { %v2497_v32 = vpop.eup %2496  ;;  %v1514_v44 = vadd.f32 1.0, %v2495_v53  ;;  %2512 = vrcp.f32 %v1516_v26  ;;  %1970 = vst [vmem:[%s3856_s8 + $0x30] sm:$0xff] %v1906_v20  ;;  %v1907_v39 = vadd.f32 %v3116_v14, %v1836_v28  ;;  %v3195_v51 = vpop.f32.mrb[20].mxu0  ;;  %v1330_v56 = vsub.f32 0.0, %v1136_v45 }
 0x110   :  { %v2499_v34 = vpop.eup %2498  ;;  %v1517_v37 = vadd.f32 1.0, %v2497_v32  ;;  %1968 = vst [vmem:[%s3856_s8 + $0x20] sm:$0xff] %v1904_v59  ;;  %v1905_v46 = vadd.f32 %v3116_v14, %v1834_v36  ;;  %v1139_v57 = vadd.f32 %v3038_v8, %v1138_v31  ;;  %v3203_v61 = vpop.f32.mrb[21].mxu0  ;;  %v1418_v63 = vmul.f32 1.442695, %v1332_v47 }
 0x111   :  { %2514 = vrcp.f32 %v1514_v44  ;;  %v1515_v42 = vadd.f32 1.0, %v2499_v34  ;;  %v2501_v60 = vpop.eup %2500  ;;  %1971 = vst [vmem:[%s3856_s8 + $0x38] sm:$0xff] %v1907_v39  ;;  %v2342_v58 = vpop.f32.mrb[24].mxu1  ;;  %v1333_v3 = vsub.f32 0.0, %v1147_v50  ;;  %v1414_v9 = vmul.f32 1.442695, %v1330_v56 }
 0x112   :  { %2516 = vrcp.f32 %v1517_v37  ;;  %v2503_v52 = vpop.eup %2502  ;;  %1969 = vst [vmem:[%s3856_s8 + $0x28] sm:$0xff] %v1905_v46  ;;  %v1768_v55 = vmul.f32 %v2501_v60, %v1704_v43  ;;  %v1151_v4 = vpop.f32.mrb[25].mxu1  ;;  %v1331_v20 = vsub.f32 0.0, %v1139_v57  ;;  %v543_v28 = vadd.f32 %v3111_v12, %v3047_v27 }
 0x113   :  { %2518 = vrcp.f32 %v1515_v42  ;;  %v2505_v38 = vpop.eup %2504  ;;  %v1766_v62 = vmul.f32 %v2503_v52, %v1702_v5  ;;  %v3207_v6 = vpop.f32.mrb[22].mxu0  ;;  %v1420_v17 = vmul.f32 1.442695, %v1333_v3  ;;  %v535_v32 = vadd.f32 %v3047_v27, %v3123_v49 }
 0x114   :  { %2520 = vpow2.f32 %v1412_v30  ;;  %v2507_v7 = vpop.eup %2506  ;;  %v1839_v29 = vmul.f32 %v3103_v1, %v1768_v55  ;;  %v1769_v43 = vmul.f32 %v2505_v38, %v1705_v54  ;;  %v2343_v13 = vpop.f32.mrb[26].mxu1  ;;  %v1160_v44 = vadd.f32 %v2342_v58, %v3038_v8 }
 0x115   :  { %2522 = vpow2.f32 %v1408_v23  ;;  %v3212_v15 = vpop.f32.mrb[23].mxu0  ;;  %v2509_v16 = vpop.eup %2508  ;;  %v1837_v35 = vmul.f32 %v3103_v1, %v1766_v62  ;;  %v1767_v5 = vmul.f32 %v2507_v7, %v1703_v48  ;;  %v1416_v12 = vmul.f32 1.442695, %v1331_v20 }
 0x116   :  { %2524 = vpow2.f32 %v1418_v63  ;;  %v3215_v2 = vpop.f32.mrb[27].mxu1  ;;  %v2511_v22 = vpop.eup %2510  ;;  %v1520_v19 = vadd.f32 1.0, %v2509_v16  ;;  %v1910_v21 = vadd.f32 %v3116_v14, %v1839_v29  ;;  %v1840_v24 = vmul.f32 %v3103_v1, %v1769_v43 }
 0x117   :  { %2526 = vpow2.f32 %v1414_v9  ;;  %v1518_v11 = vadd.f32 1.0, %v2511_v22  ;;  %v1908_v54 = vadd.f32 %v3116_v14, %v1837_v35  ;;  %v1838_v53 = vmul.f32 %v3103_v1, %v1767_v5  ;;  %v3234_v59 = vpop.f32.mrb[24].mxu0 }
 0x118   :  { %2528 = vpow2.f32 %v1420_v17  ;;  %1974 = vst [vmem:[%s3856_s8 + $0x50] sm:$0xff] %v1910_v21  ;;  %v1911_v26 = vadd.f32 %v3116_v14, %v1840_v24  ;;  %v1708_v23 = vmax.f32 %v543_v28, 0.0  ;;  %v546_v34 = vadd.f32 %v3129_v41, %v3047_v27  ;;  %v3244_v40 = vpop.f32.mrb[25].mxu0 }
 0x119   :  { %2530 = vrcp.f32 %v1520_v19  ;;  %v2513_v30 = vpop.eup %2512  ;;  %1972 = vst [vmem:[%s3856_s8 + $0x40] sm:$0xff] %v1908_v54  ;;  %v1909_v31 = vadd.f32 %v3116_v14, %v1838_v53  ;;  %v1152_v37 = vadd.f32 %v3038_v8, %v1151_v4  ;;  %v3242_v39 = vpop.f32.mrb[28].mxu1  ;;  %v1706_v42 = vmax.f32 %v535_v32, 0.0 }
 0x11a   :  { %2532 = vrcp.f32 %v1518_v11  ;;  %1975 = vst [vmem:[%s3856_s8 + $0x58] sm:$0xff] %v1911_v26  ;;  %v1336_v46 = vsub.f32 0.0, %v1160_v44  ;;  %v538_v45 = vadd.f32 %v3047_v27, %v3135_v33  ;;  %v1163_v60 = vadd.f32 %v2343_v13, %v3038_v8  ;;  %v3252_v47 = vpop.f32.mrb[29].mxu1  ;;  %v3254_v41 = vpop.f32.mrb[26].mxu0 }
 0x11b   :  { %v2515_v36 = vpop.eup %2514  ;;  %1973 = vst [vmem:[%s3856_s8 + $0x48] sm:$0xff] %v1909_v31  ;;  %2534 = vpow2.f32 %v1416_v12  ;;  %v1772_v50 = vmul.f32 %v2513_v30, %v1708_v23  ;;  %v1709_v52 = vmax.f32 %v546_v34, 0.0  ;;  %v1334_v55 = vsub.f32 0.0, %v1152_v37  ;;  %v3256_v56 = vpop.f32.mrb[30].mxu1 }
 0x11c   :  { %v2517_v49 = vpop.eup %2516  ;;  %v3258_v57 = vpop.f32.mrb[27].mxu0  ;;  %v1770_v38 = vmul.f32 %v2515_v36, %v1706_v42  ;;  %v1426_v62 = vmul.f32 1.442695, %v1336_v46  ;;  %v1707_v63 = vmax.f32 %v538_v45, 0.0  ;;  %v1337_v33 = vsub.f32 0.0, %v1163_v60 }
 0x11d   :  { %v2519_v48 = vpop.eup %2518  ;;  %v3260_v3 = vpop.f32.mrb[31].mxu1  ;;  %v1843_v29 = vmul.f32 %v3103_v1, %v1772_v50  ;;  %v1773_v43 = vmul.f32 %v2517_v49, %v1709_v52  ;;  %v1422_v9 = vmul.f32 1.442695, %v1334_v55  ;;  %v1155_v23 = vadd.f32 %v3038_v8, %v3215_v2 }
 0x11e   :  { %v2521_v58 = vpop.eup %2520  ;;  %v1841_v35 = vmul.f32 %v3103_v1, %v1770_v38  ;;  %2536 = vpow2.f32 %v1426_v62  ;;  %v1771_v5 = vmul.f32 %v2519_v48, %v1707_v63  ;;  %v3268_v26 = vpop.f32.mrb[28].mxu0  ;;  %v1428_v31 = vmul.f32 1.442695, %v1337_v33 }
 0x11f   :  { %v2523_v4 = vpop.eup %2522  ;;  %v1521_v7 = vadd.f32 1.0, %v2521_v58  ;;  %v1914_v19 = vadd.f32 %v3116_v14, %v1843_v29  ;;  %v1844_v21 = vmul.f32 %v3103_v1, %v1773_v43  ;;  %v3276_v44 = vpop.f32.mrb[29].mxu0  ;;  %v559_v34 = vadd.f32 %v3155_v0, %v3047_v27 }
 0x120   :  { %v2525_v13 = vpop.eup %2524  ;;  %v1519_v16 = vadd.f32 1.0, %v2523_v4  ;;  %v1912_v54 = vadd.f32 %v3116_v14, %v1841_v35  ;;  %v1842_v53 = vmul.f32 %v3103_v1, %v1771_v5  ;;  %v3288_v49 = vpop.f32.mrb[30].mxu0  ;;  %v551_v42 = vadd.f32 %v3047_v27, %v3164_v10 }
 0x121   :  { %v2527_v17 = vpop.eup %2526  ;;  %2538 = vrcp.f32 %v1521_v7  ;;  %v1524_v22 = vadd.f32 1.0, %v2525_v13  ;;  %1978 = vst [vmem:[%s3856_s8 + $0x70] sm:$0xff] %v1914_v19  ;;  %v1915_v30 = vadd.f32 %v3116_v14, %v1844_v21  ;;  %v3274_v32 = vpop.f32.mrb[32].mxu1  ;;  %v1176_v46 = vadd.f32 %v3242_v39, %v3038_v8 }
 0x122   :  { %v2529_v24 = vpop.eup %2528  ;;  %2540 = vrcp.f32 %v1519_v16  ;;  %v1522_v11 = vadd.f32 1.0, %v2527_v17  ;;  %1976 = vst [vmem:[%s3856_s8 + $0x60] sm:$0xff] %v1912_v54  ;;  %v1913_v12 = vadd.f32 %v3116_v14, %v1842_v53  ;;  %v3286_v37 = vpop.f32.mrb[33].mxu1  ;;  %v562_v2 = vadd.f32 %v3169_v18, %v3047_v27 }
 0x123   :  { %v2531_v20 = vpop.eup %2530  ;;  %2542 = vrcp.f32 %v1524_v22  ;;  %v1525_v28 = vadd.f32 1.0, %v2529_v24  ;;  %1979 = vst [vmem:[%s3856_s8 + $0x78] sm:$0xff] %v1915_v30  ;;  %v3299_v45 = vpop.f32.mrb[34].mxu1  ;;  %v1335_v60 = vsub.f32 0.0, %v1155_v23  ;;  %v1712_v48 = vmax.f32 %v559_v34, 0.0 }
 0x124   :  { %v2533_v36 = vpop.eup %2532  ;;  %2544 = vrcp.f32 %v1522_v11  ;;  %v3301_v0 = vpop.f32.mrb[31].mxu0  ;;  %1977 = vst [vmem:[%s3856_s8 + $0x68] sm:$0xff] %v1913_v12  ;;  %v1168_v10 = vadd.f32 %v3038_v8, %v3252_v47  ;;  %v1710_v52 = vmax.f32 %v551_v42, 0.0  ;;  %v1340_v18 = vsub.f32 0.0, %v1176_v46 }
 0x125   :  { %2546 = vrcp.f32 %v1525_v28  ;;  %v3308_v50 = vpop.f32.mrb[35].mxu1  ;;  %v2535_v39 = vpop.eup %2534  ;;  %v1713_v55 = vmax.f32 %v562_v2, 0.0  ;;  %v1424_v38 = vmul.f32 1.442695, %v1335_v60  ;;  %v1776_v62 = vmul.f32 %v2531_v20, %v1712_v48 }
 0x126   :  { %2548 = vpow2.f32 %v1422_v9  ;;  %v1523_v58 = vadd.f32 1.0, %v2535_v39  ;;  %v1338_v63 = vsub.f32 0.0, %v1168_v10  ;;  %v1774_v33 = vmul.f32 %v2533_v36, %v1710_v52  ;;  %v3317_v16 = vpop.f32.mrb[32].mxu0 }
 0x127   :  { %2550 = vpow2.f32 %v1428_v31  ;;  %v1434_v4 = vmul.f32 1.442695, %v1340_v18  ;;  %v554_v7 = vadd.f32 %v3047_v27, %v3174_v25  ;;  %v1179_v29 = vadd.f32 %v3256_v56, %v3038_v8  ;;  %v3322_v19 = vpop.f32.mrb[33].mxu0 }
 0x128   :  { %v2537_v47 = vpop.eup %2536  ;;  %2552 = vrcp.f32 %v1523_v58  ;;  %v1847_v43 = vmul.f32 %v3103_v1, %v1776_v62  ;;  %v1430_v9 = vmul.f32 1.442695, %v1338_v63  ;;  %v1171_v13 = vadd.f32 %v3038_v8, %v3260_v3  ;;  %v3327_v3 = vpop.f32.mrb[34].mxu0 }
 0x129   :  { %v1528_v5 = vadd.f32 1.0, %v2537_v47  ;;  %2554 = vpow2.f32 %v1424_v38  ;;  %v1845_v17 = vmul.f32 %v3103_v1, %v1774_v33  ;;  %v1711_v22 = vmax.f32 %v554_v7, 0.0  ;;  %v3320_v25 = vpop.f32.mrb[36].mxu1  ;;  %v3332_v36 = vpop.f32.mrb[35].mxu0 }
 0x12a   :  { %v1918_v21 = vadd.f32 %v3116_v14, %v1847_v43  ;;  %2556 = vpow2.f32 %v1434_v4  ;;  %v1341_v11 = vsub.f32 0.0, %v1179_v29  ;;  %v3325_v54 = vpop.f32.mrb[37].mxu1  ;;  %v1339_v30 = vsub.f32 0.0, %v1171_v13 }
 0x12b   :  { %v2539_v35 = vpop.eup %2538  ;;  %2558 = vrcp.f32 %v1528_v5  ;;  %v1916_v20 = vadd.f32 %v3116_v14, %v1845_v17  ;;  %v3330_v31 = vpop.f32.mrb[38].mxu1  ;;  %v575_v42 = vadd.f32 %v3195_v51, %v3047_v27  ;;  %v567_v10 = vadd.f32 %v3047_v27, %v3203_v61 }
 0x12c   :  { %v2541_v56 = vpop.eup %2540  ;;  %v1777_v24 = vmul.f32 %v2539_v35, %v1713_v55  ;;  %1982 = vst [vmem:[%s3856_s8 + $0x90] sm:$0xff] %v1918_v21  ;;  %2560 = vpow2.f32 %v1430_v9  ;;  %v1436_v34 = vmul.f32 1.442695, %v1341_v11  ;;  %v3340_v46 = vpop.f32.mrb[39].mxu1  ;;  %v1432_v48 = vmul.f32 1.442695, %v1339_v30 }
 0x12d   :  { %v2543_v53 = vpop.eup %2542  ;;  %v1775_v28 = vmul.f32 %v2541_v56, %v1711_v22  ;;  %1980 = vst [vmem:[%s3856_s8 + $0x80] sm:$0xff] %v1916_v20  ;;  %v1192_v39 = vadd.f32 %v3274_v32, %v3038_v8  ;;  %v1716_v51 = vmax.f32 %v575_v42, 0.0  ;;  %v578_v55 = vadd.f32 %v3207_v6, %v3047_v27  ;;  %v3357_v7 = vpop.f32.mrb[36].mxu0 }
 0x12e   :  { %v2545_v12 = vpop.eup %2544  ;;  %v1848_v23 = vmul.f32 %v3103_v1, %v1777_v24  ;;  %2562 = vpow2.f32 %v1436_v34  ;;  %v1714_v63 = vmax.f32 %v567_v10, 0.0  ;;  %v1184_v29 = vadd.f32 %v3038_v8, %v3286_v37  ;;  %v3368_v9 = vpop.f32.mrb[37].mxu0 }
 0x12f   :  { %v2547_v2 = vpop.eup %2546  ;;  %v1846_v60 = vmul.f32 %v3103_v1, %v1775_v28  ;;  %2564 = vpow2.f32 %v1432_v48  ;;  %v1780_v61 = vmul.f32 %v2543_v53, %v1716_v51  ;;  %v1344_v32 = vsub.f32 0.0, %v1192_v39  ;;  %v3373_v56 = vpop.f32.mrb[38].mxu0 }
 0x130   :  { %v2549_v52 = vpop.eup %2548  ;;  %v1919_v18 = vadd.f32 %v3116_v14, %v1848_v23  ;;  %v1717_v4 = vmax.f32 %v578_v55, 0.0  ;;  %v1778_v6 = vmul.f32 %v2545_v12, %v1714_v63  ;;  %v570_v47 = vadd.f32 %v3047_v27, %v3212_v15  ;;  %v3380_v20 = vpop.f32.mrb[39].mxu0 }
 0x131   :  { %v2551_v58 = vpop.eup %2550  ;;  %v1526_v38 = vadd.f32 1.0, %v2549_v52  ;;  %v1917_v62 = vadd.f32 %v3116_v14, %v1846_v60  ;;  %v3366_v43 = vpop.f32.mrb[40].mxu1  ;;  %v1851_v35 = vmul.f32 %v3103_v1, %v1780_v61  ;;  %v1442_v5 = vmul.f32 1.442695, %v1344_v32 }
 0x132   :  { %v1529_v33 = vadd.f32 1.0, %v2551_v58  ;;  %1983 = vst [vmem:[%s3856_s8 + $0x98] sm:$0xff] %v1919_v18  ;;  %v2553_v13 = vpop.eup %2552  ;;  %v1781_v17 = vmul.f32 %v2547_v2, %v1717_v4  ;;  %v3371_v22 = vpop.f32.mrb[41].mxu1  ;;  %v1849_v37 = vmul.f32 %v3103_v1, %v1778_v6  ;;  %v1342_v24 = vsub.f32 0.0, %v1184_v29 }
 0x133   :  { %2566 = vrcp.f32 %v1526_v38  ;;  %1981 = vst [vmem:[%s3856_s8 + $0x88] sm:$0xff] %v1917_v62  ;;  %v2555_v21 = vpop.eup %2554  ;;  %v1715_v11 = vmax.f32 %v570_v47, 0.0  ;;  %v1195_v15 = vadd.f32 %v3299_v45, %v3038_v8  ;;  %v3378_v53 = vpop.f32.mrb[42].mxu1  ;;  %v1922_v12 = vadd.f32 %v3116_v14, %v1851_v35 }
 0x134   :  { %2568 = vrcp.f32 %v1529_v33  ;;  %v2557_v28 = vpop.eup %2556  ;;  %v1527_v30 = vadd.f32 1.0, %v2555_v21  ;;  %v1852_v23 = vmul.f32 %v3103_v1, %v1781_v17  ;;  %v3384_v34 = vpop.f32.mrb[43].mxu1  ;;  %v1920_v60 = vadd.f32 %v3116_v14, %v1849_v37 }
 0x135   :  { %2570 = vpow2.f32 %v1442_v5  ;;  %v2559_v42 = vpop.eup %2558  ;;  %v1532_v2 = vadd.f32 1.0, %v2557_v28  ;;  %v1438_v48 = vmul.f32 1.442695, %v1342_v24  ;;  %v1779_v10 = vmul.f32 %v2553_v13, %v1715_v11  ;;  %1986 = vst [vmem:[%s3856_s8 + $0xb0] sm:$0xff] %v1922_v12  ;;  %v3404_v33 = vpop.f32.mrb[40].mxu0 }
 0x136   :  { %v2561_v45 = vpop.eup %2560  ;;  %2572 = vrcp.f32 %v1527_v30  ;;  %v1923_v39 = vadd.f32 %v3116_v14, %v1852_v23  ;;  %v1345_v52 = vsub.f32 0.0, %v1195_v15  ;;  %v1187_v18 = vadd.f32 %v3038_v8, %v3308_v50  ;;  %1984 = vst [vmem:[%s3856_s8 + $0xa0] sm:$0xff] %v1920_v60  ;;  %v3409_v29 = vpop.f32.mrb[41].mxu0  ;;  %v3429_v12 = vld [vmem:[%s3852_s5] ss:$0 sm:$0xff] }
 0x137   :  { %2574 = vrcp.f32 %v1532_v2  ;;  %v1530_v51 = vadd.f32 1.0, %v2561_v45  ;;  %v1850_v55 = vmul.f32 %v3103_v1, %v1779_v10  ;;  %v591_v58 = vadd.f32 %v3234_v59, %v3047_v27  ;;  %v3413_v17 = vpop.f32.mrb[42].mxu0 }
 0x138   :  { %v2563_v38 = vpop.eup %2562  ;;  %1987 = vst [vmem:[%s3856_s8 + $0xb8] sm:$0xff] %v1923_v39  ;;  %2576 = vpow2.f32 %v1438_v48  ;;  %v1444_v62 = vmul.f32 1.442695, %v1345_v52  ;;  %v1343_v63 = vsub.f32 0.0, %v1187_v18  ;;  %v583_v50 = vadd.f32 %v3047_v27, %v3244_v40  ;;  %v3424_v15 = vpop.f32.mrb[43].mxu0 }
 0x139   :  { %v2565_v61 = vpop.eup %2564  ;;  %2578 = vrcp.f32 %v1530_v51  ;;  %v1533_v32 = vadd.f32 1.0, %v2563_v38  ;;  %v1921_v4 = vadd.f32 %v3116_v14, %v1850_v55  ;;  %v1720_v6 = vmax.f32 %v591_v58, 0.0  ;;  %v3407_v59 = vpop.f32.mrb[44].mxu1 }
 0x13a   :  { %v1531_v47 = vadd.f32 1.0, %v2565_v61  ;;  %2580 = vpow2.f32 %v1444_v62  ;;  %v1440_v13 = vmul.f32 1.442695, %v1343_v63  ;;  %v1718_v35 = vmax.f32 %v583_v50, 0.0  ;;  %v3411_v5 = vpop.f32.mrb[45].mxu1 }
 0x13b   :  { %2582 = vrcp.f32 %v1533_v32  ;;  %1985 = vst [vmem:[%s3856_s8 + $0xa8] sm:$0xff] %v1921_v4  ;;  %v1784_v21 = vmul.f32 %v2559_v42, %v1720_v6  ;;  %v1208_v37 = vadd.f32 %v3320_v25, %v3038_v8  ;;  %v594_v24 = vadd.f32 %v3254_v41, %v3047_v27  ;;  %v3422_v11 = vpop.f32.mrb[46].mxu1  ;;  %v3445_v62 = vpop.f32.mrb[44].mxu0  ;;  %v3454_v61 = vld [vmem:[%s3853_s3] ss:$0 sm:$0xff] }
 0x13c   :  { %2584 = vrcp.f32 %v1531_v47  ;;  %v1200_v23 = vadd.f32 %v3429_v12, %v3325_v54  ;;  %v586_v8 = vadd.f32 %v3047_v27, %v3258_v57  ;;  %v3435_v25 = vpop.f32.mrb[47].mxu1  ;;  %v1211_v39 = vadd.f32 %v3429_v12, %v3330_v31  ;;  %v3460_v4 = vpop.f32.mrb[45].mxu0 }
 0x13d   :  { %v2567_v40 = vpop.eup %2566  ;;  %2586 = vpow2.f32 %v1440_v13  ;;  %v1855_v41 = vmul.f32 %v3103_v1, %v1784_v21  ;;  %v1348_v42 = vsub.f32 0.0, %v1208_v37  ;;  %v1721_v2 = vmax.f32 %v594_v24, 0.0  ;;  %v3469_v21 = vpop.f32.mrb[46].mxu0 }
 0x13e   :  { %v2569_v28 = vpop.eup %2568  ;;  %v1782_v30 = vmul.f32 %v2567_v40, %v1718_v35  ;;  %v1346_v10 = vsub.f32 0.0, %v1200_v23  ;;  %v1719_v45 = vmax.f32 %v586_v8, 0.0  ;;  %v1349_v58 = vsub.f32 0.0, %v1211_v39  ;;  %v3475_v23 = vpop.f32.mrb[47].mxu0 }
 0x13f   :  { %v2571_v60 = vpop.eup %2570  ;;  %v1926_v54 = vadd.f32 %v3116_v14, %v1855_v41  ;;  %v1450_v18 = vmul.f32 1.442695, %v1348_v42  ;;  %v1785_v27 = vmul.f32 %v2569_v28, %v1721_v2  ;;  %v1203_v38 = vadd.f32 %v3429_v12, %v3340_v46 }
 0x140   :  { %v1853_v48 = vmul.f32 %v3103_v1, %v1782_v30  ;;  %v1536_v52 = vadd.f32 1.0, %v2571_v60  ;;  %v2573_v57 = vpop.eup %2572  ;;  %v1446_v55 = vmul.f32 1.442695, %v1346_v10  ;;  %v607_v32 = vadd.f32 %v3454_v61, %v3268_v26 }
 0x141   :  { %v2575_v63 = vpop.eup %2574  ;;  %1990 = vst [vmem:[%s3856_s8 + $0xd0] sm:$0xff] %v1926_v54  ;;  %v1856_v31 = vmul.f32 %v3103_v1, %v1785_v27  ;;  %v1783_v50 = vmul.f32 %v2573_v57, %v1719_v45  ;;  %v3458_v46 = vpop.f32.mrb[48].mxu1  ;;  %v1452_v47 = vmul.f32 1.442695, %v1349_v58  ;;  %v1347_v13 = vsub.f32 0.0, %v1203_v38 }
 0x142   :  { %v1924_v51 = vadd.f32 %v3116_v14, %v1853_v48  ;;  %2588 = vrcp.f32 %v1536_v52  ;;  %v2577_v6 = vpop.eup %2576  ;;  %v599_v35 = vadd.f32 %v3454_v61, %v3276_v44  ;;  %v3467_v40 = vpop.f32.mrb[49].mxu1  ;;  %v1724_v42 = vmax.f32 %v607_v32, 0.0 }
 0x143   :  { %2590 = vpow2.f32 %v1450_v18  ;;  %v2579_v26 = vpop.eup %2578  ;;  %v1534_v37 = vadd.f32 1.0, %v2577_v6  ;;  %v1927_v24 = vadd.f32 %v3116_v14, %v1856_v31  ;;  %v1854_v28 = vmul.f32 %v3103_v1, %v1783_v50  ;;  %v3473_v30 = vpop.f32.mrb[50].mxu1 }
 0x144   :  { %1988 = vst [vmem:[%s3856_s8 + $0xc0] sm:$0xff] %v1924_v51  ;;  %2592 = vpow2.f32 %v1446_v55  ;;  %v2581_v8 = vpop.eup %2580  ;;  %v1448_v41 = vmul.f32 1.442695, %v1347_v13  ;;  %v1722_v44 = vmax.f32 %v599_v35, 0.0  ;;  %v3477_v2 = vpop.f32.mrb[51].mxu1  ;;  %v1224_v45 = vadd.f32 %v3429_v12, %v3366_v43 }
 0x145   :  { %2594 = vpow2.f32 %v1452_v47  ;;  %v2583_v60 = vpop.eup %2582  ;;  %v1537_v48 = vadd.f32 1.0, %v2581_v8  ;;  %1991 = vst [vmem:[%s3856_s8 + $0xd8] sm:$0xff] %v1927_v24  ;;  %v1925_v10 = vadd.f32 %v3116_v14, %v1854_v28  ;;  %v1788_v52 = vmul.f32 %v2575_v63, %v1724_v42 }
 0x146   :  { %2596 = vrcp.f32 %v1534_v37  ;;  %v2585_v39 = vpop.eup %2584  ;;  %v1786_v54 = vmul.f32 %v2579_v26, %v1722_v44  ;;  %v610_v18 = vadd.f32 %v3454_v61, %v3288_v49  ;;  %v1352_v57 = vsub.f32 0.0, %v1224_v45  ;;  %v3496_v49 = vpop.f32.mrb[48].mxu0 }
 0x147   :  { %2598 = vpow2.f32 %v1448_v41  ;;  %v2587_v27 = vpop.eup %2586  ;;  %1989 = vst [vmem:[%s3856_s8 + $0xc8] sm:$0xff] %v1925_v10  ;;  %v1216_v51 = vadd.f32 %v3429_v12, %v3371_v22  ;;  %v602_v43 = vadd.f32 %v3454_v61, %v3301_v0  ;;  %v1859_v58 = vmul.f32 %v3103_v1, %v1788_v52  ;;  %v3502_v22 = vpop.f32.mrb[49].mxu0 }
 0x148   :  { %2600 = vrcp.f32 %v1537_v48  ;;  %v1535_v55 = vadd.f32 1.0, %v2587_v27  ;;  %v1857_v38 = vmul.f32 %v3103_v1, %v1786_v54  ;;  %v1725_v63 = vmax.f32 %v610_v18, 0.0  ;;  %v3508_v37 = vpop.f32.mrb[50].mxu0 }
 0x149   :  { %v1458_v31 = vmul.f32 1.442695, %v1352_v57  ;;  %v1350_v50 = vsub.f32 0.0, %v1216_v51  ;;  %v1723_v32 = vmax.f32 %v602_v43, 0.0  ;;  %v1227_v6 = vadd.f32 %v3429_v12, %v3378_v53  ;;  %v3500_v47 = vpop.f32.mrb[52].mxu1  ;;  %v3512_v42 = vpop.f32.mrb[51].mxu0 }
 0x14a   :  { %2602 = vrcp.f32 %v1535_v55  ;;  %v1930_v0 = vadd.f32 %v3116_v14, %v1859_v58  ;;  %v1928_v13 = vadd.f32 %v3116_v14, %v1857_v38  ;;  %v1789_v35 = vmul.f32 %v2583_v60, %v1725_v63  ;;  %v3506_v26 = vpop.f32.mrb[53].mxu1 }
 0x14b   :  { %2604 = vpow2.f32 %v1458_v31  ;;  %v1454_v28 = vmul.f32 1.442695, %v1350_v50  ;;  %v1787_v8 = vmul.f32 %v2585_v39, %v1723_v32  ;;  %v1353_v41 = vsub.f32 0.0, %v1227_v6  ;;  %v3510_v53 = vpop.f32.mrb[54].mxu1  ;;  %v3537_v32 = vpop.f32.mrb[52].mxu0 }
 0x14c   :  { %v2589_v24 = vpop.eup %2588  ;;  %1994 = vst [vmem:[%s3856_s8 + $0xf0] sm:$0xff] %v1930_v0  ;;  %1992 = vst [vmem:[%s3856_s8 + $0xe0] sm:$0xff] %v1928_v13  ;;  %v1860_v60 = vmul.f32 %v3103_v1, %v1789_v35  ;;  %v1219_v48 = vadd.f32 %v3429_v12, %v3384_v34  ;;  %v623_v10 = vadd.f32 %v3454_v61, %v3317_v16  ;;  %v3527_v39 = vpop.f32.mrb[55].mxu1 }
 0x14d   :  { %v2591_v44 = vpop.eup %2590  ;;  %v615_v45 = vadd.f32 %v3454_v61, %v3322_v19  ;;  %2606 = vpow2.f32 %v1454_v28  ;;  %v1858_v18 = vmul.f32 %v3103_v1, %v1787_v8  ;;  %v1460_v27 = vmul.f32 1.442695, %v1353_v41  ;;  %v3546_v28 = vpop.f32.mrb[53].mxu0 }
 0x14e   :  { %v2593_v52 = vpop.eup %2592  ;;  %v1540_v54 = vadd.f32 1.0, %v2591_v44  ;;  %v1931_v43 = vadd.f32 %v3116_v14, %v1860_v60  ;;  %v1351_v55 = vsub.f32 0.0, %v1219_v48  ;;  %v1728_v34 = vmax.f32 %v623_v10, 0.0  ;;  %v3558_v60 = vpop.f32.mrb[54].mxu0 }
 0x14f   :  { %v2595_v57 = vpop.eup %2594  ;;  %v1538_v51 = vadd.f32 1.0, %v2593_v52  ;;  %v1929_v38 = vadd.f32 %v3116_v14, %v1858_v18  ;;  %v1726_v19 = vmax.f32 %v615_v45, 0.0  ;;  %v1240_v50 = vadd.f32 %v3429_v12, %v3407_v59  ;;  %v3551_v59 = vld [vmem:[%s3854_s6] ss:$0 sm:$0xff]  ;;  %v3565_v52 = vpop.f32.mrb[55].mxu0 }
 0x150   :  { %v2597_v58 = vpop.eup %2596  ;;  %2608 = vrcp.f32 %v1540_v54  ;;  %v1541_v16 = vadd.f32 1.0, %v2595_v57  ;;  %1995 = vst [vmem:[%s3856_s8 + $0xf8] sm:$0xff] %v1931_v43  ;;  %v1456_v1 = vmul.f32 1.442695, %v1351_v55  ;;  %v1792_v31 = vmul.f32 %v2589_v24, %v1728_v34 }
 0x151   :  { %v2599_v63 = vpop.eup %2598  ;;  %2610 = vrcp.f32 %v1538_v51  ;;  %1993 = vst [vmem:[%s3856_s8 + $0xe8] sm:$0xff] %v1929_v38  ;;  %v1790_v14 = vmul.f32 %v2597_v58, %v1726_v19  ;;  %v626_v13 = vadd.f32 %v3454_v61, %v3327_v3  ;;  %v3544_v35 = vpop.f32.mrb[56].mxu1  ;;  %v1356_v8 = vsub.f32 0.0, %v1240_v50 }
 0x152   :  { %v2601_v6 = vpop.eup %2600  ;;  %2612 = vrcp.f32 %v1541_v16  ;;  %v1539_v0 = vadd.f32 1.0, %v2599_v63  ;;  %v1863_v24 = vmul.f32 %v3551_v59, %v1792_v31  ;;  %v1232_v41 = vadd.f32 %v3429_v12, %v3411_v5  ;;  %v3556_v44 = vpop.f32.mrb[57].mxu1  ;;  %v3570_v5 = vld [vmem:[%s3855_s7] ss:$0 sm:$0xff] }
 0x153   :  { %2614 = vpow2.f32 %v1460_v27  ;;  %v1861_v3 = vmul.f32 %v3551_v59, %v1790_v14  ;;  %v1729_v48 = vmax.f32 %v626_v13, 0.0  ;;  %v618_v10 = vadd.f32 %v3454_v61, %v3332_v36  ;;  %v3563_v45 = vpop.f32.mrb[58].mxu1  ;;  %v3591_v13 = vpop.f32.mrb[56].mxu0 }
 0x154   :  { %2616 = vrcp.f32 %v1539_v0  ;;  %v2603_v54 = vpop.eup %2602  ;;  %v1934_v18 = vadd.f32 %v3570_v5, %v1863_v24  ;;  %v1466_v27 = vmul.f32 1.442695, %v1356_v8  ;;  %v1354_v57 = vsub.f32 0.0, %v1232_v41  ;;  %v3573_v51 = vpop.f32.mrb[59].mxu1 }
 0x155   :  { %2618 = vpow2.f32 %v1456_v1  ;;  %v2605_v43 = vpop.eup %2604  ;;  %v1932_v36 = vadd.f32 %v3570_v5, %v1861_v3  ;;  %v1793_v55 = vmul.f32 %v2601_v6, %v1729_v48  ;;  %v1727_v34 = vmax.f32 %v618_v10, 0.0  ;;  %v3597_v48 = vpop.f32.mrb[57].mxu0 }
 0x156   :  { %v1243_v58 = vadd.f32 %v3429_v12, %v3422_v11  ;;  %v1544_v16 = vadd.f32 1.0, %v2605_v43  ;;  %1998 = vst [vmem:[%s3856_s8 + $0x110] sm:$0xff] %v1934_v18  ;;  %2620 = vpow2.f32 %v1466_v27  ;;  %v1462_v38 = vmul.f32 1.442695, %v1354_v57 }
 0x157   :  { %v1235_v19 = vadd.f32 %v3429_v12, %v3435_v25  ;;  %v2607_v63 = vpop.eup %2606  ;;  %1996 = vst [vmem:[%s3856_s8 + $0x100] sm:$0xff] %v1932_v36  ;;  %v1864_v1 = vmul.f32 %v3551_v59, %v1793_v55  ;;  %v1791_v31 = vmul.f32 %v2603_v54, %v1727_v34  ;;  %v639_v11 = vadd.f32 %v3454_v61, %v3357_v7 }
 0x158   :  { %v1357_v50 = vsub.f32 0.0, %v1243_v58  ;;  %2622 = vrcp.f32 %v1544_v16  ;;  %v1542_v6 = vadd.f32 1.0, %v2607_v63  ;;  %v631_v14 = vadd.f32 %v3454_v61, %v3368_v9  ;;  %v3601_v9 = vpop.f32.mrb[58].mxu0 }
 0x159   :  { %v1355_v0 = vsub.f32 0.0, %v1235_v19  ;;  %v1935_v24 = vadd.f32 %v3570_v5, %v1864_v1  ;;  %2624 = vpow2.f32 %v1462_v38  ;;  %v1862_v8 = vmul.f32 %v3551_v59, %v1791_v31  ;;  %v3595_v3 = vpop.f32.mrb[60].mxu1  ;;  %v3613_v58 = vpop.f32.mrb[59].mxu0 }
 0x15a   :  { %v2609_v25 = vpop.eup %2608  ;;  %v1468_v41 = vmul.f32 1.442695, %v1357_v50  ;;  %2626 = vrcp.f32 %v1542_v6  ;;  %v1732_v54 = vmax.f32 %v639_v11, 0.0  ;;  %v1730_v18 = vmax.f32 %v631_v14, 0.0  ;;  %v3599_v27 = vpop.f32.mrb[61].mxu1 }
 0x15b   :  { %v2611_v7 = vpop.eup %2610  ;;  %v1464_v10 = vmul.f32 1.442695, %v1355_v0  ;;  %1999 = vst [vmem:[%s3856_s8 + $0x118] sm:$0xff] %v1935_v24  ;;  %v1933_v43 = vadd.f32 %v3570_v5, %v1862_v8  ;;  %v1256_v36 = vadd.f32 %v3429_v12, %v3458_v46  ;;  %v642_v55 = vadd.f32 %v3454_v61, %v3373_v56  ;;  %v3611_v34 = vpop.f32.mrb[62].mxu1 }
 0x15c   :  { %v2613_v57 = vpop.eup %2612  ;;  %2628 = vpow2.f32 %v1468_v41  ;;  %v1796_v38 = vmul.f32 %v2609_v25, %v1732_v54  ;;  %v1794_v19 = vmul.f32 %v2611_v7, %v1730_v18  ;;  %v1248_v63 = vadd.f32 %v3429_v12, %v3467_v40  ;;  %v3617_v1 = vpop.f32.mrb[63].mxu1 }
 0x15d   :  { %v2615_v16 = vpop.eup %2614  ;;  %2630 = vpow2.f32 %v1464_v10  ;;  %1997 = vst [vmem:[%s3856_s8 + $0x108] sm:$0xff] %v1933_v43  ;;  %v1360_v56 = vsub.f32 0.0, %v1256_v36  ;;  %v1733_v46 = vmax.f32 %v642_v55, 0.0  ;;  %v634_v11 = vadd.f32 %v3454_v61, %v3380_v20  ;;  %v3630_v43 = vpop.f32.mrb[60].mxu0 }
 0x15e   :  { %v2617_v31 = vpop.eup %2616  ;;  %v1545_v50 = vadd.f32 1.0, %v2615_v16  ;;  %v1867_v0 = vmul.f32 %v3551_v59, %v1796_v38  ;;  %v1865_v14 = vmul.f32 %v3551_v59, %v1794_v19  ;;  %v1358_v25 = vsub.f32 0.0, %v1248_v63  ;;  %v3633_v38 = vpop.f32.mrb[61].mxu0 }
 0x15f   :  { %v2619_v6 = vpop.eup %2618  ;;  %v1259_v40 = vadd.f32 %v3429_v12, %v3473_v30  ;;  %v1474_v8 = vmul.f32 1.442695, %v1360_v56  ;;  %v1797_v41 = vmul.f32 %v2613_v57, %v1733_v46  ;;  %v1731_v20 = vmax.f32 %v634_v11, 0.0 }
 0x160   :  { %2632 = vrcp.f32 %v1545_v50  ;;  %v1543_v24 = vadd.f32 1.0, %v2619_v6  ;;  %v2621_v7 = vpop.eup %2620  ;;  %v1938_v10 = vadd.f32 %v3570_v5, %v1867_v0  ;;  %v1936_v54 = vadd.f32 %v3570_v5, %v1865_v14  ;;  %v3645_v50 = vpop.f32.mrb[62].mxu0 }
 0x161   :  { %v1470_v18 = vmul.f32 1.442695, %v1358_v25  ;;  %v1548_v36 = vadd.f32 1.0, %v2621_v7  ;;  %v1868_v55 = vmul.f32 %v3551_v59, %v1797_v41  ;;  %v1361_v16 = vsub.f32 0.0, %v1259_v40  ;;  %v3650_v0 = vpop.f32.mrb[63].mxu0 }
 0x162   :  { %2634 = vrcp.f32 %v1543_v24  ;;  %v2623_v30 = vpop.eup %2622  ;;  %2002 = vst [vmem:[%s3856_s8 + $0x130] sm:$0xff] %v1938_v10  ;;  %2000 = vst [vmem:[%s3856_s8 + $0x120] sm:$0xff] %v1936_v54  ;;  %v1795_v57 = vmul.f32 %v2617_v31, %v1731_v20  ;;  %v1251_v19 = vadd.f32 %v3429_v12, %v3477_v2  ;;  %v655_v63 = vadd.f32 %v3454_v61, %v3404_v33 }
 0x163   :  { %2636 = vpow2.f32 %v1474_v8  ;;  %v2625_v56 = vpop.eup %2624  ;;  %v1939_v46 = vadd.f32 %v3570_v5, %v1868_v55  ;;  %v1476_v11 = vmul.f32 1.442695, %v1361_v16  ;;  %v647_v6 = vadd.f32 %v3454_v61, %v3409_v29 }
 0x164   :  { %2638 = vrcp.f32 %v1548_v36  ;;  %v2627_v14 = vpop.eup %2626  ;;  %v1546_v31 = vadd.f32 1.0, %v2625_v56  ;;  %v1866_v2 = vmul.f32 %v3551_v59, %v1795_v57  ;;  %v1359_v25 = vsub.f32 0.0, %v1251_v19 }
 0x165   :  { %2640 = vpow2.f32 %v1470_v18  ;;  %2003 = vst [vmem:[%s3856_s8 + $0x138] sm:$0xff] %v1939_v46  ;;  %v1736_v33 = vmax.f32 %v655_v63, 0.0  ;;  %v1734_v24 = vmax.f32 %v647_v6, 0.0  ;;  %v1272_v8 = vadd.f32 %v3429_v12, %v3500_v47 }
 0x166   :  { %v2629_v40 = vpop.eup %2628  ;;  %2642 = vpow2.f32 %v1476_v11  ;;  %v1937_v7 = vadd.f32 %v3570_v5, %v1866_v2  ;;  %v1472_v10 = vmul.f32 1.442695, %v1359_v25  ;;  %v658_v55 = vadd.f32 %v3454_v61, %v3413_v17 }
 0x167   :  { %v2631_v29 = vpop.eup %2630  ;;  %2644 = vrcp.f32 %v1546_v31  ;;  %v1549_v41 = vadd.f32 1.0, %v2629_v40  ;;  %v1800_v18 = vmul.f32 %v2623_v30, %v1736_v33  ;;  %v1798_v20 = vmul.f32 %v2627_v14, %v1734_v24 }
 0x168   :  { %v1547_v54 = vadd.f32 1.0, %v2631_v29  ;;  %v1364_v36 = vsub.f32 0.0, %v1272_v8  ;;  %2001 = vst [vmem:[%s3856_s8 + $0x128] sm:$0xff] %v1937_v7  ;;  %v1264_v47 = vadd.f32 %v3429_v12, %v3506_v26  ;;  %v650_v16 = vadd.f32 %v3454_v61, %v3424_v15 }
 0x169   :  { %2646 = vrcp.f32 %v1549_v41  ;;  %v1871_v30 = vmul.f32 %v3551_v59, %v1800_v18  ;;  %v1869_v19 = vmul.f32 %v3551_v59, %v1798_v20  ;;  %v1737_v56 = vmax.f32 %v658_v55, 0.0 }
 0x16a   :  { %v2633_v57 = vpop.eup %2632  ;;  %2648 = vrcp.f32 %v1547_v54  ;;  %v1482_v63 = vmul.f32 1.442695, %v1364_v36  ;;  %v1362_v46 = vsub.f32 0.0, %v1264_v47  ;;  %v1735_v11 = vmax.f32 %v650_v16, 0.0 }
 0x16b   :  { %2650 = vpow2.f32 %v1472_v10  ;;  %v1942_v17 = vadd.f32 %v3570_v5, %v1871_v30  ;;  %v1940_v14 = vadd.f32 %v3570_v5, %v1869_v19  ;;  %v1275_v15 = vadd.f32 %v3429_v12, %v3510_v53 }
 0x16c   :  { %v2635_v6 = vpop.eup %2634  ;;  %2652 = vpow2.f32 %v1482_v63  ;;  %v1801_v31 = vmul.f32 %v2633_v57, %v1737_v56  ;;  %v1478_v2 = vmul.f32 1.442695, %v1362_v46  ;;  %v1267_v40 = vadd.f32 %v3429_v12, %v3527_v39 }
 0x16d   :  { %v2637_v26 = vpop.eup %2636  ;;  %v1799_v25 = vmul.f32 %v2635_v6, %v1735_v11  ;;  %2006 = vst [vmem:[%s3856_s8 + $0x150] sm:$0xff] %v1942_v17  ;;  %2004 = vst [vmem:[%s3856_s8 + $0x140] sm:$0xff] %v1940_v14  ;;  %v1365_v8 = vsub.f32 0.0, %v1275_v15  ;;  %v671_v53 = vadd.f32 %v3454_v61, %v3445_v62  ;;  %v663_v29 = vadd.f32 %v3454_v61, %v3460_v4 }
 0x16e   :  { %v2639_v33 = vpop.eup %2638  ;;  %v1552_v24 = vadd.f32 1.0, %v2637_v26  ;;  %v1872_v39 = vmul.f32 %v3551_v59, %v1801_v31  ;;  %2654 = vpow2.f32 %v1478_v2  ;;  %v1363_v10 = vsub.f32 0.0, %v1267_v40 }
 0x16f   :  { %v2641_v41 = vpop.eup %2640  ;;  %v1870_v7 = vmul.f32 %v3551_v59, %v1799_v25  ;;  %v1484_v20 = vmul.f32 1.442695, %v1365_v8  ;;  %v1740_v36 = vmax.f32 %v671_v53, 0.0  ;;  %v1738_v30 = vmax.f32 %v663_v29, 0.0 }
 0x170   :  { %v2643_v54 = vpop.eup %2642  ;;  %2656 = vrcp.f32 %v1552_v24  ;;  %v1550_v18 = vadd.f32 1.0, %v2641_v41  ;;  %v1943_v16 = vadd.f32 %v3570_v5, %v1872_v39  ;;  %v1480_v57 = vmul.f32 1.442695, %v1363_v10 }
 0x171   :  { %v2645_v55 = vpop.eup %2644  ;;  %v1553_v47 = vadd.f32 1.0, %v2643_v54  ;;  %v1941_v62 = vadd.f32 %v3570_v5, %v1870_v7  ;;  %v1804_v4 = vmul.f32 %v2639_v33, %v1740_v36  ;;  %v1288_v19 = vadd.f32 %v3429_v12, %v3544_v35 }
 0x172   :  { %2658 = vrcp.f32 %v1550_v18  ;;  %2007 = vst [vmem:[%s3856_s8 + $0x158] sm:$0xff] %v1943_v16  ;;  %v674_v56 = vadd.f32 %v3454_v61, %v3469_v21  ;;  %v1280_v46 = vadd.f32 %v3429_v12, %v3556_v44  ;;  %v666_v11 = vadd.f32 %v3454_v61, %v3475_v23 }
 0x173   :  { %v2647_v63 = vpop.eup %2646  ;;  %2660 = vrcp.f32 %v1553_v47  ;;  %2005 = vst [vmem:[%s3856_s8 + $0x148] sm:$0xff] %v1941_v62  ;;  %v1875_v6 = vmul.f32 %v3551_v59, %v1804_v4  ;;  %v1802_v17 = vmul.f32 %v2645_v55, %v1738_v30  ;;  %v1368_v14 = vsub.f32 0.0, %v1288_v19 }
 0x174   :  { %v2649_v35 = vpop.eup %2648  ;;  %2662 = vpow2.f32 %v1484_v20  ;;  %v1741_v26 = vmax.f32 %v674_v56, 0.0  ;;  %v1366_v31 = vsub.f32 0.0, %v1280_v46  ;;  %v1739_v2 = vmax.f32 %v666_v11, 0.0 }
 0x175   :  { %v2651_v15 = vpop.eup %2650  ;;  %2664 = vpow2.f32 %v1480_v57  ;;  %v1946_v21 = vadd.f32 %v3570_v5, %v1875_v6  ;;  %v1873_v44 = vmul.f32 %v3551_v59, %v1802_v17  ;;  %v1490_v33 = vmul.f32 1.442695, %v1368_v14 }
 0x176   :  { %v2653_v25 = vpop.eup %2652  ;;  %v1551_v40 = vadd.f32 1.0, %v2651_v15  ;;  %v1805_v23 = vmul.f32 %v2647_v63, %v1741_v26  ;;  %v1486_v8 = vmul.f32 1.442695, %v1366_v31  ;;  %v1803_v53 = vmul.f32 %v2649_v35, %v1739_v2 }
 0x177   :  { %v1556_v24 = vadd.f32 1.0, %v2653_v25  ;;  %2010 = vst [vmem:[%s3856_s8 + $0x170] sm:$0xff] %v1946_v21  ;;  %v1944_v29 = vadd.f32 %v3570_v5, %v1873_v44  ;;  %v1291_v41 = vadd.f32 %v3429_v12, %v3563_v45  ;;  %v1283_v39 = vadd.f32 %v3429_v12, %v3573_v51 }
 0x178   :  { %2666 = vrcp.f32 %v1551_v40  ;;  %v2655_v7 = vpop.eup %2654  ;;  %v1876_v10 = vmul.f32 %v3551_v59, %v1805_v23  ;;  %v1874_v54 = vmul.f32 %v3551_v59, %v1803_v53  ;;  %v687_v18 = vadd.f32 %v3454_v61, %v3496_v49 }
 0x179   :  { %2668 = vrcp.f32 %v1556_v24  ;;  %v1554_v36 = vadd.f32 1.0, %v2655_v7  ;;  %2008 = vst [vmem:[%s3856_s8 + $0x160] sm:$0xff] %v1944_v29  ;;  %v1369_v45 = vsub.f32 0.0, %v1291_v41  ;;  %v1367_v55 = vsub.f32 0.0, %v1283_v39 }
 0x17a   :  { %v2657_v20 = vpop.eup %2656  ;;  %2670 = vpow2.f32 %v1490_v33  ;;  %v1947_v51 = vadd.f32 %v3570_v5, %v1876_v10  ;;  %v1945_v47 = vadd.f32 %v3570_v5, %v1874_v54  ;;  %v1744_v16 = vmax.f32 %v687_v18, 0.0 }
 0x17b   :  { %2672 = vpow2.f32 %v1486_v8  ;;  %v1492_v57 = vmul.f32 1.442695, %v1369_v45  ;;  %v1488_v4 = vmul.f32 1.442695, %v1367_v55  ;;  %v679_v49 = vadd.f32 %v3454_v61, %v3502_v22 }
 0x17c   :  { %v2659_v62 = vpop.eup %2658  ;;  %2674 = vrcp.f32 %v1554_v36  ;;  %2011 = vst [vmem:[%s3856_s8 + $0x178] sm:$0xff] %v1947_v51  ;;  %2009 = vst [vmem:[%s3856_s8 + $0x168] sm:$0xff] %v1945_v47  ;;  %v1808_v19 = vmul.f32 %v2657_v20, %v1744_v16  ;;  %v1304_v63 = vadd.f32 %v3429_v12, %v3595_v3  ;;  %v690_v56 = vadd.f32 %v3454_v61, %v3508_v37 }
 0x17d   :  { %v2661_v30 = vpop.eup %2660  ;;  %v1296_v46 = vadd.f32 %v3429_v12, %v3599_v27  ;;  %2676 = vpow2.f32 %v1492_v57  ;;  %v1742_v11 = vmax.f32 %v679_v49, 0.0  ;;  %v682_v35 = vadd.f32 %v3454_v61, %v3512_v42 }
 0x17e   :  { %v2663_v22 = vpop.eup %2662  ;;  %v1307_v6 = vadd.f32 %v3429_v12, %v3611_v34  ;;  %2678 = vpow2.f32 %v1488_v4  ;;  %v1879_v3 = vmul.f32 %v3551_v59, %v1808_v19  ;;  %v1372_v15 = vsub.f32 0.0, %v1304_v63 }
 0x17f   :  { %v2665_v17 = vpop.eup %2664  ;;  %v1557_v14 = vadd.f32 1.0, %v2663_v22  ;;  %v1806_v37 = vmul.f32 %v2659_v62, %v1742_v11  ;;  %v1745_v31 = vmax.f32 %v690_v56, 0.0  ;;  %v1370_v2 = vsub.f32 0.0, %v1296_v46 }
 0x180   :  { %v1555_v26 = vadd.f32 1.0, %v2665_v17  ;;  %v1950_v27 = vadd.f32 %v3570_v5, %v1879_v3  ;;  %v1498_v25 = vmul.f32 1.442695, %v1372_v15  ;;  %v1743_v40 = vmax.f32 %v682_v35, 0.0 }
 0x181   :  { %2680 = vrcp.f32 %v1557_v14  ;;  %v1877_v42 = vmul.f32 %v3551_v59, %v1806_v37  ;;  %v1809_v34 = vmul.f32 %v2661_v30, %v1745_v31  ;;  %v1494_v44 = vmul.f32 1.442695, %v1370_v2 }
 0x182   :  { %v2667_v21 = vpop.eup %2666  ;;  %2682 = vrcp.f32 %v1555_v26  ;;  %2014 = vst [vmem:[%s3856_s8 + $0x190] sm:$0xff] %v1950_v27  ;;  %v1373_v23 = vsub.f32 0.0, %v1307_v6  ;;  %v1299_v8 = vadd.f32 %v3429_v12, %v3617_v1  ;;  %v703_v39 = vadd.f32 %v3454_v61, %v3537_v32 }
 0x183   :  { %v2669_v33 = vpop.eup %2668  ;;  %2684 = vpow2.f32 %v1498_v25  ;;  %v1807_v24 = vmul.f32 %v2667_v21, %v1743_v40  ;;  %v1948_v29 = vadd.f32 %v3570_v5, %v1877_v42  ;;  %v1880_v41 = vmul.f32 %v3551_v59, %v1809_v34 }
 0x184   :  { %v2671_v53 = vpop.eup %2670  ;;  %2686 = vpow2.f32 %v1494_v44  ;;  %v1500_v18 = vmul.f32 1.442695, %v1373_v23  ;;  %v1371_v20 = vsub.f32 0.0, %v1299_v8  ;;  %v1748_v1 = vmax.f32 %v703_v39, 0.0 }
 0x185   :  { %v2673_v7 = vpop.eup %2672  ;;  %v1560_v10 = vadd.f32 1.0, %v2671_v53  ;;  %v1878_v54 = vmul.f32 %v3551_v59, %v1807_v24  ;;  %2012 = vst [vmem:[%s3856_s8 + $0x180] sm:$0xff] %v1948_v29  ;;  %v1951_v12 = vadd.f32 %v3570_v5, %v1880_v41  ;;  %v695_v55 = vadd.f32 %v3454_v61, %v3546_v28 }
 0x186   :  { %v2675_v36 = vpop.eup %2674  ;;  %v1558_v45 = vadd.f32 1.0, %v2673_v7  ;;  %v1496_v51 = vmul.f32 1.442695, %v1371_v20  ;;  %v706_v47 = vadd.f32 %v3454_v61, %v3558_v60  ;;  %v1812_v62 = vmul.f32 %v2669_v33, %v1748_v1 }
 0x187   :  { %2688 = vrcp.f32 %v1560_v10  ;;  %v1949_v32 = vadd.f32 %v3570_v5, %v1878_v54  ;;  %v2677_v16 = vpop.eup %2676  ;;  %2015 = vst [vmem:[%s3856_s8 + $0x198] sm:$0xff] %v1951_v12  ;;  %v1746_v57 = vmax.f32 %v695_v55, 0.0  ;;  %v698_v4 = vadd.f32 %v3454_v61, %v3565_v52 }
 0x188   :  { %2690 = vrcp.f32 %v1558_v45  ;;  %v2679_v49 = vpop.eup %2678  ;;  %v1561_v28 = vadd.f32 1.0, %v2677_v16  ;;  %v1749_v30 = vmax.f32 %v706_v47, 0.0  ;;  %v719_v60 = vadd.f32 %v3454_v61, %v3591_v13 }
 0x189   :  { %2013 = vst [vmem:[%s3856_s8 + $0x188] sm:$0xff] %v1949_v32  ;;  %2692 = vpow2.f32 %v1500_v18  ;;  %v1559_v19 = vadd.f32 1.0, %v2679_v49  ;;  %v1883_v63 = vmul.f32 %v3551_v59, %v1812_v62  ;;  %v1810_v56 = vmul.f32 %v2675_v36, %v1746_v57 }
 0x18a   :  { %2694 = vpow2.f32 %v1496_v51  ;;  %v1747_v22 = vmax.f32 %v698_v4, 0.0  ;;  %v711_v52 = vadd.f32 %v3454_v61, %v3597_v48  ;;  %v1752_v48 = vmax.f32 %v719_v60, 0.0 }
 0x18b   :  { %v2681_v46 = vpop.eup %2680  ;;  %2696 = vrcp.f32 %v1561_v28  ;;  %v1954_v35 = vadd.f32 %v3570_v5, %v1883_v63  ;;  %v1881_v6 = vmul.f32 %v3551_v59, %v1810_v56  ;;  %v722_v40 = vadd.f32 %v3454_v61, %v3601_v9 }
 0x18c   :  { %v2683_v11 = vpop.eup %2682  ;;  %2698 = vrcp.f32 %v1559_v19  ;;  %v1813_v17 = vmul.f32 %v2681_v46, %v1749_v30  ;;  %v1750_v27 = vmax.f32 %v711_v52, 0.0  ;;  %v714_v34 = vadd.f32 %v3454_v61, %v3613_v58 }
 0x18d   :  { %v2685_v14 = vpop.eup %2684  ;;  %v1811_v13 = vmul.f32 %v2683_v11, %v1747_v22  ;;  %2018 = vst [vmem:[%s3856_s8 + $0x1b0] sm:$0xff] %v1954_v35  ;;  %v1952_v26 = vadd.f32 %v3570_v5, %v1881_v6  ;;  %v735_v9 = vadd.f32 %v3454_v61, %v3630_v43  ;;  %v1753_v58 = vmax.f32 %v722_v40, 0.0 }
 0x18e   :  { %v2687_v3 = vpop.eup %2686  ;;  %v1564_v15 = vadd.f32 1.0, %v2685_v14  ;;  %v1884_v37 = vmul.f32 %v3551_v59, %v1813_v17  ;;  %v727_v41 = vadd.f32 %v3454_v61, %v3633_v38  ;;  %v1751_v54 = vmax.f32 %v714_v34, 0.0 }
 0x18f   :  { %v1562_v31 = vadd.f32 1.0, %v2687_v3  ;;  %v1882_v2 = vmul.f32 %v3551_v59, %v1811_v13  ;;  %2016 = vst [vmem:[%s3856_s8 + $0x1a0] sm:$0xff] %v1952_v26  ;;  %v1756_v12 = vmax.f32 %v735_v9, 0.0  ;;  %v738_v57 = vadd.f32 %v3454_v61, %v3645_v50 }
 0x190   :  { %2700 = vrcp.f32 %v1564_v15  ;;  %v1955_v25 = vadd.f32 %v3570_v5, %v1884_v37  ;;  %v1754_v1 = vmax.f32 %v727_v41, 0.0  ;;  %v730_v49 = vadd.f32 %v3454_v61, %v3650_v0 }
 0x191   :  { %v2689_v21 = vpop.eup %2688  ;;  %2702 = vrcp.f32 %v1562_v31  ;;  %v1953_v42 = vadd.f32 %v3570_v5, %v1882_v2  ;;  %v1757_v19 = vmax.f32 %v738_v57, 0.0 }
 0x192   :  { %v2691_v44 = vpop.eup %2690  ;;  %2019 = vst [vmem:[%s3856_s8 + $0x1b8] sm:$0xff] %v1955_v25  ;;  %v1816_v33 = vmul.f32 %v2689_v21, %v1752_v48  ;;  %v1755_v56 = vmax.f32 %v730_v49, 0.0 }
 0x193   :  { %v2693_v24 = vpop.eup %2692  ;;  %2017 = vst [vmem:[%s3856_s8 + $0x1a8] sm:$0xff] %v1953_v42  ;;  %v1814_v23 = vmul.f32 %v2691_v44, %v1750_v27 }
 0x194   :  { %v2695_v8 = vpop.eup %2694  ;;  %v1565_v53 = vadd.f32 1.0, %v2693_v24  ;;  %v1887_v29 = vmul.f32 %v3551_v59, %v1816_v33 }
 0x195   :  { %v2697_v39 = vpop.eup %2696  ;;  %v1563_v7 = vadd.f32 1.0, %v2695_v8  ;;  %v1885_v10 = vmul.f32 %v3551_v59, %v1814_v23 }
 0x196   :  { %v2699_v18 = vpop.eup %2698  ;;  %2704 = vrcp.f32 %v1565_v53  ;;  %v1958_v20 = vadd.f32 %v3570_v5, %v1887_v29  ;;  %v1817_v36 = vmul.f32 %v2697_v39, %v1753_v58 }
 0x197   :  { %2706 = vrcp.f32 %v1563_v7  ;;  %v1956_v43 = vadd.f32 %v3570_v5, %v1885_v10  ;;  %v1815_v45 = vmul.f32 %v2699_v18, %v1751_v54 }
 0x198   :  { %2022 = vst [vmem:[%s3856_s8 + $0x1d0] sm:$0xff] %v1958_v20  ;;  %v1888_v38 = vmul.f32 %v3551_v59, %v1817_v36 }
 0x199   :  { %2020 = vst [vmem:[%s3856_s8 + $0x1c0] sm:$0xff] %v1956_v43  ;;  %v1886_v55 = vmul.f32 %v3551_v59, %v1815_v45 }
 0x19a   :  { %v2701_v32 = vpop.eup %2700  ;;  %v1959_v51 = vadd.f32 %v3570_v5, %v1888_v38 }
 0x19b   :  { %v2703_v47 = vpop.eup %2702  ;;  %v1957_v16 = vadd.f32 %v3570_v5, %v1886_v55  ;;  %v1820_v62 = vmul.f32 %v2701_v32, %v1756_v12 }
 0x19c   :  { %2023 = vst [vmem:[%s3856_s8 + $0x1d8] sm:$0xff] %v1959_v51  ;;  %v1818_v4 = vmul.f32 %v2703_v47, %v1754_v1 }
 0x19d   :  { %2021 = vst [vmem:[%s3856_s8 + $0x1c8] sm:$0xff] %v1957_v16  ;;  %v1891_v28 = vmul.f32 %v3551_v59, %v1820_v62 }
 0x19e   :  { %v1889_v30 = vmul.f32 %v3551_v59, %v1818_v4 }
 0x19f   :  { %v1962_v60 = vadd.f32 %v3570_v5, %v1891_v28 }
 0x1a0   :  { %v2705_v50 = vpop.eup %2704  ;;  %v1960_v63 = vadd.f32 %v3570_v5, %v1889_v30 }
 0x1a1   :  { %v2707_v46 = vpop.eup %2706  ;;  %2026 = vst [vmem:[%s3856_s8 + $0x1f0] sm:$0xff] %v1962_v60  ;;  %v1821_v61 = vmul.f32 %v2705_v50, %v1757_v19 }
 0x1a2   :  { %2024 = vst [vmem:[%s3856_s8 + $0x1e0] sm:$0xff] %v1960_v63  ;;  %v1819_v0 = vmul.f32 %v2707_v46, %v1755_v56 }
 0x1a3   :  { %v1892_v22 = vmul.f32 %v3551_v59, %v1821_v61 }
 0x1a4   :  { %v1890_v52 = vmul.f32 %v3551_v59, %v1819_v0 }
 0x1a5   :  { %v1963_v11 = vadd.f32 %v3570_v5, %v1892_v22 }
 0x1a6   :  { %v1961_v35 = vadd.f32 %v3570_v5, %v1890_v52 }
 0x1a7   :  { %2027 = vst [vmem:[%s3856_s8 + $0x1f8] sm:$0xff] %v1963_v11 }
 0x1a8   :  { %2025 = vst [vmem:[%s3856_s8 + $0x1e8] sm:$0xff] %v1961_v35 }

</bundles_post_ra>
